<compile_context>
chip_gen: v7x
topology: tpu7x:2x2x1
jax: 0.10.0
libtpu: 0.0.40
codegen_flags: <defaults>
</compile_context>

<pallas_src>
import functools

import jax
import jax.numpy as jnp
from jax.experimental import pallas as pl
from jax.experimental.pallas import tpu as pltpu


def _erf_f32(x):
    # Abramowitz & Stegun 7.1.26; |error| < 1.5e-7 (well inside the 1e-3 check).
    a1, a2, a3, a4, a5 = 0.254829592, -0.284496736, 1.421413741, -1.453152027, 1.061405429
    p = 0.3275911
    sgn = jnp.where(x >= 0.0, 1.0, -1.0)
    ax = jnp.abs(x)
    t = 1.0 / (1.0 + p * ax)
    poly = ((((a5 * t + a4) * t + a3) * t + a2) * t + a1) * t
    return sgn * (1.0 - poly * jnp.exp(-ax * ax))


# ----------------------------- fused Pallas kernel ---------------------------

def _block_kernel(x_ref, kv_w_ref, kv_b_ref, kv_dw_ref, q_ref, temp_ref,
                  amask_ref, proj_w_ref, ffn_w_ref, ffn_b_ref, ffn_dw_ref,
                  ffn_out_w_ref, mask9_ref, o_ref, *, H, W, hidden):
    f32 = jnp.float32
    C = o_ref.shape[1]
    HW = H * W

    x = x_ref[0].astype(f32)                       # (C, HW) channel-major, lane-dense

    # Hoisted once (reused by all four dwconv calls): the 9 tap boundary masks.
    m9 = mask9_ref[...]                            # (9, HW) = row-valid * col-valid
    tap_mask = [m9[j:j + 1, :] for j in range(9)]

    def layer_norm(t):
        # Affine-free LN over channels (gamma/beta folded into the next 1x1 conv).
        # Single pass: var = E[x^2] - mu^2; rsqrt runs on the EUP.
        mu = jnp.mean(t, axis=0, keepdims=True)
        ms = jnp.mean(t * t, axis=0, keepdims=True)
        var = ms - mu * mu
        return (t - mu) * jax.lax.rsqrt(var + 1e-5)

    def dwconv3x3(t, w):
        # 3x3 depthwise conv (padding=1) on (C2, HW) via lane rolls + edge masks.
        # t: (C2, HW), w: (C2, 9) with tap column j = (dh+1)*3 + (dw+1).
        acc = t * w[:, 4:5]                        # centre tap: no roll, no mask
        for dh in (-1, 0, 1):
            for dw in (-1, 0, 1):
                if dh == 0 and dw == 0:
                    continue
                d = dh * W + dw
                j = (dh + 1) * 3 + (dw + 1)
                s = pltpu.roll(t, (-d) % HW, axis=1)   # out[n] = t[(n + d) mod HW]
                acc = acc + s * tap_mask[j] * w[:, j:j + 1]
        return acc

    # --------------- attention branch: x = x + proj(attn(norm1(x))) ----------
    xn = layer_norm(x)
    kv_w = kv_w_ref[...]                           # (2C, C), LN1 gamma folded in
    kv_b = kv_b_ref[...]                           # (2C, 1), = kv_w @ LN1 beta
    kv_dw = kv_dw_ref[...]                         # (2C, 9)
    k = dwconv3x3(jnp.dot(kv_w[:C], xn, preferred_element_type=f32) + kv_b[:C],
                  kv_dw[:C])
    v = dwconv3x3(jnp.dot(kv_w[C:], xn, preferred_element_type=f32) + kv_b[C:],
                  kv_dw[C:])

    # F.normalize(k, dim=-1): L2 over (h w) with eps clamp, rsqrt on the EUP.
    ss = jnp.sum(k * k, axis=-1, keepdims=True)
    kn = k * jax.lax.rsqrt(jnp.maximum(ss, 1e-24))

    # Fused multi-head attention: one (C,C) score matrix, per-row temperature,
    # additive block-diagonal mask (-1e30 off-head) -> single softmax.
    q = q_ref[...]                                 # (C, HW), heads stacked by rows
    s = jax.lax.dot_general(q, kn, (((1,), (1,)), ((), ())),
                            preferred_element_type=f32)          # (C, C)
    s = s * temp_ref[...] + amask_ref[...]
    s = s - jnp.max(s, axis=-1, keepdims=True)
    e = jnp.exp(s)
    p = e * pl.reciprocal(jnp.sum(e, axis=-1, keepdims=True), approx=False)
    out = jnp.dot(p, v, preferred_element_type=f32)              # (C, HW)
    # TODO(synk): DynamicHPF is not defined in the reference source; treated as identity.
    x = x + jnp.dot(proj_w_ref[...], out, preferred_element_type=f32)

    # --------------------- FFN branch: x = x + ffn(norm2(x)) -----------------
    xn2 = layer_norm(x)
    ffn_w = ffn_w_ref[...]                         # (2*hidden, C), LN2 gamma folded
    ffn_b = ffn_b_ref[...]                         # (2*hidden, 1)
    ffn_dw = ffn_dw_ref[...]                       # (2*hidden, 9)
    # x1 / x2 halves handled separately: halves the live vreg set in the tap loops.
    x1 = dwconv3x3(jnp.dot(ffn_w[:hidden], xn2, preferred_element_type=f32)
                   + ffn_b[:hidden], ffn_dw[:hidden])
    g1 = 0.5 * x1 * (1.0 + _erf_f32(x1 * 0.7071067811865476))     # exact GELU
    x2 = dwconv3x3(jnp.dot(ffn_w[hidden:], xn2, preferred_element_type=f32)
                   + ffn_b[hidden:], ffn_dw[hidden:])
    x = x + jnp.dot(ffn_out_w_ref[...], g1 * x2, preferred_element_type=f32)

    o_ref[0] = x.astype(o_ref.dtype)


# ------------------------------ wrapper --------------------------------------

def transformer_block(x, params, num_heads):
    """x: (B, C, H, W) float32 (NCHW, like the PyTorch module)."""
    B, C, H, W = x.shape
    HW = H * W
    hidden = params['ffn_out_w'].shape[1]
    cper = C // num_heads
    twoC, twoH = 2 * C, 2 * hidden
    f32 = jnp.float32

    x_cm = x.reshape(B, C, HW)                 # 'b c h w -> b c (h w)' (no transpose)

    # Nearest-neighbour F.interpolate of the learned query (input-independent):
    # (1, heads, cper, 48) -> (C, HW), heads stacked along rows; shared over batch.
    src = (jnp.arange(HW) * params['q'].shape[-1]) // HW
    q_interp = params['q'][0][..., src].reshape(C, HW).astype(f32)

    # Per-row temperature and block-diagonal additive mask for the fused attention.
    temp_rows = jnp.repeat(params['temperature'].astype(f32), cper).reshape(C, 1)
    head_id = jnp.arange(C) // cper
    amask = jnp.where(head_id[:, None] == head_id[None, :], 0.0, -1e30).astype(f32)

    # (9, HW) boundary masks for the roll-based depthwise conv (row & col validity).
    row = jnp.arange(HW) // W
    col = jnp.arange(HW) % W
    m = []
    for dh in (-1, 0, 1):
        rv = (row + dh >= 0) & (row + dh < H)
        for dw in (-1, 0, 1):
            cv = (col + dw >= 0) & (col + dw < W)
            m.append((rv & cv).astype(f32))
    mask9 = jnp.stack(m, axis=0)

    # Fold the LayerNorm affine (gamma, beta) into the following 1x1 convs.
    kv_w_f = params['kv_w'].astype(f32) * params['ln1_w'].astype(f32)[None, :]
    kv_b = (params['kv_w'].astype(f32) @ params['ln1_b'].astype(f32)).reshape(twoC, 1)
    ffn_w_f = params['ffn_in_w'].astype(f32) * params['ln2_w'].astype(f32)[None, :]
    ffn_b = (params['ffn_in_w'].astype(f32) @ params['ln2_b'].astype(f32)).reshape(twoH, 1)

    kern = functools.partial(_block_kernel, H=H, W=W, hidden=hidden)

    out = pl.pallas_call(
        kern,
        out_shape=jax.ShapeDtypeStruct((B, C, HW), x.dtype),
        grid=(B,),
        in_specs=[
            pl.BlockSpec((1, C, HW), lambda b: (b, 0, 0)),     # x
            pl.BlockSpec((twoC, C), lambda b: (0, 0)),         # kv_w (LN1 gamma folded)
            pl.BlockSpec((twoC, 1), lambda b: (0, 0)),         # kv bias (from LN1 beta)
            pl.BlockSpec((twoC, 9), lambda b: (0, 0)),         # kv depthwise weights
            pl.BlockSpec((C, HW), lambda b: (0, 0)),           # interpolated q (shared)
            pl.BlockSpec((C, 1), lambda b: (0, 0)),            # per-row temperature
            pl.BlockSpec((C, C), lambda b: (0, 0)),            # block-diagonal mask
            pl.BlockSpec((C, C), lambda b: (0, 0)),            # proj_w
            pl.BlockSpec((twoH, C), lambda b: (0, 0)),         # ffn_in_w (LN2 folded)
            pl.BlockSpec((twoH, 1), lambda b: (0, 0)),         # ffn bias (from LN2 beta)
            pl.BlockSpec((twoH, 9), lambda b: (0, 0)),         # ffn depthwise weights
            pl.BlockSpec((C, hidden), lambda b: (0, 0)),       # ffn_out_w
            pl.BlockSpec((9, HW), lambda b: (0, 0)),           # dwconv boundary masks
        ],
        out_specs=pl.BlockSpec((1, C, HW), lambda b: (b, 0, 0)),
        compiler_params=pltpu.CompilerParams(
            dimension_semantics=("parallel",)),
    )(x_cm, kv_w_f, kv_b, params['kv_dw_w'].reshape(twoC, 9).astype(f32),
      q_interp, temp_rows, amask, params['proj_w'].astype(f32),
      ffn_w_f, ffn_b, params['ffn_dw_w'].reshape(twoH, 9).astype(f32),
      params['ffn_out_w'].astype(f32), mask9)

    return out.reshape(B, C, H, W)


# -------------------------- pure-JAX reference -------------------------------

def reference(x, params, num_heads):
    B, C, H, W = x.shape
    HW = H * W
    cper = C // num_heads
    hidden = params['ffn_out_w'].shape[1]
    xt = x.reshape(B, C, HW)

    def ln(t, w, b):
        mu = jnp.mean(t, axis=1, keepdims=True)
        var = jnp.mean((t - mu) ** 2, axis=1, keepdims=True)
        return (t - mu) / jnp.sqrt(var + 1e-5) * w[None, :, None] + b[None, :, None]

    def pconv(t, w):                          # w: (Cout, Cin)
        return jnp.einsum('oc,bcn->bon', w, t)

    def dwconv(t, w):                         # w: (C2, 3, 3)
        C2 = t.shape[1]
        tn = t.reshape(B, C2, H, W)
        tp = jnp.pad(tn, ((0, 0), (0, 0), (1, 1), (1, 1)))
        acc = jnp.zeros_like(tn)
        for kh in range(3):
            for kw in range(3):
                acc = acc + tp[:, :, kh:kh + H, kw:kw + W] * w[None, :, kh, kw, None, None]
        return acc.reshape(B, C2, HW)

    xn = ln(xt, params['ln1_w'], params['ln1_b'])
    kv = dwconv(pconv(xn, params['kv_w']), params['kv_dw_w'])
    k, v = kv[:, :C], kv[:, C:]
    k = k.reshape(B, num_heads, cper, HW)
    v = v.reshape(B, num_heads, cper, HW)
    src = (jnp.arange(HW) * params['q'].shape[-1]) // HW
    q = jnp.broadcast_to(params['q'][..., src], (B, num_heads, cper, HW))
    kn = k / jnp.maximum(jnp.sqrt(jnp.sum(k * k, -1, keepdims=True)), 1e-12)
    attn = jnp.einsum('bhcn,bhdn->bhcd', q, kn) * params['temperature'][None, :, None, None]
    attn = jax.nn.softmax(attn, axis=-1)
    out = jnp.einsum('bhcd,bhdn->bhcn', attn, v).reshape(B, C, HW)
    xt = xt + pconv(out, params['proj_w'])

    xn2 = ln(xt, params['ln2_w'], params['ln2_b'])
    hid = dwconv(pconv(xn2, params['ffn_in_w']), params['ffn_dw_w'])
    x1, x2 = hid[:, :hidden], hid[:, hidden:]
    xt = xt + pconv(jax.nn.gelu(x1, approximate=False) * x2, params['ffn_out_w'])
    return xt.reshape(B, C, H, W)


# ---------------------------------- main --------------------------------------

if __name__ == "__main__":
    B, C, H, W = 2, 16, 16, 16                # dim=16
    num_heads = 2
    ffn_expansion_factor = 2
    hidden = int(C * ffn_expansion_factor)
    cper = C // num_heads

    key = jax.random.PRNGKey(0)
    ks = jax.random.split(key, 16)
    f32 = jnp.float32
    params = {
        'ln1_w': 1.0 + 0.1 * jax.random.normal(ks[0], (C,), f32),
        'ln1_b': 0.1 * jax.random.normal(ks[1], (C,), f32),
        'kv_w': 0.25 * jax.random.normal(ks[2], (2 * C, C), f32),          # (Cout, Cin)
        'kv_dw_w': 0.2 * jax.random.normal(ks[3], (2 * C, 3, 3), f32),     # (C2, 3, 3)
        'q': jax.random.uniform(ks[4], (1, num_heads, cper, 48), f32),
        'temperature': 1.0 + 0.1 * jax.random.normal(ks[5], (num_heads,), f32),
        'proj_w': 0.25 * jax.random.normal(ks[6], (C, C), f32),
        'ln2_w': 1.0 + 0.1 * jax.random.normal(ks[7], (C,), f32),
        'ln2_b': 0.1 * jax.random.normal(ks[8], (C,), f32),
        'ffn_in_w': 0.25 * jax.random.normal(ks[9], (2 * hidden, C), f32),
        'ffn_dw_w': 0.2 * jax.random.normal(ks[10], (2 * hidden, 3, 3), f32),
        'ffn_out_w': 0.18 * jax.random.normal(ks[11], (C, hidden), f32),
    }
    x = jax.random.normal(ks[12], (B, C, H, W), f32)

    out = jax.block_until_ready(transformer_block(x, params, num_heads))
    ref = jax.block_until_ready(reference(x, params, num_heads))

    err = float(jnp.max(jnp.abs(out - ref)))
    if not (out.shape == (B, C, H, W) and err < 1e-3):
        raise AssertionError(f"mismatch vs reference: max_abs_err={err}")

    print("KERNEL_OK")
</pallas_src>

<mosaic_0001>
module attributes {stable_mosaic.version = 11 : i64} {
  func.func @_block_kernel(%arg0: i32, %arg1: memref<1x16x256xf32, #tpu.memory_space<vmem>>, %arg2: memref<32x16xf32, #tpu.memory_space<vmem>>, %arg3: memref<32x1xf32, #tpu.memory_space<vmem>>, %arg4: memref<32x9xf32, #tpu.memory_space<vmem>>, %arg5: memref<16x256xf32, #tpu.memory_space<vmem>>, %arg6: memref<16x1xf32, #tpu.memory_space<vmem>>, %arg7: memref<16x16xf32, #tpu.memory_space<vmem>>, %arg8: memref<16x16xf32, #tpu.memory_space<vmem>>, %arg9: memref<64x16xf32, #tpu.memory_space<vmem>>, %arg10: memref<64x1xf32, #tpu.memory_space<vmem>>, %arg11: memref<64x9xf32, #tpu.memory_space<vmem>>, %arg12: memref<16x32xf32, #tpu.memory_space<vmem>>, %arg13: memref<9x256xf32, #tpu.memory_space<vmem>>, %arg14: memref<1x16x256xf32, #tpu.memory_space<vmem>>) attributes {dimension_semantics = [#tpu.dimension_semantics<parallel>], iteration_bounds = array<i64: 2>, scalar_prefetch = 0 : i64, scratch_operands = 0 : i64, tpu.core_type = #tpu.core_type<tc>, window_params = [{transform_indices = @transform_0, window_bounds = array<i64: 1, 16, 256>}, {pipeline_mode = #tpu.pipeline_mode<synchronous>, transform_indices = @transform_1, window_bounds = array<i64: 32, 16>}, {pipeline_mode = #tpu.pipeline_mode<synchronous>, transform_indices = @transform_2, window_bounds = array<i64: 32, 1>}, {pipeline_mode = #tpu.pipeline_mode<synchronous>, transform_indices = @transform_3, window_bounds = array<i64: 32, 9>}, {pipeline_mode = #tpu.pipeline_mode<synchronous>, transform_indices = @transform_4, window_bounds = array<i64: 16, 256>}, {pipeline_mode = #tpu.pipeline_mode<synchronous>, transform_indices = @transform_5, window_bounds = array<i64: 16, 1>}, {pipeline_mode = #tpu.pipeline_mode<synchronous>, transform_indices = @transform_6, window_bounds = array<i64: 16, 16>}, {pipeline_mode = #tpu.pipeline_mode<synchronous>, transform_indices = @transform_7, window_bounds = array<i64: 16, 16>}, {pipeline_mode = #tpu.pipeline_mode<synchronous>, transform_indices = @transform_8, window_bounds = array<i64: 64, 16>}, {pipeline_mode = #tpu.pipeline_mode<synchronous>, transform_indices = @transform_9, window_bounds = array<i64: 64, 1>}, {pipeline_mode = #tpu.pipeline_mode<synchronous>, transform_indices = @transform_10, window_bounds = array<i64: 64, 9>}, {pipeline_mode = #tpu.pipeline_mode<synchronous>, transform_indices = @transform_11, window_bounds = array<i64: 16, 32>}, {pipeline_mode = #tpu.pipeline_mode<synchronous>, transform_indices = @transform_12, window_bounds = array<i64: 9, 256>}, {transform_indices = @transform_13, window_bounds = array<i64: 1, 16, 256>}]} {
    %c0 = arith.constant 0 : index
    %c0_0 = arith.constant 0 : index
    %c0_1 = arith.constant 0 : index
    %0 = vector.load %arg1[%c0, %c0_0, %c0_1] : memref<1x16x256xf32, #tpu.memory_space<vmem>>, vector<1x16x256xf32>
    %1 = vector.shape_cast %0 : vector<1x16x256xf32> to vector<16x256xf32>
    %c0_2 = arith.constant 0 : index
    %c0_3 = arith.constant 0 : index
    %2 = vector.load %arg13[%c0_2, %c0_3] : memref<9x256xf32, #tpu.memory_space<vmem>>, vector<9x256xf32>
    %3 = vector.extract_strided_slice %2 {offsets = [0, 0], sizes = [1, 256], strides = [1, 1]} : vector<9x256xf32> to vector<1x256xf32>
    %4 = vector.extract_strided_slice %2 {offsets = [1, 0], sizes = [1, 256], strides = [1, 1]} : vector<9x256xf32> to vector<1x256xf32>
    %5 = vector.extract_strided_slice %2 {offsets = [2, 0], sizes = [1, 256], strides = [1, 1]} : vector<9x256xf32> to vector<1x256xf32>
    %6 = vector.extract_strided_slice %2 {offsets = [3, 0], sizes = [1, 256], strides = [1, 1]} : vector<9x256xf32> to vector<1x256xf32>
    %7 = vector.extract_strided_slice %2 {offsets = [5, 0], sizes = [1, 256], strides = [1, 1]} : vector<9x256xf32> to vector<1x256xf32>
    %8 = vector.extract_strided_slice %2 {offsets = [6, 0], sizes = [1, 256], strides = [1, 1]} : vector<9x256xf32> to vector<1x256xf32>
    %9 = vector.extract_strided_slice %2 {offsets = [7, 0], sizes = [1, 256], strides = [1, 1]} : vector<9x256xf32> to vector<1x256xf32>
    %10 = vector.extract_strided_slice %2 {offsets = [8, 0], sizes = [1, 256], strides = [1, 1]} : vector<9x256xf32> to vector<1x256xf32>
    %cst = arith.constant dense<0.000000e+00> : vector<256xf32>
    %11 = vector.multi_reduction <add>, %1, %cst [0] : vector<16x256xf32> to vector<256xf32>
    %12 = vector.shape_cast %11 : vector<256xf32> to vector<1x256xf32>
    %cst_4 = arith.constant 1.600000e+01 : f32
    %13 = vector.broadcast %cst_4 : f32 to vector<1x256xf32>
    %14 = arith.divf %12, %13 : vector<1x256xf32>
    %15 = arith.mulf %1, %1 : vector<16x256xf32>
    %cst_5 = arith.constant dense<0.000000e+00> : vector<256xf32>
    %16 = vector.multi_reduction <add>, %15, %cst_5 [0] : vector<16x256xf32> to vector<256xf32>
    %17 = vector.shape_cast %16 : vector<256xf32> to vector<1x256xf32>
    %cst_6 = arith.constant 1.600000e+01 : f32
    %18 = vector.broadcast %cst_6 : f32 to vector<1x256xf32>
    %19 = arith.divf %17, %18 : vector<1x256xf32>
    %20 = arith.mulf %14, %14 : vector<1x256xf32>
    %21 = arith.subf %19, %20 : vector<1x256xf32>
    %22 = vector.broadcast %14 : vector<1x256xf32> to vector<16x256xf32>
    %23 = arith.subf %1, %22 : vector<16x256xf32>
    %cst_7 = arith.constant 9.99999974E-6 : f32
    %24 = vector.broadcast %cst_7 : f32 to vector<1x256xf32>
    %25 = arith.addf %21, %24 : vector<1x256xf32>
    %26 = math.rsqrt %25 : vector<1x256xf32>
    %27 = vector.broadcast %26 : vector<1x256xf32> to vector<16x256xf32>
    %28 = arith.mulf %23, %27 : vector<16x256xf32>
    %c0_8 = arith.constant 0 : index
    %c0_9 = arith.constant 0 : index
    %29 = vector.load %arg2[%c0_8, %c0_9] : memref<32x16xf32, #tpu.memory_space<vmem>>, vector<32x16xf32>
    %c0_10 = arith.constant 0 : index
    %c0_11 = arith.constant 0 : index
    %30 = vector.load %arg3[%c0_10, %c0_11] : memref<32x1xf32, #tpu.memory_space<vmem>>, vector<32x1xf32>
    %c0_12 = arith.constant 0 : index
    %c0_13 = arith.constant 0 : index
    %31 = vector.load %arg4[%c0_12, %c0_13] : memref<32x9xf32, #tpu.memory_space<vmem>>, vector<32x9xf32>
    %32 = vector.extract_strided_slice %29 {offsets = [0, 0], sizes = [16, 16], strides = [1, 1]} : vector<32x16xf32> to vector<16x16xf32>
    %cst_14 = arith.constant dense<0.000000e+00> : vector<16x256xf32>
    %33 = tpu.matmul %32, %28, %cst_14 {dimension_numbers = #tpu.dot_dimension_numbers<[1], [0], [0], [1], [0, 0, 1, 1], [], []>} : vector<16x16xf32>, vector<16x256xf32>, vector<16x256xf32> -> vector<16x256xf32>
    %34 = vector.extract_strided_slice %30 {offsets = [0, 0], sizes = [16, 1], strides = [1, 1]} : vector<32x1xf32> to vector<16x1xf32>
    %35 = vector.broadcast %34 : vector<16x1xf32> to vector<16x256xf32>
    %36 = arith.addf %33, %35 : vector<16x256xf32>
    %37 = vector.extract_strided_slice %31 {offsets = [0, 0], sizes = [16, 9], strides = [1, 1]} : vector<32x9xf32> to vector<16x9xf32>
    %38 = vector.extract_strided_slice %37 {offsets = [0, 4], sizes = [16, 1], strides = [1, 1]} : vector<16x9xf32> to vector<16x1xf32>
    %39 = vector.broadcast %38 : vector<16x1xf32> to vector<16x256xf32>
    %40 = arith.mulf %36, %39 : vector<16x256xf32>
    %c17_i32 = arith.constant 17 : i32
    %41 = tpu.dynamic_rotate %36 by %c17_i32 dim 1 : vector<16x256xf32>, i32 -> vector<16x256xf32>
    %42 = vector.broadcast %3 : vector<1x256xf32> to vector<16x256xf32>
    %43 = arith.mulf %41, %42 : vector<16x256xf32>
    %44 = vector.extract_strided_slice %37 {offsets = [0, 0], sizes = [16, 1], strides = [1, 1]} : vector<16x9xf32> to vector<16x1xf32>
    %45 = vector.broadcast %44 : vector<16x1xf32> to vector<16x256xf32>
    %46 = arith.mulf %43, %45 : vector<16x256xf32>
    %47 = arith.addf %40, %46 : vector<16x256xf32>
    %c16_i32 = arith.constant 16 : i32
    %48 = tpu.dynamic_rotate %36 by %c16_i32 dim 1 : vector<16x256xf32>, i32 -> vector<16x256xf32>
    %49 = vector.broadcast %4 : vector<1x256xf32> to vector<16x256xf32>
    %50 = arith.mulf %48, %49 : vector<16x256xf32>
    %51 = vector.extract_strided_slice %37 {offsets = [0, 1], sizes = [16, 1], strides = [1, 1]} : vector<16x9xf32> to vector<16x1xf32>
    %52 = vector.broadcast %51 : vector<16x1xf32> to vector<16x256xf32>
    %53 = arith.mulf %50, %52 : vector<16x256xf32>
    %54 = arith.addf %47, %53 : vector<16x256xf32>
    %c15_i32 = arith.constant 15 : i32
    %55 = tpu.dynamic_rotate %36 by %c15_i32 dim 1 : vector<16x256xf32>, i32 -> vector<16x256xf32>
    %56 = vector.broadcast %5 : vector<1x256xf32> to vector<16x256xf32>
    %57 = arith.mulf %55, %56 : vector<16x256xf32>
    %58 = vector.extract_strided_slice %37 {offsets = [0, 2], sizes = [16, 1], strides = [1, 1]} : vector<16x9xf32> to vector<16x1xf32>
    %59 = vector.broadcast %58 : vector<16x1xf32> to vector<16x256xf32>
    %60 = arith.mulf %57, %59 : vector<16x256xf32>
    %61 = arith.addf %54, %60 : vector<16x256xf32>
    %c1_i32 = arith.constant 1 : i32
    %62 = tpu.dynamic_rotate %36 by %c1_i32 dim 1 : vector<16x256xf32>, i32 -> vector<16x256xf32>
    %63 = vector.broadcast %6 : vector<1x256xf32> to vector<16x256xf32>
    %64 = arith.mulf %62, %63 : vector<16x256xf32>
    %65 = vector.extract_strided_slice %37 {offsets = [0, 3], sizes = [16, 1], strides = [1, 1]} : vector<16x9xf32> to vector<16x1xf32>
    %66 = vector.broadcast %65 : vector<16x1xf32> to vector<16x256xf32>
    %67 = arith.mulf %64, %66 : vector<16x256xf32>
    %68 = arith.addf %61, %67 : vector<16x256xf32>
    %c255_i32 = arith.constant 255 : i32
    %69 = tpu.dynamic_rotate %36 by %c255_i32 dim 1 : vector<16x256xf32>, i32 -> vector<16x256xf32>
    %70 = vector.broadcast %7 : vector<1x256xf32> to vector<16x256xf32>
    %71 = arith.mulf %69, %70 : vector<16x256xf32>
    %72 = vector.extract_strided_slice %37 {offsets = [0, 5], sizes = [16, 1], strides = [1, 1]} : vector<16x9xf32> to vector<16x1xf32>
    %73 = vector.broadcast %72 : vector<16x1xf32> to vector<16x256xf32>
    %74 = arith.mulf %71, %73 : vector<16x256xf32>
    %75 = arith.addf %68, %74 : vector<16x256xf32>
    %c241_i32 = arith.constant 241 : i32
    %76 = tpu.dynamic_rotate %36 by %c241_i32 dim 1 : vector<16x256xf32>, i32 -> vector<16x256xf32>
    %77 = vector.broadcast %8 : vector<1x256xf32> to vector<16x256xf32>
    %78 = arith.mulf %76, %77 : vector<16x256xf32>
    %79 = vector.extract_strided_slice %37 {offsets = [0, 6], sizes = [16, 1], strides = [1, 1]} : vector<16x9xf32> to vector<16x1xf32>
    %80 = vector.broadcast %79 : vector<16x1xf32> to vector<16x256xf32>
    %81 = arith.mulf %78, %80 : vector<16x256xf32>
    %82 = arith.addf %75, %81 : vector<16x256xf32>
    %c240_i32 = arith.constant 240 : i32
    %83 = tpu.dynamic_rotate %36 by %c240_i32 dim 1 : vector<16x256xf32>, i32 -> vector<16x256xf32>
    %84 = vector.broadcast %9 : vector<1x256xf32> to vector<16x256xf32>
    %85 = arith.mulf %83, %84 : vector<16x256xf32>
    %86 = vector.extract_strided_slice %37 {offsets = [0, 7], sizes = [16, 1], strides = [1, 1]} : vector<16x9xf32> to vector<16x1xf32>
    %87 = vector.broadcast %86 : vector<16x1xf32> to vector<16x256xf32>
    %88 = arith.mulf %85, %87 : vector<16x256xf32>
    %89 = arith.addf %82, %88 : vector<16x256xf32>
    %c239_i32 = arith.constant 239 : i32
    %90 = tpu.dynamic_rotate %36 by %c239_i32 dim 1 : vector<16x256xf32>, i32 -> vector<16x256xf32>
    %91 = vector.broadcast %10 : vector<1x256xf32> to vector<16x256xf32>
    %92 = arith.mulf %90, %91 : vector<16x256xf32>
    %93 = vector.extract_strided_slice %37 {offsets = [0, 8], sizes = [16, 1], strides = [1, 1]} : vector<16x9xf32> to vector<16x1xf32>
    %94 = vector.broadcast %93 : vector<16x1xf32> to vector<16x256xf32>
    %95 = arith.mulf %92, %94 : vector<16x256xf32>
    %96 = arith.addf %89, %95 : vector<16x256xf32>
    %97 = vector.extract_strided_slice %29 {offsets = [16, 0], sizes = [16, 16], strides = [1, 1]} : vector<32x16xf32> to vector<16x16xf32>
    %cst_15 = arith.constant dense<0.000000e+00> : vector<16x256xf32>
    %98 = tpu.matmul %97, %28, %cst_15 {dimension_numbers = #tpu.dot_dimension_numbers<[1], [0], [0], [1], [0, 0, 1, 1], [], []>} : vector<16x16xf32>, vector<16x256xf32>, vector<16x256xf32> -> vector<16x256xf32>
    %99 = vector.extract_strided_slice %30 {offsets = [16, 0], sizes = [16, 1], strides = [1, 1]} : vector<32x1xf32> to vector<16x1xf32>
    %100 = vector.broadcast %99 : vector<16x1xf32> to vector<16x256xf32>
    %101 = arith.addf %98, %100 : vector<16x256xf32>
    %102 = vector.extract_strided_slice %31 {offsets = [16, 0], sizes = [16, 9], strides = [1, 1]} : vector<32x9xf32> to vector<16x9xf32>
    %103 = vector.extract_strided_slice %102 {offsets = [0, 4], sizes = [16, 1], strides = [1, 1]} : vector<16x9xf32> to vector<16x1xf32>
    %104 = vector.broadcast %103 : vector<16x1xf32> to vector<16x256xf32>
    %105 = arith.mulf %101, %104 : vector<16x256xf32>
    %c17_i32_16 = arith.constant 17 : i32
    %106 = tpu.dynamic_rotate %101 by %c17_i32_16 dim 1 : vector<16x256xf32>, i32 -> vector<16x256xf32>
    %107 = vector.broadcast %3 : vector<1x256xf32> to vector<16x256xf32>
    %108 = arith.mulf %106, %107 : vector<16x256xf32>
    %109 = vector.extract_strided_slice %102 {offsets = [0, 0], sizes = [16, 1], strides = [1, 1]} : vector<16x9xf32> to vector<16x1xf32>
    %110 = vector.broadcast %109 : vector<16x1xf32> to vector<16x256xf32>
    %111 = arith.mulf %108, %110 : vector<16x256xf32>
    %112 = arith.addf %105, %111 : vector<16x256xf32>
    %c16_i32_17 = arith.constant 16 : i32
    %113 = tpu.dynamic_rotate %101 by %c16_i32_17 dim 1 : vector<16x256xf32>, i32 -> vector<16x256xf32>
    %114 = vector.broadcast %4 : vector<1x256xf32> to vector<16x256xf32>
    %115 = arith.mulf %113, %114 : vector<16x256xf32>
    %116 = vector.extract_strided_slice %102 {offsets = [0, 1], sizes = [16, 1], strides = [1, 1]} : vector<16x9xf32> to vector<16x1xf32>
    %117 = vector.broadcast %116 : vector<16x1xf32> to vector<16x256xf32>
    %118 = arith.mulf %115, %117 : vector<16x256xf32>
    %119 = arith.addf %112, %118 : vector<16x256xf32>
    %c15_i32_18 = arith.constant 15 : i32
    %120 = tpu.dynamic_rotate %101 by %c15_i32_18 dim 1 : vector<16x256xf32>, i32 -> vector<16x256xf32>
    %121 = vector.broadcast %5 : vector<1x256xf32> to vector<16x256xf32>
    %122 = arith.mulf %120, %121 : vector<16x256xf32>
    %123 = vector.extract_strided_slice %102 {offsets = [0, 2], sizes = [16, 1], strides = [1, 1]} : vector<16x9xf32> to vector<16x1xf32>
    %124 = vector.broadcast %123 : vector<16x1xf32> to vector<16x256xf32>
    %125 = arith.mulf %122, %124 : vector<16x256xf32>
    %126 = arith.addf %119, %125 : vector<16x256xf32>
    %c1_i32_19 = arith.constant 1 : i32
    %127 = tpu.dynamic_rotate %101 by %c1_i32_19 dim 1 : vector<16x256xf32>, i32 -> vector<16x256xf32>
    %128 = vector.broadcast %6 : vector<1x256xf32> to vector<16x256xf32>
    %129 = arith.mulf %127, %128 : vector<16x256xf32>
    %130 = vector.extract_strided_slice %102 {offsets = [0, 3], sizes = [16, 1], strides = [1, 1]} : vector<16x9xf32> to vector<16x1xf32>
    %131 = vector.broadcast %130 : vector<16x1xf32> to vector<16x256xf32>
    %132 = arith.mulf %129, %131 : vector<16x256xf32>
    %133 = arith.addf %126, %132 : vector<16x256xf32>
    %c255_i32_20 = arith.constant 255 : i32
    %134 = tpu.dynamic_rotate %101 by %c255_i32_20 dim 1 : vector<16x256xf32>, i32 -> vector<16x256xf32>
    %135 = vector.broadcast %7 : vector<1x256xf32> to vector<16x256xf32>
    %136 = arith.mulf %134, %135 : vector<16x256xf32>
    %137 = vector.extract_strided_slice %102 {offsets = [0, 5], sizes = [16, 1], strides = [1, 1]} : vector<16x9xf32> to vector<16x1xf32>
    %138 = vector.broadcast %137 : vector<16x1xf32> to vector<16x256xf32>
    %139 = arith.mulf %136, %138 : vector<16x256xf32>
    %140 = arith.addf %133, %139 : vector<16x256xf32>
    %c241_i32_21 = arith.constant 241 : i32
    %141 = tpu.dynamic_rotate %101 by %c241_i32_21 dim 1 : vector<16x256xf32>, i32 -> vector<16x256xf32>
    %142 = vector.broadcast %8 : vector<1x256xf32> to vector<16x256xf32>
    %143 = arith.mulf %141, %142 : vector<16x256xf32>
    %144 = vector.extract_strided_slice %102 {offsets = [0, 6], sizes = [16, 1], strides = [1, 1]} : vector<16x9xf32> to vector<16x1xf32>
    %145 = vector.broadcast %144 : vector<16x1xf32> to vector<16x256xf32>
    %146 = arith.mulf %143, %145 : vector<16x256xf32>
    %147 = arith.addf %140, %146 : vector<16x256xf32>
    %c240_i32_22 = arith.constant 240 : i32
    %148 = tpu.dynamic_rotate %101 by %c240_i32_22 dim 1 : vector<16x256xf32>, i32 -> vector<16x256xf32>
    %149 = vector.broadcast %9 : vector<1x256xf32> to vector<16x256xf32>
    %150 = arith.mulf %148, %149 : vector<16x256xf32>
    %151 = vector.extract_strided_slice %102 {offsets = [0, 7], sizes = [16, 1], strides = [1, 1]} : vector<16x9xf32> to vector<16x1xf32>
    %152 = vector.broadcast %151 : vector<16x1xf32> to vector<16x256xf32>
    %153 = arith.mulf %150, %152 : vector<16x256xf32>
    %154 = arith.addf %147, %153 : vector<16x256xf32>
    %c239_i32_23 = arith.constant 239 : i32
    %155 = tpu.dynamic_rotate %101 by %c239_i32_23 dim 1 : vector<16x256xf32>, i32 -> vector<16x256xf32>
    %156 = vector.broadcast %10 : vector<1x256xf32> to vector<16x256xf32>
    %157 = arith.mulf %155, %156 : vector<16x256xf32>
    %158 = vector.extract_strided_slice %102 {offsets = [0, 8], sizes = [16, 1], strides = [1, 1]} : vector<16x9xf32> to vector<16x1xf32>
    %159 = vector.broadcast %158 : vector<16x1xf32> to vector<16x256xf32>
    %160 = arith.mulf %157, %159 : vector<16x256xf32>
    %161 = arith.addf %154, %160 : vector<16x256xf32>
    %162 = arith.mulf %96, %96 : vector<16x256xf32>
    %cst_24 = arith.constant dense<0.000000e+00> : vector<16xf32>
    %163 = vector.multi_reduction <add>, %162, %cst_24 [1] : vector<16x256xf32> to vector<16xf32>
    %164 = vector.shape_cast %163 : vector<16xf32> to vector<16x1xf32>
    %cst_25 = arith.constant 1.000000e-24 : f32
    %165 = vector.broadcast %cst_25 : f32 to vector<16x1xf32>
    %166 = arith.maximumf %164, %165 : vector<16x1xf32>
    %167 = math.rsqrt %166 : vector<16x1xf32>
    %168 = vector.broadcast %167 : vector<16x1xf32> to vector<16x256xf32>
    %169 = arith.mulf %96, %168 : vector<16x256xf32>
    %c0_26 = arith.constant 0 : index
    %c0_27 = arith.constant 0 : index
    %170 = vector.load %arg5[%c0_26, %c0_27] : memref<16x256xf32, #tpu.memory_space<vmem>>, vector<16x256xf32>
    %cst_28 = arith.constant dense<0.000000e+00> : vector<16x16xf32>
    %171 = tpu.matmul %170, %169, %cst_28 {dimension_numbers = #tpu.dot_dimension_numbers<[1], [1], [0], [0], [0, 0, 1, 0], [], []>} : vector<16x256xf32>, vector<16x256xf32>, vector<16x16xf32> -> vector<16x16xf32>
    %c0_29 = arith.constant 0 : index
    %c0_30 = arith.constant 0 : index
    %172 = vector.load %arg6[%c0_29, %c0_30] : memref<16x1xf32, #tpu.memory_space<vmem>>, vector<16x1xf32>
    %173 = vector.broadcast %172 : vector<16x1xf32> to vector<16x16xf32>
    %174 = arith.mulf %171, %173 : vector<16x16xf32>
    %c0_31 = arith.constant 0 : index
    %c0_32 = arith.constant 0 : index
    %175 = vector.load %arg7[%c0_31, %c0_32] : memref<16x16xf32, #tpu.memory_space<vmem>>, vector<16x16xf32>
    %176 = arith.addf %174, %175 : vector<16x16xf32>
    %cst_33 = arith.constant dense<0xFF800000> : vector<16xf32>
    %177 = vector.multi_reduction <maximumf>, %176, %cst_33 [1] : vector<16x16xf32> to vector<16xf32>
    %178 = vector.shape_cast %177 : vector<16xf32> to vector<16x1xf32>
    %179 = vector.broadcast %178 : vector<16x1xf32> to vector<16x16xf32>
    %180 = arith.subf %176, %179 : vector<16x16xf32>
    %181 = math.exp %180 : vector<16x16xf32>
    %cst_34 = arith.constant dense<0.000000e+00> : vector<16xf32>
    %182 = vector.multi_reduction <add>, %181, %cst_34 [1] : vector<16x16xf32> to vector<16xf32>
    %183 = vector.shape_cast %182 : vector<16xf32> to vector<16x1xf32>
    %184 = tpu.reciprocal %183 : vector<16x1xf32> -> vector<16x1xf32>
    %185 = vector.broadcast %184 : vector<16x1xf32> to vector<16x16xf32>
    %186 = arith.mulf %181, %185 : vector<16x16xf32>
    %cst_35 = arith.constant dense<0.000000e+00> : vector<16x256xf32>
    %187 = tpu.matmul %186, %161, %cst_35 {dimension_numbers = #tpu.dot_dimension_numbers<[1], [0], [0], [1], [0, 0, 1, 1], [], []>} : vector<16x16xf32>, vector<16x256xf32>, vector<16x256xf32> -> vector<16x256xf32>
    %c0_36 = arith.constant 0 : index
    %c0_37 = arith.constant 0 : index
    %188 = vector.load %arg8[%c0_36, %c0_37] : memref<16x16xf32, #tpu.memory_space<vmem>>, vector<16x16xf32>
    %cst_38 = arith.constant dense<0.000000e+00> : vector<16x256xf32>
    %189 = tpu.matmul %188, %187, %cst_38 {dimension_numbers = #tpu.dot_dimension_numbers<[1], [0], [0], [1], [0, 0, 1, 1], [], []>} : vector<16x16xf32>, vector<16x256xf32>, vector<16x256xf32> -> vector<16x256xf32>
    %190 = arith.addf %1, %189 : vector<16x256xf32>
    %cst_39 = arith.constant dense<0.000000e+00> : vector<256xf32>
    %191 = vector.multi_reduction <add>, %190, %cst_39 [0] : vector<16x256xf32> to vector<256xf32>
    %192 = vector.shape_cast %191 : vector<256xf32> to vector<1x256xf32>
    %cst_40 = arith.constant 1.600000e+01 : f32
    %193 = vector.broadcast %cst_40 : f32 to vector<1x256xf32>
    %194 = arith.divf %192, %193 : vector<1x256xf32>
    %195 = arith.mulf %190, %190 : vector<16x256xf32>
    %cst_41 = arith.constant dense<0.000000e+00> : vector<256xf32>
    %196 = vector.multi_reduction <add>, %195, %cst_41 [0] : vector<16x256xf32> to vector<256xf32>
    %197 = vector.shape_cast %196 : vector<256xf32> to vector<1x256xf32>
    %cst_42 = arith.constant 1.600000e+01 : f32
    %198 = vector.broadcast %cst_42 : f32 to vector<1x256xf32>
    %199 = arith.divf %197, %198 : vector<1x256xf32>
    %200 = arith.mulf %194, %194 : vector<1x256xf32>
    %201 = arith.subf %199, %200 : vector<1x256xf32>
    %202 = vector.broadcast %194 : vector<1x256xf32> to vector<16x256xf32>
    %203 = arith.subf %190, %202 : vector<16x256xf32>
    %cst_43 = arith.constant 9.99999974E-6 : f32
    %204 = vector.broadcast %cst_43 : f32 to vector<1x256xf32>
    %205 = arith.addf %201, %204 : vector<1x256xf32>
    %206 = math.rsqrt %205 : vector<1x256xf32>
    %207 = vector.broadcast %206 : vector<1x256xf32> to vector<16x256xf32>
    %208 = arith.mulf %203, %207 : vector<16x256xf32>
    %c0_44 = arith.constant 0 : index
    %c0_45 = arith.constant 0 : index
    %209 = vector.load %arg9[%c0_44, %c0_45] : memref<64x16xf32, #tpu.memory_space<vmem>>, vector<64x16xf32>
    %c0_46 = arith.constant 0 : index
    %c0_47 = arith.constant 0 : index
    %210 = vector.load %arg10[%c0_46, %c0_47] : memref<64x1xf32, #tpu.memory_space<vmem>>, vector<64x1xf32>
    %c0_48 = arith.constant 0 : index
    %c0_49 = arith.constant 0 : index
    %211 = vector.load %arg11[%c0_48, %c0_49] : memref<64x9xf32, #tpu.memory_space<vmem>>, vector<64x9xf32>
    %212 = vector.extract_strided_slice %209 {offsets = [0, 0], sizes = [32, 16], strides = [1, 1]} : vector<64x16xf32> to vector<32x16xf32>
    %cst_50 = arith.constant dense<0.000000e+00> : vector<32x256xf32>
    %213 = tpu.matmul %212, %208, %cst_50 {dimension_numbers = #tpu.dot_dimension_numbers<[1], [0], [0], [1], [0, 0, 1, 1], [], []>} : vector<32x16xf32>, vector<16x256xf32>, vector<32x256xf32> -> vector<32x256xf32>
    %214 = vector.extract_strided_slice %210 {offsets = [0, 0], sizes = [32, 1], strides = [1, 1]} : vector<64x1xf32> to vector<32x1xf32>
    %215 = vector.broadcast %214 : vector<32x1xf32> to vector<32x256xf32>
    %216 = arith.addf %213, %215 : vector<32x256xf32>
    %217 = vector.extract_strided_slice %211 {offsets = [0, 0], sizes = [32, 9], strides = [1, 1]} : vector<64x9xf32> to vector<32x9xf32>
    %218 = vector.extract_strided_slice %217 {offsets = [0, 4], sizes = [32, 1], strides = [1, 1]} : vector<32x9xf32> to vector<32x1xf32>
    %219 = vector.broadcast %218 : vector<32x1xf32> to vector<32x256xf32>
    %220 = arith.mulf %216, %219 : vector<32x256xf32>
    %c17_i32_51 = arith.constant 17 : i32
    %221 = tpu.dynamic_rotate %216 by %c17_i32_51 dim 1 : vector<32x256xf32>, i32 -> vector<32x256xf32>
    %222 = vector.broadcast %3 : vector<1x256xf32> to vector<32x256xf32>
    %223 = arith.mulf %221, %222 : vector<32x256xf32>
    %224 = vector.extract_strided_slice %217 {offsets = [0, 0], sizes = [32, 1], strides = [1, 1]} : vector<32x9xf32> to vector<32x1xf32>
    %225 = vector.broadcast %224 : vector<32x1xf32> to vector<32x256xf32>
    %226 = arith.mulf %223, %225 : vector<32x256xf32>
    %227 = arith.addf %220, %226 : vector<32x256xf32>
    %c16_i32_52 = arith.constant 16 : i32
    %228 = tpu.dynamic_rotate %216 by %c16_i32_52 dim 1 : vector<32x256xf32>, i32 -> vector<32x256xf32>
    %229 = vector.broadcast %4 : vector<1x256xf32> to vector<32x256xf32>
    %230 = arith.mulf %228, %229 : vector<32x256xf32>
    %231 = vector.extract_strided_slice %217 {offsets = [0, 1], sizes = [32, 1], strides = [1, 1]} : vector<32x9xf32> to vector<32x1xf32>
    %232 = vector.broadcast %231 : vector<32x1xf32> to vector<32x256xf32>
    %233 = arith.mulf %230, %232 : vector<32x256xf32>
    %234 = arith.addf %227, %233 : vector<32x256xf32>
    %c15_i32_53 = arith.constant 15 : i32
    %235 = tpu.dynamic_rotate %216 by %c15_i32_53 dim 1 : vector<32x256xf32>, i32 -> vector<32x256xf32>
    %236 = vector.broadcast %5 : vector<1x256xf32> to vector<32x256xf32>
    %237 = arith.mulf %235, %236 : vector<32x256xf32>
    %238 = vector.extract_strided_slice %217 {offsets = [0, 2], sizes = [32, 1], strides = [1, 1]} : vector<32x9xf32> to vector<32x1xf32>
    %239 = vector.broadcast %238 : vector<32x1xf32> to vector<32x256xf32>
    %240 = arith.mulf %237, %239 : vector<32x256xf32>
    %241 = arith.addf %234, %240 : vector<32x256xf32>
    %c1_i32_54 = arith.constant 1 : i32
    %242 = tpu.dynamic_rotate %216 by %c1_i32_54 dim 1 : vector<32x256xf32>, i32 -> vector<32x256xf32>
    %243 = vector.broadcast %6 : vector<1x256xf32> to vector<32x256xf32>
    %244 = arith.mulf %242, %243 : vector<32x256xf32>
    %245 = vector.extract_strided_slice %217 {offsets = [0, 3], sizes = [32, 1], strides = [1, 1]} : vector<32x9xf32> to vector<32x1xf32>
    %246 = vector.broadcast %245 : vector<32x1xf32> to vector<32x256xf32>
    %247 = arith.mulf %244, %246 : vector<32x256xf32>
    %248 = arith.addf %241, %247 : vector<32x256xf32>
    %c255_i32_55 = arith.constant 255 : i32
    %249 = tpu.dynamic_rotate %216 by %c255_i32_55 dim 1 : vector<32x256xf32>, i32 -> vector<32x256xf32>
    %250 = vector.broadcast %7 : vector<1x256xf32> to vector<32x256xf32>
    %251 = arith.mulf %249, %250 : vector<32x256xf32>
    %252 = vector.extract_strided_slice %217 {offsets = [0, 5], sizes = [32, 1], strides = [1, 1]} : vector<32x9xf32> to vector<32x1xf32>
    %253 = vector.broadcast %252 : vector<32x1xf32> to vector<32x256xf32>
    %254 = arith.mulf %251, %253 : vector<32x256xf32>
    %255 = arith.addf %248, %254 : vector<32x256xf32>
    %c241_i32_56 = arith.constant 241 : i32
    %256 = tpu.dynamic_rotate %216 by %c241_i32_56 dim 1 : vector<32x256xf32>, i32 -> vector<32x256xf32>
    %257 = vector.broadcast %8 : vector<1x256xf32> to vector<32x256xf32>
    %258 = arith.mulf %256, %257 : vector<32x256xf32>
    %259 = vector.extract_strided_slice %217 {offsets = [0, 6], sizes = [32, 1], strides = [1, 1]} : vector<32x9xf32> to vector<32x1xf32>
    %260 = vector.broadcast %259 : vector<32x1xf32> to vector<32x256xf32>
    %261 = arith.mulf %258, %260 : vector<32x256xf32>
    %262 = arith.addf %255, %261 : vector<32x256xf32>
    %c240_i32_57 = arith.constant 240 : i32
    %263 = tpu.dynamic_rotate %216 by %c240_i32_57 dim 1 : vector<32x256xf32>, i32 -> vector<32x256xf32>
    %264 = vector.broadcast %9 : vector<1x256xf32> to vector<32x256xf32>
    %265 = arith.mulf %263, %264 : vector<32x256xf32>
    %266 = vector.extract_strided_slice %217 {offsets = [0, 7], sizes = [32, 1], strides = [1, 1]} : vector<32x9xf32> to vector<32x1xf32>
    %267 = vector.broadcast %266 : vector<32x1xf32> to vector<32x256xf32>
    %268 = arith.mulf %265, %267 : vector<32x256xf32>
    %269 = arith.addf %262, %268 : vector<32x256xf32>
    %c239_i32_58 = arith.constant 239 : i32
    %270 = tpu.dynamic_rotate %216 by %c239_i32_58 dim 1 : vector<32x256xf32>, i32 -> vector<32x256xf32>
    %271 = vector.broadcast %10 : vector<1x256xf32> to vector<32x256xf32>
    %272 = arith.mulf %270, %271 : vector<32x256xf32>
    %273 = vector.extract_strided_slice %217 {offsets = [0, 8], sizes = [32, 1], strides = [1, 1]} : vector<32x9xf32> to vector<32x1xf32>
    %274 = vector.broadcast %273 : vector<32x1xf32> to vector<32x256xf32>
    %275 = arith.mulf %272, %274 : vector<32x256xf32>
    %276 = arith.addf %269, %275 : vector<32x256xf32>
    %cst_59 = arith.constant 5.000000e-01 : f32
    %277 = vector.broadcast %cst_59 : f32 to vector<32x256xf32>
    %278 = arith.mulf %277, %276 : vector<32x256xf32>
    %cst_60 = arith.constant 0.707106769 : f32
    %279 = vector.broadcast %cst_60 : f32 to vector<32x256xf32>
    %280 = arith.mulf %276, %279 : vector<32x256xf32>
    %cst_61 = arith.constant 0.000000e+00 : f32
    %281 = vector.broadcast %cst_61 : f32 to vector<32x256xf32>
    %282 = arith.cmpf oge, %280, %281 : vector<32x256xf32>
    %cst_62 = arith.constant 1.000000e+00 : f32
    %cst_63 = arith.constant -1.000000e+00 : f32
    %283 = vector.broadcast %cst_62 : f32 to vector<32x256xf32>
    %284 = vector.broadcast %cst_63 : f32 to vector<32x256xf32>
    %285 = arith.select %282, %283, %284 : vector<32x256xi1>, vector<32x256xf32>
    %286 = math.absf %280 : vector<32x256xf32>
    %cst_64 = arith.constant 0.327591091 : f32
    %287 = vector.broadcast %cst_64 : f32 to vector<32x256xf32>
    %288 = arith.mulf %287, %286 : vector<32x256xf32>
    %cst_65 = arith.constant 1.000000e+00 : f32
    %289 = vector.broadcast %cst_65 : f32 to vector<32x256xf32>
    %290 = arith.addf %289, %288 : vector<32x256xf32>
    %cst_66 = arith.constant 1.000000e+00 : f32
    %291 = vector.broadcast %cst_66 : f32 to vector<32x256xf32>
    %292 = arith.divf %291, %290 : vector<32x256xf32>
    %cst_67 = arith.constant 1.06140542 : f32
    %293 = vector.broadcast %cst_67 : f32 to vector<32x256xf32>
    %294 = arith.mulf %293, %292 : vector<32x256xf32>
    %cst_68 = arith.constant -1.45315206 : f32
    %295 = vector.broadcast %cst_68 : f32 to vector<32x256xf32>
    %296 = arith.addf %294, %295 : vector<32x256xf32>
    %297 = arith.mulf %296, %292 : vector<32x256xf32>
    %cst_69 = arith.constant 1.42141378 : f32
    %298 = vector.broadcast %cst_69 : f32 to vector<32x256xf32>
    %299 = arith.addf %297, %298 : vector<32x256xf32>
    %300 = arith.mulf %299, %292 : vector<32x256xf32>
    %cst_70 = arith.constant -0.284496725 : f32
    %301 = vector.broadcast %cst_70 : f32 to vector<32x256xf32>
    %302 = arith.addf %300, %301 : vector<32x256xf32>
    %303 = arith.mulf %302, %292 : vector<32x256xf32>
    %cst_71 = arith.constant 0.254829586 : f32
    %304 = vector.broadcast %cst_71 : f32 to vector<32x256xf32>
    %305 = arith.addf %303, %304 : vector<32x256xf32>
    %306 = arith.mulf %305, %292 : vector<32x256xf32>
    %cst_72 = arith.constant 0.000000e+00 : f32
    %307 = vector.broadcast %cst_72 : f32 to vector<32x256xf32>
    %308 = arith.subf %307, %286 : vector<32x256xf32>
    %309 = arith.mulf %308, %286 : vector<32x256xf32>
    %310 = math.exp %309 : vector<32x256xf32>
    %311 = arith.mulf %306, %310 : vector<32x256xf32>
    %cst_73 = arith.constant 1.000000e+00 : f32
    %312 = vector.broadcast %cst_73 : f32 to vector<32x256xf32>
    %313 = arith.subf %312, %311 : vector<32x256xf32>
    %314 = arith.mulf %285, %313 : vector<32x256xf32>
    %cst_74 = arith.constant 1.000000e+00 : f32
    %315 = vector.broadcast %cst_74 : f32 to vector<32x256xf32>
    %316 = arith.addf %315, %314 : vector<32x256xf32>
    %317 = arith.mulf %278, %316 : vector<32x256xf32>
    %318 = vector.extract_strided_slice %209 {offsets = [32, 0], sizes = [32, 16], strides = [1, 1]} : vector<64x16xf32> to vector<32x16xf32>
    %cst_75 = arith.constant dense<0.000000e+00> : vector<32x256xf32>
    %319 = tpu.matmul %318, %208, %cst_75 {dimension_numbers = #tpu.dot_dimension_numbers<[1], [0], [0], [1], [0, 0, 1, 1], [], []>} : vector<32x16xf32>, vector<16x256xf32>, vector<32x256xf32> -> vector<32x256xf32>
    %320 = vector.extract_strided_slice %210 {offsets = [32, 0], sizes = [32, 1], strides = [1, 1]} : vector<64x1xf32> to vector<32x1xf32>
    %321 = vector.broadcast %320 : vector<32x1xf32> to vector<32x256xf32>
    %322 = arith.addf %319, %321 : vector<32x256xf32>
    %323 = vector.extract_strided_slice %211 {offsets = [32, 0], sizes = [32, 9], strides = [1, 1]} : vector<64x9xf32> to vector<32x9xf32>
    %324 = vector.extract_strided_slice %323 {offsets = [0, 4], sizes = [32, 1], strides = [1, 1]} : vector<32x9xf32> to vector<32x1xf32>
    %325 = vector.broadcast %324 : vector<32x1xf32> to vector<32x256xf32>
    %326 = arith.mulf %322, %325 : vector<32x256xf32>
    %c17_i32_76 = arith.constant 17 : i32
    %327 = tpu.dynamic_rotate %322 by %c17_i32_76 dim 1 : vector<32x256xf32>, i32 -> vector<32x256xf32>
    %328 = vector.broadcast %3 : vector<1x256xf32> to vector<32x256xf32>
    %329 = arith.mulf %327, %328 : vector<32x256xf32>
    %330 = vector.extract_strided_slice %323 {offsets = [0, 0], sizes = [32, 1], strides = [1, 1]} : vector<32x9xf32> to vector<32x1xf32>
    %331 = vector.broadcast %330 : vector<32x1xf32> to vector<32x256xf32>
    %332 = arith.mulf %329, %331 : vector<32x256xf32>
    %333 = arith.addf %326, %332 : vector<32x256xf32>
    %c16_i32_77 = arith.constant 16 : i32
    %334 = tpu.dynamic_rotate %322 by %c16_i32_77 dim 1 : vector<32x256xf32>, i32 -> vector<32x256xf32>
    %335 = vector.broadcast %4 : vector<1x256xf32> to vector<32x256xf32>
    %336 = arith.mulf %334, %335 : vector<32x256xf32>
    %337 = vector.extract_strided_slice %323 {offsets = [0, 1], sizes = [32, 1], strides = [1, 1]} : vector<32x9xf32> to vector<32x1xf32>
    %338 = vector.broadcast %337 : vector<32x1xf32> to vector<32x256xf32>
    %339 = arith.mulf %336, %338 : vector<32x256xf32>
    %340 = arith.addf %333, %339 : vector<32x256xf32>
    %c15_i32_78 = arith.constant 15 : i32
    %341 = tpu.dynamic_rotate %322 by %c15_i32_78 dim 1 : vector<32x256xf32>, i32 -> vector<32x256xf32>
    %342 = vector.broadcast %5 : vector<1x256xf32> to vector<32x256xf32>
    %343 = arith.mulf %341, %342 : vector<32x256xf32>
    %344 = vector.extract_strided_slice %323 {offsets = [0, 2], sizes = [32, 1], strides = [1, 1]} : vector<32x9xf32> to vector<32x1xf32>
    %345 = vector.broadcast %344 : vector<32x1xf32> to vector<32x256xf32>
    %346 = arith.mulf %343, %345 : vector<32x256xf32>
    %347 = arith.addf %340, %346 : vector<32x256xf32>
    %c1_i32_79 = arith.constant 1 : i32
    %348 = tpu.dynamic_rotate %322 by %c1_i32_79 dim 1 : vector<32x256xf32>, i32 -> vector<32x256xf32>
    %349 = vector.broadcast %6 : vector<1x256xf32> to vector<32x256xf32>
    %350 = arith.mulf %348, %349 : vector<32x256xf32>
    %351 = vector.extract_strided_slice %323 {offsets = [0, 3], sizes = [32, 1], strides = [1, 1]} : vector<32x9xf32> to vector<32x1xf32>
    %352 = vector.broadcast %351 : vector<32x1xf32> to vector<32x256xf32>
    %353 = arith.mulf %350, %352 : vector<32x256xf32>
    %354 = arith.addf %347, %353 : vector<32x256xf32>
    %c255_i32_80 = arith.constant 255 : i32
    %355 = tpu.dynamic_rotate %322 by %c255_i32_80 dim 1 : vector<32x256xf32>, i32 -> vector<32x256xf32>
    %356 = vector.broadcast %7 : vector<1x256xf32> to vector<32x256xf32>
    %357 = arith.mulf %355, %356 : vector<32x256xf32>
    %358 = vector.extract_strided_slice %323 {offsets = [0, 5], sizes = [32, 1], strides = [1, 1]} : vector<32x9xf32> to vector<32x1xf32>
    %359 = vector.broadcast %358 : vector<32x1xf32> to vector<32x256xf32>
    %360 = arith.mulf %357, %359 : vector<32x256xf32>
    %361 = arith.addf %354, %360 : vector<32x256xf32>
    %c241_i32_81 = arith.constant 241 : i32
    %362 = tpu.dynamic_rotate %322 by %c241_i32_81 dim 1 : vector<32x256xf32>, i32 -> vector<32x256xf32>
    %363 = vector.broadcast %8 : vector<1x256xf32> to vector<32x256xf32>
    %364 = arith.mulf %362, %363 : vector<32x256xf32>
    %365 = vector.extract_strided_slice %323 {offsets = [0, 6], sizes = [32, 1], strides = [1, 1]} : vector<32x9xf32> to vector<32x1xf32>
    %366 = vector.broadcast %365 : vector<32x1xf32> to vector<32x256xf32>
    %367 = arith.mulf %364, %366 : vector<32x256xf32>
    %368 = arith.addf %361, %367 : vector<32x256xf32>
    %c240_i32_82 = arith.constant 240 : i32
    %369 = tpu.dynamic_rotate %322 by %c240_i32_82 dim 1 : vector<32x256xf32>, i32 -> vector<32x256xf32>
    %370 = vector.broadcast %9 : vector<1x256xf32> to vector<32x256xf32>
    %371 = arith.mulf %369, %370 : vector<32x256xf32>
    %372 = vector.extract_strided_slice %323 {offsets = [0, 7], sizes = [32, 1], strides = [1, 1]} : vector<32x9xf32> to vector<32x1xf32>
    %373 = vector.broadcast %372 : vector<32x1xf32> to vector<32x256xf32>
    %374 = arith.mulf %371, %373 : vector<32x256xf32>
    %375 = arith.addf %368, %374 : vector<32x256xf32>
    %c239_i32_83 = arith.constant 239 : i32
    %376 = tpu.dynamic_rotate %322 by %c239_i32_83 dim 1 : vector<32x256xf32>, i32 -> vector<32x256xf32>
    %377 = vector.broadcast %10 : vector<1x256xf32> to vector<32x256xf32>
    %378 = arith.mulf %376, %377 : vector<32x256xf32>
    %379 = vector.extract_strided_slice %323 {offsets = [0, 8], sizes = [32, 1], strides = [1, 1]} : vector<32x9xf32> to vector<32x1xf32>
    %380 = vector.broadcast %379 : vector<32x1xf32> to vector<32x256xf32>
    %381 = arith.mulf %378, %380 : vector<32x256xf32>
    %382 = arith.addf %375, %381 : vector<32x256xf32>
    %c0_84 = arith.constant 0 : index
    %c0_85 = arith.constant 0 : index
    %383 = vector.load %arg12[%c0_84, %c0_85] : memref<16x32xf32, #tpu.memory_space<vmem>>, vector<16x32xf32>
    %384 = arith.mulf %317, %382 : vector<32x256xf32>
    %cst_86 = arith.constant dense<0.000000e+00> : vector<16x256xf32>
    %385 = tpu.matmul %383, %384, %cst_86 {dimension_numbers = #tpu.dot_dimension_numbers<[1], [0], [0], [1], [0, 0, 1, 1], [], []>} : vector<16x32xf32>, vector<32x256xf32>, vector<16x256xf32> -> vector<16x256xf32>
    %386 = arith.addf %190, %385 : vector<16x256xf32>
    %c0_87 = arith.constant 0 : index
    %c0_88 = arith.constant 0 : index
    %c0_89 = arith.constant 0 : index
    %387 = vector.load %arg14[%c0_87, %c0_88, %c0_89] : memref<1x16x256xf32, #tpu.memory_space<vmem>>, vector<1x16x256xf32>
    %388 = vector.shape_cast %387 : vector<1x16x256xf32> to vector<16x256xf32>
    %389 = vector.shape_cast %386 : vector<16x256xf32> to vector<1x16x256xf32>
    tpu.vector_store %arg14[%c0_87, %c0_88, %c0_89], %389 {strides = array<i32>} : memref<1x16x256xf32, #tpu.memory_space<vmem>>, vector<1x16x256xf32>,
    return
  }
  func.func @transform_0(%arg0: i32) -> (i32, i32, i32) {
    %c0_i32 = arith.constant 0 : i32
    %c0_i32_0 = arith.constant 0 : i32
    %c0_i32_1 = arith.constant 0 : i32
    return %arg0, %c0_i32, %c0_i32_0 : i32, i32, i32
  }
  func.func @transform_1(%arg0: i32) -> (i32, i32) {
    %c0_i32 = arith.constant 0 : i32
    %c0_i32_0 = arith.constant 0 : i32
    %c0_i32_1 = arith.constant 0 : i32
    return %c0_i32, %c0_i32_0 : i32, i32
  }
  func.func @transform_2(%arg0: i32) -> (i32, i32) {
    %c0_i32 = arith.constant 0 : i32
    %c0_i32_0 = arith.constant 0 : i32
    %c0_i32_1 = arith.constant 0 : i32
    return %c0_i32, %c0_i32_0 : i32, i32
  }
  func.func @transform_3(%arg0: i32) -> (i32, i32) {
    %c0_i32 = arith.constant 0 : i32
    %c0_i32_0 = arith.constant 0 : i32
    %c0_i32_1 = arith.constant 0 : i32
    return %c0_i32, %c0_i32_0 : i32, i32
  }
  func.func @transform_4(%arg0: i32) -> (i32, i32) {
    %c0_i32 = arith.constant 0 : i32
    %c0_i32_0 = arith.constant 0 : i32
    %c0_i32_1 = arith.constant 0 : i32
    return %c0_i32, %c0_i32_0 : i32, i32
  }
  func.func @transform_5(%arg0: i32) -> (i32, i32) {
    %c0_i32 = arith.constant 0 : i32
    %c0_i32_0 = arith.constant 0 : i32
    %c0_i32_1 = arith.constant 0 : i32
    return %c0_i32, %c0_i32_0 : i32, i32
  }
  func.func @transform_6(%arg0: i32) -> (i32, i32) {
    %c0_i32 = arith.constant 0 : i32
    %c0_i32_0 = arith.constant 0 : i32
    %c0_i32_1 = arith.constant 0 : i32
    return %c0_i32, %c0_i32_0 : i32, i32
  }
  func.func @transform_7(%arg0: i32) -> (i32, i32) {
    %c0_i32 = arith.constant 0 : i32
    %c0_i32_0 = arith.constant 0 : i32
    %c0_i32_1 = arith.constant 0 : i32
    return %c0_i32, %c0_i32_0 : i32, i32
  }
  func.func @transform_8(%arg0: i32) -> (i32, i32) {
    %c0_i32 = arith.constant 0 : i32
    %c0_i32_0 = arith.constant 0 : i32
    %c0_i32_1 = arith.constant 0 : i32
    return %c0_i32, %c0_i32_0 : i32, i32
  }
  func.func @transform_9(%arg0: i32) -> (i32, i32) {
    %c0_i32 = arith.constant 0 : i32
    %c0_i32_0 = arith.constant 0 : i32
    %c0_i32_1 = arith.constant 0 : i32
    return %c0_i32, %c0_i32_0 : i32, i32
  }
  func.func @transform_10(%arg0: i32) -> (i32, i32) {
    %c0_i32 = arith.constant 0 : i32
    %c0_i32_0 = arith.constant 0 : i32
    %c0_i32_1 = arith.constant 0 : i32
    return %c0_i32, %c0_i32_0 : i32, i32
  }
  func.func @transform_11(%arg0: i32) -> (i32, i32) {
    %c0_i32 = arith.constant 0 : i32
    %c0_i32_0 = arith.constant 0 : i32
    %c0_i32_1 = arith.constant 0 : i32
    return %c0_i32, %c0_i32_0 : i32, i32
  }
  func.func @transform_12(%arg0: i32) -> (i32, i32) {
    %c0_i32 = arith.constant 0 : i32
    %c0_i32_0 = arith.constant 0 : i32
    %c0_i32_1 = arith.constant 0 : i32
    return %c0_i32, %c0_i32_0 : i32, i32
  }
  func.func @transform_13(%arg0: i32) -> (i32, i32, i32) {
    %c0_i32 = arith.constant 0 : i32
    %c0_i32_0 = arith.constant 0 : i32
    %c0_i32_1 = arith.constant 0 : i32
    return %arg0, %c0_i32, %c0_i32_0 : i32, i32, i32
  }
}

</mosaic_0001>

<bundles_post_ra>
// kernel: tpu_custom_call.1
= control target key start
LH: loop header
LB: loop body
LE: loop exit
PB: predicated region body
PF: predicated region fallthrough
CT: control target
= control target key end

     0   :  { %s6587_s0 = inlined_call_operand.vmem [shape: f32[2,16,256], index: 0, kind: input, shape index: {}]   ;;  %s6588_s1 = inlined_call_operand.vmem [shape: f32[32,16], index: 1, kind: input, shape index: {}]   ;;  %s6589_s2 = inlined_call_operand.vmem [shape: f32[32,1], index: 2, kind: input, shape index: {}]   ;;  %s6590_s3 = inlined_call_operand.vmem [shape: f32[32,9], index: 3, kind: input, shape index: {}]   ;;  %s6591_s4 = inlined_call_operand.vmem [shape: f32[16,256], index: 4, kind: input, shape index: {}]   ;;  %s6592_s5 = inlined_call_operand.vmem [shape: f32[16,1], index: 5, kind: input, shape index: {}]   ;;  %s6593_s6 = inlined_call_operand.vmem [shape: f32[16,16], index: 6, kind: input, shape index: {}]   ;;  %s6594_s7 = inlined_call_operand.vmem [shape: f32[16,16], index: 7, kind: input, shape index: {}]   ;;  %s6595_s8 = inlined_call_operand.vmem [shape: f32[64,16], index: 8, kind: input, shape index: {}]   ;;  %s6596_s9 = inlined_call_operand.vmem [shape: f32[64,1], index: 9, kind: input, shape index: {}]   ;;  %s6597_s10 = inlined_call_operand.vmem [shape: f32[64,9], index: 10, kind: input, shape index: {}]   ;;  %s6598_s11 = inlined_call_operand.vmem [shape: f32[16,32], index: 11, kind: input, shape index: {}]   ;;  %s6599_s12 = inlined_call_operand.vmem [shape: f32[9,256], index: 12, kind: input, shape index: {}]   ;;  %s6600_s13 = inlined_call_operand.hbm [shape: f32[2,16,256], index: 13, kind: output, shape index: {}]  }
   0x1   :  { %6754 = sst [smem:[#allocation79_spill]] %s6587_s0 }
   0x2   :  { %6755 = sst [smem:[#allocation80_spill]] %s6588_s1 }
   0x3   :  { %6756 = sst [smem:[#allocation81_spill]] %s6589_s2 }
   0x4   :  { %6757 = sst [smem:[#allocation82_spill]] %s6590_s3 }
   0x5   :  { %6758 = sst [smem:[#allocation83_spill]] %s6591_s4 }
   0x6   :  { %6759 = sst [smem:[#allocation84_spill]] %s6592_s5 }
   0x7   :  { %6760 = sst [smem:[#allocation85_spill]] %s6593_s6 }
   0x8   :  { %18 = vsyncpa [#allocation3], 0 }
   0x9   :  { %20 = vsyncpa [#allocation3 + $0x1], 0  ;;  %s3835_s25 = smov 0   ;;  %s3837_s26 = smov 0  }
   0xa   :  { %s3839_s27 = smov 0   ;;  %s3841_s28 = smov 0  }
   0xb LB: > { %6761 = sst [smem:[#allocation5_spill]] %s3738_s27  ;;  %s3856_s29 = sadd.s32 4294967295, %s3742_s28   ;;  %s3742_s28 = sphi %s3841_s28, %s7016_s28   ;;  %s3738_s27 = sphi %s3839_s27, %s7013_s27   ;;  %s3734_s26 = sphi %s3837_s26, %s7015_s26   ;;  %s3730_s25 = sphi %s3835_s25, %s7014_s25  }
   0xc   : > { %s3414_s30 = sadd.s32 4294967294, %s3742_s28   ;;  %s3860_s14 = sadd.s32 1, %s3742_s28  }
   0xd   : > { %s311_s15 = sadd.s32 1, %s3738_s27  ;;  %s308_s16 = ssub.s32 %s3742_s28, %s3860_s14 }
   0xe   : > { %p321_p0 = scmp.ne.s32.totalorder %s3738_s27, %s3734_s26  ;;  %p309_p1 = scmp.eq.s32.totalorder %s308_s16, 0 }
   0xf   : > { %p322_p2 = scmp.eq.s32.totalorder %s3856_s29, 1  ;;  %p327_p3 = scmp.ne.s32.totalorder %s3734_s26, %s3730_s25 }
  0x10   : > { %p328_p4 = scmp.eq.s32.totalorder %s3414_s30, 1  ;;  %p3417_p7 = scmp.ge.s32.totalorder %s3742_s28, 1 }
  0x11   : > { %s3871_s17 = scalar_select %p309_p1, %s3738_s27, %s311_s15  }
  0x12   : > { %p3873_p5 = por %p322_p2, %p321_p0  ;;  %p3877_p6 = por %p328_p4, %p327_p3 }
  0x13   : > { %6762 = sst [smem:[#allocation6_spill]] %s3871_s17  ;;  %p390_p8 = scmp.lt.s32.totalorder %s3742_s28, 3 }
  0x15   : > { %p391_p9 = pnand %p3417_p7, %p390_p8 }
  0x17   : > { %394 = sbr.rel (%p391_p9) target bundleno = 2564 (0xa04), region = 72 }
  0x1e   : > { %p434_p10 = scmp.lt.s32.totalorder %s3856_s29, 1  ;;  %v6619_v0 = vmov 0.0   ;;  %v6625_v1 = vmov 0   ;;  %s6765_s2 = sld [smem:[#allocation81_spill]]  ;;  %v6629_v4 = vmov 4   ;;  %v6623_v21 = vmov 1  }
  0x1f   : > { %593 = vmatprep.mubr.f32.mxu0 %v6619_v0  ;;  %3543 = vset.pattern.permute.xlu0 %v6625_v1  ;;  %s6766_s3 = sld [smem:[#allocation82_spill]]  ;;  %s6767_s0 = sld [smem:[#allocation79_spill]]  ;;  %v6621_v32 = vmov 2   ;;  %v6617_v43 = vmov 3   ;;  %v6611_v53 = vmov 5   ;;  %v6627_v57 = vmov 6  }
  0x20   : > { %s435_s24 = scalar_select %p434_p10, %s3856_s29, 1  ;;  %3544 = vset.pattern.permute.xlu1 %v6629_v4  ;;  %1030 = vmatprep.mubr.f32.mxu1 %v6619_v0  ;;  %v6615_v58 = vmov 7   ;;  %vm522_vm0 = vcmask 130048  }
  0x21   : > { %s6768_s1 = sld [smem:[#allocation80_spill]]  ;;  %s6638_s20 = smov 17  }
  0x22   : > { %s3446_s16 = sshll.u32 %s435_s24, 5  ;;  %s6601_s21 = smov 16  }
  0x23   : > { %s6634_s22 = smov 1   ;;  %s6636_s30 = smov 15  }
  0x24   : > { %v504_v2 = vld [vmem:[%s6765_s2] sm:$0xff]  ;;  %v505_v5 = vld [vmem:[%s6765_s2 + $0x8] sm:$0xff]  ;;  %s6607_s15 = smov 113   ;;  %s6609_s23 = smov 127  }
  0x25   : > { %v3892_v3 = vld [vmem:[%s6766_s3] sm:$0xff]  ;;  %514 = vperm.xlu0 %3543, %v504_v2   ;;  %v3904_v6 = vld [vmem:[%s6766_s3 + $0x8] sm:$0xff]  ;;  %s3909_s17 = scalar_lea.vmem %s6767_s0, %s3446_s16  ;;  %s6603_s24 = smov 111  }
  0x26   : > { %608 = vperm.xlu1 %3544, %v3892_v3   ;;  %v3912_v7 = vld [vmem:[%s3909_s17 + $0x8] sm:$0xff]  ;;  %v3915_v8 = vld [vmem:[%s3909_s17 + $0x18] sm:$0xff]  ;;  %v3918_v9 = vld [vmem:[%s3909_s17] sm:$0xff]  ;;  %s6769_s16 = smov 16   ;;  %s6785_s5 = sld [smem:[#allocation84_spill]] }
  0x27   : > { %v454_v10 = vadd.f32 %v3915_v8, %v3912_v7  ;;  %v465_v11 = vmul.f32 %v3912_v7, %v3912_v7  ;;  %v467_v12 = vmul.f32 %v3915_v8, %v3915_v8  ;;  %v3927_v13 = vld [vmem:[%s3909_s17 + $0x10] sm:$0xff]  ;;  %v464_v14 = vmul.f32 %v3918_v9, %v3918_v9  ;;  %s6789_s4 = sld [smem:[#allocation83_spill]]  ;;  %s6802_s6 = sld [smem:[#allocation85_spill]] }
  0x28   : > { %v447_v15 = vadd.f32 %v3927_v13, %v3918_v9  ;;  %v466_v16 = vmul.f32 %v3927_v13, %v3927_v13  ;;  %s3447_s0 = sshll.u32 %s3856_s29, 9 }
  0x29   : > { %519 = vperm.xlu0 %3543, %v505_v5   ;;  %v455_v17 = vrot.slane %v454_v10, 4  ;;  %v475_v18 = vadd.f32 %v467_v12, %v465_v11  ;;  %v6613_v11 = vmov 8   ;;  %s6543_s27 = scalar_lea.hbm %s6600_s13, %s3447_s0 }
  0x2a   : > { %613 = vperm.xlu1 %3544, %v3904_v6   ;;  %v448_v19 = vrot.slane %v447_v15, 4  ;;  %v468_v20 = vadd.f32 %v466_v16, %v464_v14  ;;  %v501_v14 = vld [vmem:[%s6768_s1 + $0x8] sm:$0xff] }
  0x2b   : > { %v456_v22 = vadd.f32 %v455_v17, %v454_v10  ;;  %v476_v23 = vrot.slane %v475_v18, 4 }
  0x2c   : > { %v449_v24 = vadd.f32 %v448_v19, %v447_v15  ;;  %v469_v25 = vrot.slane %v468_v20, 4 }
  0x2d   : > { %3546 = vset.pattern.permute.xlu0 %v6623_v21  ;;  %v457_v26 = vrot.slane %v456_v22, 2  ;;  %v477_v27 = vadd.f32 %v476_v23, %v475_v18 }
  0x2e   : > { %3545 = vset.pattern.permute.xlu1 %v6625_v1  ;;  %689 = vperm.xlu0 %3546, %v3892_v3   ;;  %v450_v28 = vrot.slane %v449_v24, 2  ;;  %v470_v29 = vadd.f32 %v469_v25, %v468_v20  ;;  %v502_v20 = vld [vmem:[%s6768_s1 + $0x10] sm:$0xff] }
  0x2f   : > { %652 = vperm.xlu1 %3545, %v3904_v6   ;;  %v458_v30 = vadd.f32 %v457_v26, %v456_v22  ;;  %v478_v31 = vrot.slane %v477_v27, 2 }
  0x30   : > { %v451_v33 = vadd.f32 %v450_v28, %v449_v24  ;;  %v471_v34 = vrot.slane %v470_v29, 2  ;;  %v503_v24 = vld [vmem:[%s6768_s1 + $0x18] sm:$0xff] }
  0x31   : > { %v459_v35 = vrot.slane %v458_v30, 1  ;;  %v479_v36 = vadd.f32 %v478_v31, %v477_v27 }
  0x32   : > { %3549 = vset.pattern.permute.xlu0 %v6621_v32  ;;  %v452_v37 = vrot.slane %v451_v33, 1  ;;  %v472_v38 = vadd.f32 %v471_v34, %v470_v29 }
  0x33   : > { %3547 = vset.pattern.permute.xlu1 %v6623_v21  ;;  %734 = vperm.xlu0 %3549, %v3904_v6   ;;  %v460_v39 = vadd.f32 %v459_v35, %v458_v30  ;;  %v480_v40 = vrot.slane %v479_v36, 1 }
  0x34   : > { %693 = vperm.xlu1 %3547, %v3904_v6   ;;  %v453_v41 = vadd.f32 %v452_v37, %v451_v33  ;;  %v473_v42 = vrot.slane %v472_v38, 1 }
  0x35   : > { %v463_v44 = vmul.f32 0.0625, %v460_v39  ;;  %v481_v45 = vadd.f32 %v480_v40, %v479_v36 }
  0x36   : > { %v462_v46 = vmul.f32 0.0625, %v453_v41  ;;  %v474_v47 = vadd.f32 %v473_v42, %v472_v38 }
  0x37   : > { %3550 = vset.pattern.permute.xlu0 %v6617_v43  ;;  %v483_v48 = vmul.f32 0.0625, %v481_v45  ;;  %v485_v49 = vmul.f32 %v463_v44, %v463_v44  ;;  %v489_v59 = vsub.f32 %v3912_v7, %v463_v44  ;;  %v491_v60 = vsub.f32 %v3915_v8, %v463_v44 }
  0x38   : > { %3548 = vset.pattern.permute.xlu1 %v6621_v32  ;;  %771 = vperm.xlu0 %3550, %v3892_v3   ;;  %v482_v50 = vmul.f32 0.0625, %v474_v47  ;;  %v484_v51 = vmul.f32 %v462_v46, %v462_v46  ;;  %v488_v61 = vsub.f32 %v3918_v9, %v462_v46  ;;  %v490_v62 = vsub.f32 %v3927_v13, %v462_v46  ;;  %v500_v13 = vld [vmem:[%s6768_s1] sm:$0xff]  ;;  %s6797_s1 = smov 127  }
  0x39   : > { %730 = vperm.xlu1 %3548, %v3892_v3   ;;  %v487_v52 = vsub.f32 %v483_v48, %v485_v49 }
  0x3a   : > { %v486_v54 = vsub.f32 %v482_v50, %v484_v51 }
  0x3b   : > { %v493_v55 = vadd.f32 1e-05, %v487_v52 }
  0x3c   : > { %3553 = vset.pattern.permute.xlu0 %v6611_v53  ;;  %v492_v56 = vadd.f32 1e-05, %v486_v54 }
  0x3d   : > { %3551 = vset.pattern.permute.xlu1 %v6617_v43  ;;  %816 = vperm.xlu0 %3553, %v3904_v6   ;;  %3617 = vrsqrt.f32 %v493_v55 }
  0x3e   : > { %775 = vperm.xlu1 %3551, %v3904_v6   ;;  %3619 = vrsqrt.f32 %v492_v56 }
  0x41   : > { %3554 = vset.pattern.permute.xlu0 %v6627_v57 }
  0x42   : > { %3552 = vset.pattern.permute.xlu1 %v6611_v53  ;;  %853 = vperm.xlu0 %3554, %v3892_v3  }
  0x43   : > { %812 = vperm.xlu1 %3552, %v3892_v3  }
  0x46   : > { %3557 = vset.pattern.permute.xlu0 %v6615_v58 }
  0x47   : > { %3555 = vset.pattern.permute.xlu1 %v6627_v57  ;;  %898 = vperm.xlu0 %3557, %v3904_v6   ;;  %v3618_v63 = vpop.eup %3617 }
  0x48   : > { %857 = vperm.xlu1 %3555, %v3904_v6   ;;  %v3620_v2 = vpop.eup %3619  ;;  %v497_v5 = vmul.f32 %v3618_v63, %v489_v59  ;;  %v499_v10 = vmul.f32 %v3618_v63, %v491_v60 }
  0x49   : > { %v496_v7 = vmul.f32 %v3620_v2, %v488_v61  ;;  %v498_v12 = vmul.f32 %v3620_v2, %v490_v62  ;;  %v628_v62 = vlaneseq }
  0x4a   : > { %v3448_v8 = vpack.c.bf16 %v499_v10, %v497_v5 }
  0x4b   : > { %3558 = vset.pattern.permute.xlu0 %v6613_v11  ;;  %v3450_v9 = vpack.c.bf16 %v498_v12, %v496_v7  ;;  %v4120_v5 = vshrl.u32 %v628_v62, 7  ;;  %v4122_v10 = vand.u32 127, %v628_v62 }
  0x4c   : > { %3556 = vset.pattern.permute.xlu1 %v6615_v58  ;;  %935 = vperm.xlu0 %3558, %v3892_v3  }
  0x4d   : > { %894 = vperm.xlu1 %3556, %v3892_v3   ;;  %3449 = vmatprep.subr.bf16.mxu0 %v3448_v8  ;;  %v637_v7 = vsub.s32 0, %v4120_v5  ;;  %vm630_vm1 = vcmp.lt.s32.totalorder %v4122_v10, 17  ;;  %vm671_vm2 = vcmp.lt.s32.totalorder %v4122_v10, 16  ;;  %vm712_vm3 = vcmp.lt.s32.totalorder %v4122_v10, 15 }
  0x4e   : > { %3453 = vmatprep.subr.bf16.mxu1 %v3448_v8  ;;  %3451 = vmatpush1.bf16.msra.mxu0 %v3450_v9  ;;  %v4129_v8 = vld [vmem:[%s6599_s12] sm:$0xff]  ;;  %vm753_vm4 = vcmp.lt.s32.totalorder %v4122_v10, 1  ;;  %vm794_vm5 = vcmp.lt.s32.totalorder %v4122_v10, 127  ;;  %vm835_vm6 = vcmp.lt.s32.totalorder %v4122_v10, 113  ;;  %vm876_vm7 = vcmp.lt.s32.totalorder %v4122_v10, 112 }
  0x4f   : > { %3455 = vmatpush1.bf16.msra.mxu1 %v3450_v9  ;;  %v4134_v9 = vld [vmem:[%s6599_s12 + $0x8] sm:$0xff]  ;;  %vm917_vm8 = vcmp.lt.s32.totalorder %v4122_v10, 111 }
  0x50   : > { %3559 = vset.pattern.permute.xlu0 %v6625_v1 }
  0x51   : > { %3560 = vset.pattern.permute.xlu1 %v6613_v11  ;;  %648 = vperm.xlu0 %3559, %v3892_v3  }
  0x52   : > { %939 = vperm.xlu1 %3560, %v3904_v6   ;;  %3421 = vmatmul.mubr.msk.f32.vlgmr.msra.gmra.mrb[0].mxu0 %vm522_vm0, %v500_v13 }
  0x53   : > { %599 = vmatprep.mubr.f32.mxu0 %v6619_v0  ;;  %3425 = vmatmul.mubr.msk.f32.vlgmr.msra.gmra.mrb[0].mxu1 %vm522_vm0, %v502_v20 }
  0x54   : > { %1036 = vmatprep.mubr.f32.mxu1 %v6619_v0 }
  0x56   : > { %3561 = vset.pattern.permute.xlu1 %v6625_v1  ;;  %3422 = vmatmul.mubr.msk.f32.gmra.mrb[2].mxu0 %vm522_vm0, %v501_v14  ;;  %v4139_v14 = vrot.slane %v4129_v8, %v637_v7 }
  0x57   : > { %3426 = vmatmul.mubr.msk.f32.gmra.mrb[2].mxu1 %vm522_vm0, %v503_v24  ;;  %v719_v24 = vsub.s32 2, %v4120_v5 }
  0x58   : > { %1520 = vmatprep.mubr.f32.mxu1 %v6619_v0  ;;  %6773 = vst [vmem:[#allocation10_spill] sm:$0xff] %v4139_v14 }
  0x59   : > { %v4168_v0 = vrot.slane %v4129_v8, %v719_v24 }
  0xa4   : > { %v515_v15 = vpop.permute.xlu0 %514 }
  0xa5   : > { %v4054_v26 = vpop.permute.xlu1 %608 }
  0xa8   : > { %v520_v22 = vpop.permute.xlu0 %519 }
  0xa9   : > { %v4060_v27 = vpop.permute.xlu1 %613 }
  0xad   : > { %v4066_v29 = vpop.permute.xlu0 %689 }
  0xae   : > { %v4064_v28 = vpop.permute.xlu1 %652 }
  0xb2   : > { %v4074_v31 = vpop.permute.xlu0 %734 }
  0xb3   : > { %v4072_v30 = vpop.permute.xlu1 %693 }
  0xb7   : > { %v4078_v34 = vpop.permute.xlu0 %771 }
  0xb8   : > { %v4076_v33 = vpop.permute.xlu1 %730 }
  0xbc   : > { %v4082_v36 = vpop.permute.xlu0 %816 }
  0xbd   : > { %v4080_v35 = vpop.permute.xlu1 %775 }
  0xc1   : > { %v4086_v38 = vpop.permute.xlu0 %853 }
  0xc2   : > { %v4084_v37 = vpop.permute.xlu1 %812 }
  0xc6   : > { %v4090_v40 = vpop.permute.xlu0 %898 }
  0xc7   : > { %v4088_v39 = vpop.permute.xlu1 %857 }
  0xcb   : > { %v4094_v42 = vpop.permute.xlu0 %935 }
  0xcc   : > { %v4092_v41 = vpop.permute.xlu1 %894  ;;  %6770 = vst [vmem:[#allocation7_spill] sm:$0xff] %v4094_v42 }
  0xd0   : > { %v649_v45 = vpop.permute.xlu0 %648 }
  0xd1   : > { %v4096_v44 = vpop.permute.xlu1 %939 }
  0xd2   : > { %6771 = vst [vmem:[#allocation8_spill] sm:$0xff] %v4096_v44 }
 0x125   : > { %v595_v16 = vpop.f32.mrb[0].mxu0 }
 0x126   : > { %v3982_v17 = vadd.f32 %v595_v16, %v515_v15  ;;  %v597_v3 = vpop.f32.mrb[1].mxu0 }
 0x127   : > { %v3984_v18 = vadd.f32 %v597_v3, %v515_v15  ;;  %v4142_v15 = vrot.slane %v4134_v9, %v637_v7 }
 0x128   : > { %620 = vrot.lane.b32.xlu1 %v3982_v17, %s6638_s20 }
 0x129   : > { %v601_v6 = vpop.f32.mrb[2].mxu0  ;;  %667 = vrot.lane.b32.xlu0 %v3984_v18, %s6601_s21  ;;  %6774 = vst [vmem:[#allocation11_spill] sm:$0xff] %v4142_v15 }
 0x12a   : > { %v603_v19 = vpop.f32.mrb[3].mxu0  ;;  %v4003_v23 = vadd.f32 %v601_v6, %v520_v22 }
 0x12b   : > { %v4030_v25 = vadd.f32 %v603_v19, %v520_v22  ;;  %v678_v19 = vsub.s32 1, %v4120_v5 }
 0x12c   : > { %663 = vrot.lane.b32.xlu1 %v3982_v17, %s6601_s21  ;;  %s6605_s21 = smov 112  }
 0x12d   : > { %749 = vrot.lane.b32.xlu0 %v3984_v18, %s6634_s22  ;;  %v4154_v53 = vrot.slane %v4129_v8, %v678_v19  ;;  %v4157_v11 = vrot.slane %v4134_v9, %v678_v19  ;;  %v4171_v19 = vrot.slane %v4134_v9, %v719_v24 }
 0x12f   : > { %6775 = vst [vmem:[#allocation12_spill] sm:$0xff] %v4154_v53  ;;  %6776 = vst [vmem:[#allocation13_spill] sm:$0xff] %v4157_v11 }
 0x130   : > { %704 = vrot.lane.b32.xlu1 %v3982_v17, %s6636_s30 }
 0x131   : > { %831 = vrot.lane.b32.xlu0 %v3984_v18, %s6607_s15 }
 0x134   : > { %745 = vrot.lane.b32.xlu1 %v3982_v17, %s6634_s22 }
 0x135   : > { %622 = vrot.lane.b32.xlu0 %v4003_v23, %s6638_s20 }
 0x138   : > { %786 = vrot.lane.b32.xlu1 %v3982_v17, %s6609_s23 }
 0x139   : > { %706 = vrot.lane.b32.xlu0 %v4003_v23, %s6636_s30 }
 0x13c   : > { %827 = vrot.lane.b32.xlu1 %v3982_v17, %s6607_s15 }
 0x13d   : > { %788 = vrot.lane.b32.xlu0 %v4003_v23, %s6609_s23 }
 0x140   : > { %868 = vrot.lane.b32.xlu1 %v3982_v17, %s6605_s21 }
 0x141   : > { %870 = vrot.lane.b32.xlu0 %v4003_v23, %s6605_s21 }
 0x144   : > { %909 = vrot.lane.b32.xlu1 %v3982_v17, %s6603_s24 }
 0x145   : > { %911 = vrot.lane.b32.xlu0 %v4003_v23, %s6603_s24 }
 0x148   : > { %624 = vrot.lane.b32.xlu1 %v3984_v18, %s6638_s20 }
 0x149   : > { %626 = vrot.lane.b32.xlu0 %v4030_v25, %s6638_s20 }
 0x14c   : > { %708 = vrot.lane.b32.xlu1 %v3984_v18, %s6636_s30 }
 0x14d   : > { %710 = vrot.lane.b32.xlu0 %v4030_v25, %s6636_s30  ;;  %s6792_s30 = smov 17  }
 0x150   : > { %790 = vrot.lane.b32.xlu1 %v3984_v18, %s6609_s23 }
 0x151   : > { %792 = vrot.lane.b32.xlu0 %v4030_v25, %s6609_s23  ;;  %s6799_s23 = smov 113  }
 0x154   : > { %872 = vrot.lane.b32.xlu1 %v3984_v18, %s6605_s21 }
 0x155   : > { %874 = vrot.lane.b32.xlu0 %v4030_v25, %s6605_s21  ;;  %s6803_s21 = smov 112  }
 0x158   : > { %665 = vrot.lane.b32.xlu1 %v4003_v23, %s6769_s16 }
 0x159   : > { %915 = vrot.lane.b32.xlu0 %v4030_v25, %s6603_s24 }
 0x15c   : > { %747 = vrot.lane.b32.xlu1 %v4003_v23, %s6634_s22 }
 0x160   : > { %829 = vrot.lane.b32.xlu1 %v4003_v23, %s6607_s15 }
 0x164   : > { %669 = vrot.lane.b32.xlu1 %v4030_v25, %s6769_s16 }
 0x168   : > { %751 = vrot.lane.b32.xlu1 %v4030_v25, %s6634_s22  ;;  %s6804_s22 = smov 111  }
 0x16c   : > { %833 = vrot.lane.b32.xlu1 %v4030_v25, %s6607_s15  ;;  %s6794_s15 = smov 1  }
 0x170   : > { %913 = vrot.lane.b32.xlu1 %v3984_v18, %s6603_s24  ;;  %s6793_s24 = smov 15  }
 0x19a   : > { %v621_v46 = vpop.permute.xlu1 %620 }
 0x19b   : > { %v668_v47 = vpop.permute.xlu0 %667 }
 0x19e   : > { %v664_v48 = vpop.permute.xlu1 %663 }
 0x19f   : > { %v4098_v49 = vpop.permute.xlu0 %749 }
 0x1a2   : > { %v705_v50 = vpop.permute.xlu1 %704 }
 0x1a3   : > { %v4100_v51 = vpop.permute.xlu0 %831 }
 0x1a6   : > { %v4102_v52 = vpop.permute.xlu1 %745 }
 0x1a7   : > { %v4104_v54 = vpop.permute.xlu0 %622 }
 0x1aa   : > { %v4106_v55 = vpop.permute.xlu1 %786 }
 0x1ab   : > { %v4108_v56 = vpop.permute.xlu0 %706 }
 0x1ae   : > { %v4110_v59 = vpop.permute.xlu1 %827 }
 0x1af   : > { %v4112_v60 = vpop.permute.xlu0 %788 }
 0x1b2   : > { %v4114_v61 = vpop.permute.xlu1 %868 }
 0x1b3   : > { %v4116_v63 = vpop.permute.xlu0 %870 }
 0x1b6   : > { %v4118_v2 = vpop.permute.xlu1 %909 }
 0x1b7   : > { %6772 = vst [vmem:[#allocation9_spill] sm:$0xff] %v4118_v2  ;;  %v4136_v13 = vpop.permute.xlu0 %911 }
 0x1ba   : > { %v625_v12 = vpop.permute.xlu1 %624 }
 0x1bb   : > { %v631_v16 = vsel %vm630_vm1, %v621_v46, %v625_v12  ;;  %v633_v3 = vsel %vm630_vm1, %v625_v12, %v621_v46  ;;  %v627_v62 = vpop.permute.xlu0 %626  ;;  %v672_v46 = vsel %vm671_vm2, %v664_v48, %v668_v47  ;;  %v674_v12 = vsel %vm671_vm2, %v668_v47, %v664_v48 }
 0x1bc   : > { %v643_v20 = vmul.f32 %v4139_v14, %v633_v3  ;;  %v644_v22 = vmul.f32 %v4142_v15, %v631_v16  ;;  %v760_v16 = vsub.s32 3, %v4120_v5  ;;  %v842_v3 = vsub.s32 6, %v4120_v5 }
 0x1bd   : > { %v801_v48 = vsub.s32 5, %v4120_v5  ;;  %v685_v24 = vmul.f32 %v4157_v11, %v672_v46 }
 0x1be   : > { %v709_v6 = vpop.permute.xlu1 %708  ;;  %v655_v58 = vmul.f32 %v649_v45, %v643_v20  ;;  %v656_v43 = vmul.f32 %v649_v45, %v644_v22  ;;  %v616_v45 = vmul.f32 %v4054_v26, %v3982_v17  ;;  %v617_v20 = vmul.f32 %v4054_v26, %v3984_v18 }
 0x1bf   : > { %v713_v32 = vsel %vm712_vm3, %v705_v50, %v709_v6  ;;  %v715_v47 = vsel %vm712_vm3, %v709_v6, %v705_v50  ;;  %v684_v22 = vmul.f32 %v4154_v53, %v674_v12  ;;  %v4189_v1 = vrot.slane %v4129_v8, %v760_v16  ;;  %v711_v57 = vpop.permute.xlu0 %710 }
 0x1c0   : > { %v4192_v50 = vrot.slane %v4134_v9, %v760_v16  ;;  %v4195_v6 = vrot.slane %v4129_v8, %v842_v3  ;;  %v659_v17 = vadd.f32 %v655_v58, %v616_v45  ;;  %v660_v4 = vadd.f32 %v656_v43, %v617_v20 }
 0x1c1   : > { %v725_v18 = vmul.f32 %v4168_v0, %v715_v47  ;;  %v726_v26 = vmul.f32 %v4171_v19, %v713_v32  ;;  %v4200_v46 = vrot.slane %v4134_v9, %v842_v3  ;;  %v4203_v12 = vrot.slane %v4129_v8, %v801_v48 }
 0x1c2   : > { %v791_v7 = vpop.permute.xlu1 %790  ;;  %v4206_v42 = vrot.slane %v4134_v9, %v801_v48  ;;  %v883_v16 = vsub.s32 7, %v4120_v5  ;;  %v696_v43 = vmul.f32 %v4066_v29, %v684_v22  ;;  %v697_v58 = vmul.f32 %v4066_v29, %v685_v24 }
 0x1c3   : > { %v754_v32 = vsel %vm753_vm4, %v4102_v52, %v4098_v49  ;;  %v756_v3 = vsel %vm753_vm4, %v4098_v49, %v4102_v52  ;;  %v836_v5 = vsel %vm835_vm6, %v4110_v59, %v4100_v51  ;;  %v838_v29 = vsel %vm835_vm6, %v4100_v51, %v4110_v59  ;;  %v793_v2 = vpop.permute.xlu0 %792 }
 0x1c4   : > { %6777 = vst [vmem:[#allocation14_spill] sm:$0xff] %v4206_v42  ;;  %v632_v47 = vsel %vm630_vm1, %v4104_v54, %v627_v62  ;;  %v634_v48 = vsel %vm630_vm1, %v627_v62, %v4104_v54  ;;  %v701_v45 = vadd.f32 %v697_v58, %v660_v4  ;;  %v700_v49 = vadd.f32 %v696_v43, %v659_v17 }
 0x1c5   : > { %v737_v52 = vmul.f32 %v4076_v33, %v725_v18  ;;  %v738_v20 = vmul.f32 %v4076_v33, %v726_v26  ;;  %v766_v22 = vmul.f32 %v4189_v1, %v756_v3  ;;  %v767_v24 = vmul.f32 %v4192_v50, %v754_v32 }
 0x1c6   : > { %v4179_v21 = vpop.permute.xlu1 %872  ;;  %v795_v51 = vsel %vm794_vm5, %v4106_v55, %v791_v7  ;;  %v797_v59 = vsel %vm794_vm5, %v791_v7, %v4106_v55  ;;  %v618_v4 = vmul.f32 %v4060_v27, %v4003_v23  ;;  %v619_v33 = vmul.f32 %v4060_v27, %v4030_v25 }
 0x1c7   : > { %v645_v62 = vmul.f32 %v4139_v14, %v634_v48  ;;  %v646_v17 = vmul.f32 %v4142_v15, %v632_v47  ;;  %v848_v18 = vmul.f32 %v4195_v6, %v836_v5  ;;  %v849_v26 = vmul.f32 %v4200_v46, %v838_v29 }
 0x1c8   : > { %v714_v55 = vsel %vm712_vm3, %v4108_v56, %v711_v57  ;;  %v716_v7 = vsel %vm712_vm3, %v711_v57, %v4108_v56  ;;  %v741_v23 = vadd.f32 %v737_v52, %v700_v49  ;;  %v742_v43 = vadd.f32 %v738_v20, %v701_v45  ;;  %v875_v45 = vpop.permute.xlu0 %874 }
 0x1c9   : > { %v807_v25 = vmul.f32 %v4203_v12, %v795_v51  ;;  %v808_v27 = vmul.f32 %v4206_v42, %v797_v59  ;;  %v778_v58 = vmul.f32 %v4078_v34, %v766_v22  ;;  %v779_v32 = vmul.f32 %v4078_v34, %v767_v24 }
 0x1ca   : > { %v666_v44 = vpop.permute.xlu1 %665  ;;  %v4264_v3 = vrot.slane %v4129_v8, %v883_v16  ;;  %v4267_v5 = vrot.slane %v4134_v9, %v883_v16  ;;  %v657_v57 = vmul.f32 %v4064_v28, %v645_v62  ;;  %v658_v56 = vmul.f32 %v4064_v28, %v646_v17 }
 0x1cb   : > { %v796_v47 = vsel %vm794_vm5, %v4112_v60, %v793_v2  ;;  %v798_v48 = vsel %vm794_vm5, %v793_v2, %v4112_v60  ;;  %v860_v34 = vmul.f32 %v4086_v38, %v848_v18  ;;  %v861_v8 = vmul.f32 %v4086_v38, %v849_v26 }
 0x1cc   : > { %6778 = vst [vmem:[#allocation15_spill] sm:$0xff] %v4264_v3  ;;  %6779 = vst [vmem:[#allocation16_spill] sm:$0xff] %v4267_v5  ;;  %v727_v9 = vmul.f32 %v4168_v0, %v716_v7  ;;  %v728_v16 = vmul.f32 %v4171_v19, %v714_v55  ;;  %v783_v49 = vadd.f32 %v779_v32, %v742_v43  ;;  %v916_v43 = vpop.permute.xlu0 %915 }
 0x1cd   : > { %v782_v52 = vadd.f32 %v778_v58, %v741_v23  ;;  %v819_v28 = vmul.f32 %v4084_v37, %v807_v25  ;;  %v820_v20 = vmul.f32 %v4084_v37, %v808_v27  ;;  %v809_v22 = vmul.f32 %v4203_v12, %v796_v47 }
 0x1ce   : > { %v748_v54 = vpop.permute.xlu1 %747  ;;  %v810_v24 = vmul.f32 %v4206_v42, %v798_v48  ;;  %v877_v38 = vsel %vm876_vm7, %v4114_v61, %v4179_v21  ;;  %v879_v60 = vsel %vm876_vm7, %v4179_v21, %v4114_v61  ;;  %v661_v51 = vadd.f32 %v657_v57, %v618_v4 }
 0x1cf   : > { %v662_v59 = vadd.f32 %v658_v56, %v619_v33  ;;  %v739_v17 = vmul.f32 %v4074_v31, %v727_v9  ;;  %v740_v18 = vmul.f32 %v4074_v31, %v728_v16  ;;  %v823_v7 = vadd.f32 %v819_v28, %v782_v52 }
 0x1d0   : > { %v824_v23 = vadd.f32 %v820_v20, %v783_v49  ;;  %v889_v21 = vmul.f32 %v4264_v3, %v877_v38  ;;  %v890_v61 = vmul.f32 %v4267_v5, %v879_v60  ;;  %v821_v4 = vmul.f32 %v4082_v36, %v809_v22 }
 0x1d1   : > { %v822_v33 = vmul.f32 %v4082_v36, %v810_v24  ;;  %v878_v27 = vsel %vm876_vm7, %v4116_v63, %v875_v45  ;;  %v880_v58 = vsel %vm876_vm7, %v875_v45, %v4116_v63  ;;  %v919_v63 = vsel %vm917_vm8, %v4136_v13, %v916_v43  ;;  %v4335_v45 = vld [vmem:[%s6599_s12 + $0x18] ss:$0 sm:$0xff] }
 0x1d2   : > { %v830_v29 = vpop.permute.xlu1 %829  ;;  %v901_v48 = vmul.f32 %v4092_v41, %v889_v21  ;;  %v902_v9 = vmul.f32 %v4092_v41, %v890_v61  ;;  %v921_v16 = vsel %vm917_vm8, %v916_v43, %v4136_v13  ;;  %6781 = vst [vmem:[#allocation18_spill] sm:$0xff] %v4335_v45  ;;  %v891_v22 = vmul.f32 %v4264_v3, %v878_v27 }
 0x1d3   : > { %v892_v13 = vmul.f32 %v4267_v5, %v880_v58  ;;  %v6784_v58 = vld [vmem:[#allocation7_spill] sm:$0xff] }
 0x1d5   : > { %v904_v43 = vmul.f32 %v4090_v40, %v892_v13  ;;  %v1410_v13 = vld [vmem:[%s6785_s5] sm:$0xff] }
 0x1d6   : > { %v670_v2 = vpop.permute.xlu1 %669 }
 0x1d7   : > { %v673_v37 = vsel %vm671_vm2, %v666_v44, %v670_v2  ;;  %v675_v62 = vsel %vm671_vm2, %v670_v2, %v666_v44 }
 0x1d8   : > { %v686_v26 = vmul.f32 %v4154_v53, %v675_v62  ;;  %v687_v55 = vmul.f32 %v4157_v11, %v673_v37  ;;  %v864_v62 = vadd.f32 %v860_v34, %v823_v7 }
 0x1da   : > { %v698_v44 = vmul.f32 %v4072_v30, %v686_v26  ;;  %v699_v25 = vmul.f32 %v4072_v30, %v687_v55  ;;  %v752_v31 = vpop.permute.xlu1 %751  ;;  %v905_v27 = vadd.f32 %v901_v48, %v864_v62  ;;  %v1411_v48 = vld [vmem:[%s6785_s5 + $0x8] sm:$0xff] }
 0x1db   : > { %v755_v32 = vsel %vm753_vm4, %v748_v54, %v752_v31  ;;  %v757_v36 = vsel %vm753_vm4, %v752_v31, %v748_v54  ;;  %v4330_v54 = vld [vmem:[%s6599_s12 + $0x10] ss:$0 sm:$0xff] }
 0x1dc   : > { %v702_v57 = vadd.f32 %v698_v44, %v661_v51  ;;  %v703_v56 = vadd.f32 %v699_v25, %v662_v59  ;;  %v768_v47 = vmul.f32 %v4189_v1, %v757_v36  ;;  %v769_v30 = vmul.f32 %v4192_v50, %v755_v32  ;;  %6780 = vst [vmem:[#allocation17_spill] sm:$0xff] %v4330_v54  ;;  %v6782_v44 = vld [vmem:[#allocation9_spill] sm:$0xff] }
 0x1dd   : > { %v932_v37 = vmul.f32 %v4330_v54, %v919_v63 }
 0x1de   : > { %v743_v49 = vadd.f32 %v739_v17, %v702_v57  ;;  %v744_v41 = vadd.f32 %v740_v18, %v703_v56  ;;  %v780_v52 = vmul.f32 %v4080_v35, %v768_v47  ;;  %v781_v28 = vmul.f32 %v4080_v35, %v769_v30  ;;  %v834_v20 = vpop.permute.xlu1 %833 }
 0x1df   : > { %v837_v24 = vsel %vm835_vm6, %v830_v29, %v834_v20  ;;  %v839_v38 = vsel %vm835_vm6, %v834_v20, %v830_v29  ;;  %v933_v35 = vmul.f32 %v4335_v45, %v921_v16  ;;  %v865_v17 = vadd.f32 %v861_v8, %v824_v23 }
 0x1e0   : > { %v784_v60 = vadd.f32 %v780_v52, %v743_v49  ;;  %v785_v2 = vadd.f32 %v781_v28, %v744_v41  ;;  %v850_v51 = vmul.f32 %v4195_v6, %v837_v24  ;;  %v851_v59 = vmul.f32 %v4200_v46, %v839_v38  ;;  %v1032_v24 = vpop.f32.mrb[0].mxu1  ;;  %v507_v38 = vld [vmem:[%s6765_s2 + $0x18] sm:$0xff] }
 0x1e1   : > { %v903_v29 = vmul.f32 %v4090_v40, %v891_v22  ;;  %v906_v40 = vadd.f32 %v902_v9, %v865_v17  ;;  %v506_v9 = vld [vmem:[%s6765_s2 + $0x10] sm:$0xff]  ;;  %v6788_v17 = vmov 0  }
 0x1e2   : > { %v825_v18 = vadd.f32 %v821_v4, %v784_v60  ;;  %v826_v26 = vadd.f32 %v822_v33, %v785_v2  ;;  %v862_v55 = vmul.f32 %v4088_v39, %v850_v51  ;;  %v863_v21 = vmul.f32 %v4088_v39, %v851_v59  ;;  %v914_v61 = vpop.permute.xlu1 %913  ;;  %v6783_v39 = vld [vmem:[#allocation8_spill] sm:$0xff]  ;;  %v1034_v60 = vpop.f32.mrb[1].mxu1  ;;  %v4380_v51 = vld [vmem:[%s6766_s3 + $0x10] sm:$0xff] }
 0x1e3   : > { %v918_v25 = vsel %vm917_vm8, %v6782_v44, %v914_v61  ;;  %v920_v34 = vsel %vm917_vm8, %v914_v61, %v6782_v44  ;;  %v944_v33 = vmul.f32 %v6783_v39, %v932_v37  ;;  %v945_v31 = vmul.f32 %v6783_v39, %v933_v35  ;;  %v1038_v2 = vpop.f32.mrb[2].mxu1  ;;  %v4386_v37 = vld [vmem:[%s6766_s3 + $0x18] sm:$0xff] }
 0x1e4   : > { %v866_v8 = vadd.f32 %v862_v55, %v825_v18  ;;  %v867_v7 = vadd.f32 %v863_v21, %v826_v26  ;;  %v930_v23 = vmul.f32 %v4330_v54, %v918_v25  ;;  %v931_v4 = vmul.f32 %v4335_v45, %v920_v34  ;;  %v1040_v62 = vpop.f32.mrb[3].mxu1  ;;  %v1332_v18 = vld [vmem:[%s6789_s4 + $0x8] sm:$0xff] }
 0x1e5   : > { %v6786_v59 = vmov 4   ;;  %v6787_v35 = vmov 6   ;;  %1399 = vmatprep.mubr.f32.mxu0 %v1332_v18  ;;  %v6790_v26 = vmov 1   ;;  %v6791_v55 = vmov 2  }
 0x1e6   : > { %v942_v32 = vmul.f32 %v6784_v58, %v930_v23  ;;  %v943_v36 = vmul.f32 %v6784_v58, %v931_v4  ;;  %v907_v57 = vadd.f32 %v903_v29, %v866_v8  ;;  %v908_v56 = vadd.f32 %v904_v43, %v867_v7 }
 0x1e8   : > { %v948_v47 = vadd.f32 %v944_v33, %v907_v57  ;;  %v949_v30 = vadd.f32 %v945_v31, %v908_v56  ;;  %v946_v63 = vadd.f32 %v942_v32, %v905_v27  ;;  %v947_v16 = vadd.f32 %v943_v36, %v906_v40  ;;  %v1331_v57 = vld [vmem:[%s6789_s4] sm:$0xff]  ;;  %v1334_v56 = vld [vmem:[%s6789_s4 + $0x18] sm:$0xff] }
 0x1ea   : > { %v1315_v49 = vmul.f32 %v948_v47, %v948_v47  ;;  %v1316_v41 = vmul.f32 %v949_v30, %v949_v30  ;;  %v1313_v52 = vmul.f32 %v946_v63, %v946_v63  ;;  %v1314_v28 = vmul.f32 %v947_v16, %v947_v16 }
 0x1ec   : > { %v1320_v20 = vadd.f32 %v1316_v41, %v1315_v49  ;;  %v1317_v22 = vadd.f32 %v1314_v28, %v1313_v52  ;;  %v6800_v49 = vmov 8   ;;  %v6801_v41 = vmov 5  }
 0x1ee   : > { %1321 = vadd.xlane.f32.xlu0 %v1320_v20  ;;  %1318 = vadd.xlane.f32.xlu1 %v1317_v22  ;;  %v1424_v20 = vld [vmem:[%s6802_s6] sm:$0xff] }
 0x1ff   : > { %1419 = vperm.xlu1 %3561, %v1411_v48  }
 0x203   : > { %952 = vperm.xlu1 %3561, %v506_v9  }
 0x204   : > { %1414 = vperm.xlu0 %3559, %v1410_v13  }
 0x207   : > { %957 = vperm.xlu1 %3561, %v507_v38   ;;  %v1425_v38 = vld [vmem:[%s6802_s6 + $0x8] sm:$0xff] }
 0x208   : > { %3562 = vset.pattern.permute.xlu0 %v6786_v59 }
 0x209   : > { %1045 = vperm.xlu0 %3562, %v4380_v51  }
 0x20b   : > { %3563 = vset.pattern.permute.xlu1 %v6786_v59 }
 0x20c   : > { %1050 = vperm.xlu1 %3563, %v4386_v37  }
 0x20d   : > { %3569 = vset.pattern.permute.xlu0 %v6787_v35 }
 0x210   : > { %3564 = vset.pattern.permute.xlu1 %v6788_v17 }
 0x211   : > { %1074 = vperm.xlu1 %3564, %v4380_v51  }
 0x215   : > { %1078 = vperm.xlu1 %3564, %v4386_v37  }
 0x219   : > { %3565 = vset.pattern.permute.xlu1 %v6790_v26 }
 0x21a   : > { %1106 = vperm.xlu1 %3565, %v4380_v51  }
 0x21e   : > { %1110 = vperm.xlu1 %3565, %v4386_v37  }
 0x222   : > { %3566 = vset.pattern.permute.xlu1 %v6791_v55 }
 0x27b   : > { %v1322_v21 = vpop.xlane.xlu0 %1321  ;;  %v1319_v61 = vpop.xlane.xlu1 %1318 }
 0x27c   : > { %v1324_v29 = vmax.f32 %v1322_v21, 1e-24  ;;  %v1323_v43 = vmax.f32 %v1319_v61, 1e-24 }
 0x27e   : > { %3621 = vrsqrt.f32 %v1324_v29 }
 0x27f   : > { %3623 = vrsqrt.f32 %v1323_v43  ;;  %v4402_v44 = vpop.permute.xlu1 %1419 }
 0x283   : > { %v953_v25 = vpop.permute.xlu1 %952  ;;  %v1415_v52 = vpop.permute.xlu0 %1414 }
 0x284   : > { %v4404_v34 = vadd.f32 %v1032_v24, %v953_v25  ;;  %v4406_v8 = vadd.f32 %v1034_v60, %v953_v25 }
 0x286   : > { %1057 = vrot.lane.b32.xlu1 %v4404_v34, %s6792_s30  ;;  %1125 = vrot.lane.b32.xlu0 %v4406_v8, %s6793_s24 }
 0x287   : > { %v958_v7 = vpop.permute.xlu1 %957 }
 0x288   : > { %v3622_v23 = vpop.eup %3621  ;;  %v4412_v4 = vadd.f32 %v1038_v2, %v958_v7  ;;  %v4420_v36 = vadd.f32 %v1040_v62, %v958_v7 }
 0x289   : > { %v3624_v39 = vpop.eup %3623  ;;  %v1330_v33 = vmul.f32 %v3622_v23, %v949_v30  ;;  %v1329_v31 = vmul.f32 %v3622_v23, %v948_v47  ;;  %v1333_v47 = vld [vmem:[%s6789_s4 + $0x10] sm:$0xff]  ;;  %v6795_v30 = vmov 0.0  }
 0x28a   : > { %1059 = vrot.lane.b32.xlu1 %v4412_v4, %s6792_s30  ;;  %v1328_v27 = vmul.f32 %v3624_v39, %v947_v16  ;;  %v1327_v40 = vmul.f32 %v3624_v39, %v946_v63  ;;  %1153 = vrot.lane.b32.xlu0 %v4404_v34, %s6794_s15  ;;  %v6796_v63 = vmov 3   ;;  %v6798_v16 = vmov 7  }
 0x28b   : > { %v4485_v9 = vpop.permute.xlu1 %1050 }
 0x28c   : > { %v3456_v58 = vpack.c.bf16 %v1330_v33, %v1328_v27  ;;  %v3458_v32 = vpack.c.bf16 %v1329_v31, %v1327_v40  ;;  %v1046_v27 = vpop.permute.xlu0 %1045 }
 0x28e   : > { %3457 = vmatprep.subr.bf16.mxu0 %v3456_v58  ;;  %1061 = vrot.lane.b32.xlu1 %v4406_v8, %s6792_s30 }
 0x28f   : > { %3459 = vmatpush1.bf16.xpose.msra.mxu0 %v3458_v32  ;;  %1155 = vrot.lane.b32.xlu0 %v4412_v4, %s6794_s15 }
 0x290   : > { %v4492_v21 = vpop.permute.xlu1 %1074 }
 0x292   : > { %1063 = vrot.lane.b32.xlu1 %v4420_v36, %s6792_s30 }
 0x293   : > { %1157 = vrot.lane.b32.xlu0 %v4406_v8, %s6794_s15 }
 0x294   : > { %v4495_v29 = vpop.permute.xlu1 %1078 }
 0x296   : > { %1400 = vmatmul.mubr.f32.vlgmr.msra.gmra.mrb[4].mxu0 %v1331_v57  ;;  %1138 = vperm.xlu1 %3566, %v4380_v51  }
 0x297   : > { %1404 = vmatprep.mubr.f32.mxu0 %v1334_v56  ;;  %1159 = vrot.lane.b32.xlu0 %v4420_v36, %s6794_s15 }
 0x299   : > { %v4497_v43 = vpop.permute.xlu1 %1106 }
 0x29a   : > { %1405 = vmatmul.mubr.f32.gmra.mrb[6].mxu0 %v1333_v47  ;;  %1142 = vperm.xlu1 %3566, %v4386_v37  }
 0x29b   : > { %1234 = vperm.xlu0 %3569, %v4380_v51   ;;  %1605 = vmatprep.mubr.f32.mxu0 %v6795_v30 }
 0x29d   : > { %v4501_v25 = vpop.permute.xlu1 %1110 }
 0x29e   : > { %1089 = vrot.lane.b32.xlu1 %v4404_v34, %s6769_s16 }
 0x29f   : > { %3567 = vset.pattern.permute.xlu1 %v6796_v63  ;;  %1238 = vperm.xlu0 %3569, %v4386_v37  }
 0x2a2   : > { %1091 = vrot.lane.b32.xlu1 %v4412_v4, %s6769_s16 }
 0x2a3   : > { %1187 = vrot.lane.b32.xlu0 %v4412_v4, %s6797_s1 }
 0x2a4   : > { %3570 = vset.pattern.permute.xlu0 %v6798_v16 }
 0x2a6   : > { %1093 = vrot.lane.b32.xlu1 %v4406_v8, %s6769_s16 }
 0x2a7   : > { %1189 = vrot.lane.b32.xlu0 %v4406_v8, %s6797_s1 }
 0x2aa   : > { %1095 = vrot.lane.b32.xlu1 %v4420_v36, %s6769_s16 }
 0x2ab   : > { %1191 = vrot.lane.b32.xlu0 %v4420_v36, %s6797_s1 }
 0x2ae   : > { %1170 = vperm.xlu1 %3567, %v4380_v51  }
 0x2af   : > { %1266 = vperm.xlu0 %3570, %v4380_v51  }
 0x2b2   : > { %1174 = vperm.xlu1 %3567, %v4386_v37  }
 0x2b3   : > { %1217 = vrot.lane.b32.xlu0 %v4404_v34, %s6799_s23 }
 0x2b4   : > { %3572 = vset.pattern.permute.xlu0 %v6800_v49 }
 0x2b6   : > { %1121 = vrot.lane.b32.xlu1 %v4404_v34, %s6793_s24 }
 0x2b7   : > { %3568 = vset.pattern.permute.xlu1 %v6801_v41 }
 0x2ba   : > { %1123 = vrot.lane.b32.xlu1 %v4412_v4, %s6793_s24 }
 0x2be   : > { %1127 = vrot.lane.b32.xlu1 %v4420_v36, %s6793_s24 }
 0x2c2   : > { %1202 = vperm.xlu1 %3568, %v4380_v51  }
 0x2c6   : > { %1206 = vperm.xlu1 %3568, %v4386_v37  }
 0x2ca   : > { %1185 = vrot.lane.b32.xlu1 %v4404_v34, %s6797_s1 }
 0x2cb   : > { %3571 = vset.pattern.permute.xlu1 %v6798_v16 }
 0x2ce   : > { %1270 = vperm.xlu1 %3571, %v4386_v37  }
 0x2d2   : > { %1219 = vrot.lane.b32.xlu1 %v4412_v4, %s6799_s23 }
 0x2d3   : > { %3573 = vset.pattern.permute.xlu1 %v6800_v49 }
 0x2f8   : > { %v4530_v58 = vpop.permute.xlu0 %1125 }
 0x2fc   : > { %v4534_v57 = vpop.permute.xlu0 %1153 }
 0x301   : > { %v4538_v47 = vpop.permute.xlu0 %1155 }
 0x369   : > { %v1401_v28 = vpop.f32.mrb[4].mxu0 }
 0x36a   : > { %v1422_v22 = vmul.f32 %v1415_v52, %v1401_v28  ;;  %v1403_v48 = vpop.f32.mrb[5].mxu0  ;;  %v4542_v28 = vpop.permute.xlu0 %1157 }
 0x36c   : > { %v1426_v13 = vadd.f32 %v1424_v20, %v1422_v22 }
 0x36d   : > { %v1406_v24 = vpop.f32.mrb[6].mxu0 }
 0x36e   : > { %v1423_v60 = vmul.f32 %v4402_v44, %v1406_v24  ;;  %v1408_v2 = vpop.f32.mrb[7].mxu0  ;;  %v1428_v62 = vsel %vm522_vm0, %v1426_v13, -inf  ;;  %v1058_v44 = vpop.permute.xlu1 %1057 }
 0x36f   : > { %1429 = vmax.xlane.f32.xlu1 %v1428_v62  ;;  %v4546_v22 = vpop.permute.xlu0 %1159 }
 0x370   : > { %v1427_v18 = vadd.f32 %v1425_v38, %v1423_v60 }
 0x372   : > { %v1431_v61 = vsel %vm522_vm0, %v1427_v18, -inf  ;;  %v4512_v7 = vpop.permute.xlu1 %1059 }
 0x373   : > { %1432 = vmax.xlane.f32.xlu0 %v1431_v61  ;;  %v4550_v24 = vpop.permute.xlu0 %1234 }
 0x374   : > { %6805 = vst [vmem:[#allocation9_spill] sm:$0xff] %v4550_v24 }
 0x377   : > { %v4554_v60 = vpop.permute.xlu0 %1238 }
 0x378   : > { %6806 = vst [vmem:[#allocation8_spill] sm:$0xff] %v4554_v60 }
 0x37b   : > { %v4558_v62 = vpop.permute.xlu0 %1187 }
 0x37f   : > { %v4562_v49 = vpop.permute.xlu0 %1189 }
 0x380   : > { %1223 = vrot.lane.b32.xlu1 %v4420_v36, %s6799_s23 }
 0x383   : > { %v4566_v35 = vpop.permute.xlu0 %1191 }
 0x384   : > { %1302 = vperm.xlu1 %3573, %v4386_v37   ;;  %v1062_v37 = vpop.permute.xlu1 %1061 }
 0x387   : > { %v4570_v63 = vpop.permute.xlu0 %1266 }
 0x388   : > { %1249 = vrot.lane.b32.xlu1 %v4404_v34, %s6803_s21  ;;  %v1064_v23 = vpop.permute.xlu1 %1063  ;;  %6808 = vst [vmem:[#allocation19_spill] sm:$0xff] %v4570_v63 }
 0x389   : > { %1221 = vrot.lane.b32.xlu0 %v4406_v8, %s6799_s23  ;;  %3574 = vset.pattern.permute.xlu1 %v6788_v17 }
 0x38b   : > { %v4574_v26 = vpop.permute.xlu0 %1217 }
 0x38c   : > { %1253 = vrot.lane.b32.xlu1 %v4406_v8, %s6803_s21  ;;  %v4522_v39 = vpop.permute.xlu1 %1138 }
 0x38d   : > { %1298 = vperm.xlu0 %3572, %v4380_v51  }
 0x390   : > { %1281 = vrot.lane.b32.xlu1 %v4404_v34, %s6804_s22  ;;  %v4524_v33 = vpop.permute.xlu1 %1142 }
 0x391   : > { %1251 = vrot.lane.b32.xlu0 %v4412_v4, %s6803_s21 }
 0x394   : > { %v4526_v51 = vpop.permute.xlu1 %1089 }
 0x395   : > { %1255 = vrot.lane.b32.xlu0 %v4420_v36, %s6803_s21 }
 0x398   : > { %v4528_v31 = vpop.permute.xlu1 %1091 }
 0x399   : > { %1283 = vrot.lane.b32.xlu0 %v4412_v4, %s6804_s22 }
 0x39c   : > { %v1094_v40 = vpop.permute.xlu1 %1093 }
 0x3a0   : > { %v4532_v32 = vpop.permute.xlu1 %1095 }
 0x3a4   : > { %v4536_v56 = vpop.permute.xlu1 %1170 }
 0x3a8   : > { %v4540_v52 = vpop.permute.xlu1 %1174 }
 0x3ac   : > { %v4544_v20 = vpop.permute.xlu1 %1121 }
 0x3b0   : > { %v4548_v48 = vpop.permute.xlu1 %1123 }
 0x3b4   : > { %v4552_v38 = vpop.permute.xlu1 %1127 }
 0x3b8   : > { %v4556_v2 = vpop.permute.xlu1 %1202 }
 0x3bc   : > { %v4560_v61 = vpop.permute.xlu1 %1206 }
 0x3c0   : > { %v4564_v16 = vpop.permute.xlu1 %1185 }
 0x3c4   : > { %v4568_v41 = vpop.permute.xlu1 %1270 }
 0x3c5   : > { %6807 = vst [vmem:[#allocation7_spill] sm:$0xff] %v4568_v41 }
 0x3c8   : > { %v4572_v55 = vpop.permute.xlu1 %1219 }
 0x3fc   : > { %v1430_v17 = vpop.xlane.xlu1 %1429 }
 0x3fd   : > { %v1434_v30 = vsub.f32 %v1426_v13, %v1430_v17  ;;  %v1065_v17 = vsel %vm630_vm1, %v1058_v44, %v1062_v37 }
 0x3fe   : > { %v1070_v13 = vmul.f32 %v1065_v17, %v4142_v15  ;;  %v1100_v17 = vsel %vm671_vm2, %v4532_v32, %v4528_v31 }
 0x3ff   : > { %v1436_v45 = vmul.f32 1.442695, %v1434_v30 }
 0x400   : > { %v1433_v54 = vpop.xlane.xlu0 %1432  ;;  %v4601_v30 = vpop.permute.xlu1 %1223 }
 0x401   : > { %3625 = vpow2.f32 %v1436_v45  ;;  %v1435_v24 = vsub.f32 %v1427_v18, %v1433_v54  ;;  %v4591_v54 = vld [vmem:[%s6597_s10 + $0x18] sm:$0xff] }
 0x402   : > { %6809 = vst [vmem:[#allocation20_spill] sm:$0xff] %v4591_v54 }
 0x403   : > { %v1438_v60 = vmul.f32 1.442695, %v1435_v24  ;;  %v1068_v24 = vsel %vm630_vm1, %v1064_v23, %v4512_v7 }
 0x404   : > { %v4597_v45 = vpop.permute.xlu0 %1221 }
 0x405   : > { %3627 = vpow2.f32 %v1438_v60 }
 0x40b   : > { %v4576_v5 = vpop.eup %3625 }
 0x40c   : > { %v1440_v3 = vsel %vm522_vm0, %v4576_v5, 0.0  ;;  %v4605_v18 = vpop.permute.xlu0 %1298 }
 0x40d   : > { %1441 = vadd.xlane.f32.xlu0 %v1440_v3  ;;  %v1067_v3 = vsel %vm630_vm1, %v1062_v37, %v1058_v44  ;;  %v1082_v44 = vmul.f32 %v4492_v21, %v1070_v13  ;;  %v1071_v37 = vmul.f32 %v1068_v24, %v4139_v14  ;;  %v1056_v13 = vmul.f32 %v4485_v9, %v4420_v36 }
 0x40f   : > { %v4580_v41 = vpop.eup %3627 }
 0x410   : > { %v1443_v63 = vsel %vm522_vm0, %v4580_v41, 0.0 }
 0x411   : > { %1444 = vadd.xlane.f32.xlu1 %v1443_v63  ;;  %v1069_v63 = vmul.f32 %v1067_v3, %v4139_v14  ;;  %v1099_v3 = vsel %vm671_vm2, %v1094_v40, %v4526_v51  ;;  %v1131_v14 = vsel %vm712_vm3, %v4530_v58, %v4544_v20 }
 0x413   : > { %v1081_v60 = vmul.f32 %v4492_v21, %v1069_v63  ;;  %v1055_v63 = vmul.f32 %v4485_v9, %v4412_v4  ;;  %v1054_v21 = vmul.f32 %v1046_v27, %v4406_v8  ;;  %v1103_v9 = vmul.f32 %v1100_v17, %v4154_v53 }
 0x422   : > { %1285 = vrot.lane.b32.xlu1 %v4406_v8, %s6804_s22  ;;  %v4643_v8 = vpop.permute.xlu0 %1251 }
 0x423   : > { %1287 = vrot.lane.b32.xlu0 %v4420_v36, %s6804_s22  ;;  %v1098_v36 = vsel %vm671_vm2, %v4528_v31, %v4532_v32  ;;  %v1130_v31 = vsel %vm712_vm3, %v4548_v48, %v4552_v38 }
 0x427   : > { %2340 = vperm.xlu0 %3572, %v4591_v54   ;;  %v1066_v54 = vsel %vm630_vm1, %v4512_v7, %v1064_v23  ;;  %v1053_v7 = vmul.f32 %v1046_v27, %v4404_v34  ;;  %v1097_v23 = vsel %vm671_vm2, %v4526_v51, %v1094_v40  ;;  %v1132_v34 = vsel %vm712_vm3, %v4552_v38, %v4548_v48 }
 0x428   : > { %v1072_v24 = vmul.f32 %v1066_v54, %v4142_v15  ;;  %v1101_v51 = vmul.f32 %v1099_v3, %v4154_v53  ;;  %v1086_v27 = vadd.f32 %v1082_v44, %v1054_v21  ;;  %v1083_v40 = vmul.f32 %v4495_v29, %v1071_v37 }
 0x429   : > { %v1085_v4 = vadd.f32 %v1081_v60, %v1053_v7  ;;  %v1102_v54 = vmul.f32 %v1097_v23, %v4157_v11  ;;  %v1129_v15 = vsel %vm712_vm3, %v4544_v20, %v4530_v58  ;;  %v1163_v60 = vsel %vm753_vm4, %v4542_v28, %v4534_v57  ;;  %v1256_v23 = vpop.permute.xlu0 %1255 }
 0x42a   : > { %v1133_v3 = vmul.f32 %v1131_v14, %v4168_v0  ;;  %v1135_v32 = vmul.f32 %v1132_v34, %v4168_v0  ;;  %v1084_v44 = vmul.f32 %v4495_v29, %v1072_v24  ;;  %v1104_v37 = vmul.f32 %v1098_v36, %v4157_v11 }
 0x42b   : > { %3590 = vset.pattern.permute.xlu0 %v6786_v59  ;;  %v4623_v59 = vpop.permute.xlu1 %1302  ;;  %v1161_v58 = vsel %vm753_vm4, %v4534_v57, %v4542_v28  ;;  %v1164_v14 = vsel %vm753_vm4, %v4546_v22, %v4538_v47  ;;  %v1113_v17 = vmul.f32 %v4497_v43, %v1101_v51  ;;  %v1115_v48 = vmul.f32 %v4501_v25, %v1103_v9 }
 0x42c   : > { %v1162_v29 = vsel %vm753_vm4, %v4538_v47, %v4546_v22  ;;  %v1134_v38 = vmul.f32 %v1129_v15, %v4171_v19  ;;  %v1087_v7 = vadd.f32 %v1083_v40, %v1055_v63  ;;  %v1114_v57 = vmul.f32 %v4497_v43, %v1102_v54 }
 0x42d   : > { %v1165_v28 = vmul.f32 %v1163_v60, %v4189_v1  ;;  %v1136_v21 = vmul.f32 %v1130_v31, %v4171_v19  ;;  %v1167_v24 = vmul.f32 %v1164_v14, %v4189_v1  ;;  %v1145_v34 = vmul.f32 %v4522_v39, %v1133_v3 }
 0x42e   : > { %v1147_v51 = vmul.f32 %v4524_v33, %v1135_v32  ;;  %v1194_v47 = vsel %vm794_vm5, %v4558_v62, %v4566_v35  ;;  %v1088_v15 = vadd.f32 %v1084_v44, %v1056_v13  ;;  %v1116_v22 = vmul.f32 %v4501_v25, %v1104_v37 }
 0x42f   : > { %v1250_v20 = vpop.permute.xlu1 %1249  ;;  %v1166_v43 = vmul.f32 %v1161_v58, %v4192_v50  ;;  %v1168_v63 = vmul.f32 %v1162_v29, %v4192_v50  ;;  %v1117_v36 = vadd.f32 %v1113_v17, %v1085_v4  ;;  %v1119_v9 = vadd.f32 %v1115_v48, %v1087_v7 }
 0x430   : > { %v1146_v40 = vmul.f32 %v4522_v39, %v1134_v38  ;;  %v1196_v54 = vsel %vm794_vm5, %v4566_v35, %v4558_v62  ;;  %v1118_v60 = vadd.f32 %v1114_v57, %v1086_v27  ;;  %v1177_v3 = vmul.f32 %v4536_v56, %v1165_v28  ;;  %v1284_v27 = vpop.permute.xlu0 %1283 }
 0x431   : > { %v1148_v13 = vmul.f32 %v4524_v33, %v1136_v21  ;;  %v1199_v25 = vmul.f32 %v1194_v47, %v4203_v12  ;;  %v1179_v32 = vmul.f32 %v4540_v52, %v1167_v24  ;;  %v1149_v44 = vadd.f32 %v1145_v34, %v1117_v36 }
 0x432   : > { %v1151_v4 = vadd.f32 %v1147_v51, %v1119_v9  ;;  %v1193_v39 = vsel %vm794_vm5, %v4564_v16, %v4562_v49  ;;  %v1120_v37 = vadd.f32 %v1116_v22, %v1088_v15  ;;  %v1178_v35 = vmul.f32 %v4536_v56, %v1166_v43  ;;  %v6810_v9 = vld [vmem:[#allocation15_spill] sm:$0xff] }
 0x433   : > { %v1254_v31 = vpop.permute.xlu1 %1253  ;;  %v1200_v62 = vmul.f32 %v1196_v54, %v4206_v42  ;;  %v1195_v33 = vsel %vm794_vm5, %v4562_v49, %v4564_v16  ;;  %v1180_v58 = vmul.f32 %v4540_v52, %v1168_v63  ;;  %v1150_v14 = vadd.f32 %v1146_v40, %v1118_v60  ;;  %v6811_v54 = vld [vmem:[#allocation16_spill] sm:$0xff] }
 0x434   : > { %v1226_v17 = vsel %vm835_vm6, %v4572_v55, %v4601_v30  ;;  %v1228_v56 = vsel %vm835_vm6, %v4601_v30, %v4572_v55  ;;  %v1152_v48 = vadd.f32 %v1148_v13, %v1120_v37  ;;  %v1197_v29 = vmul.f32 %v1193_v39, %v4203_v12 }
 0x435   : > { %v1225_v16 = vsel %vm835_vm6, %v4574_v26, %v4597_v45  ;;  %v1227_v49 = vsel %vm835_vm6, %v4597_v45, %v4574_v26  ;;  %v1183_v52 = vadd.f32 %v1179_v32, %v1151_v4  ;;  %v1211_v38 = vmul.f32 %v4560_v61, %v1199_v25  ;;  %v6813_v32 = vld [vmem:[#allocation9_spill] sm:$0xff] }
 0x436   : > { %v1181_v7 = vadd.f32 %v1177_v3, %v1149_v44  ;;  %v1198_v57 = vmul.f32 %v1195_v33, %v4206_v42  ;;  %v1231_v55 = vmul.f32 %v1226_v17, %v4195_v6  ;;  %v1232_v30 = vmul.f32 %v1228_v56, %v4200_v46  ;;  %v6812_v3 = vld [vmem:[#allocation8_spill] sm:$0xff]  ;;  %v6816_v56 = vld [vmem:[#allocation19_spill] sm:$0xff] }
 0x437   : > { %v1257_v28 = vsel %vm876_vm7, %v1250_v20, %v1254_v31  ;;  %v1259_v21 = vsel %vm876_vm7, %v1254_v31, %v1250_v20  ;;  %v1282_v24 = vpop.permute.xlu1 %1281  ;;  %v1229_v26 = vmul.f32 %v1225_v16, %v4195_v6  ;;  %v1230_v45 = vmul.f32 %v1227_v49, %v4200_v46 }
 0x438   : > { %v1258_v51 = vsel %vm876_vm7, %v4643_v8, %v1256_v23  ;;  %v1260_v47 = vsel %vm876_vm7, %v1256_v23, %v4643_v8  ;;  %v1184_v15 = vadd.f32 %v1180_v58, %v1152_v48  ;;  %v1212_v22 = vmul.f32 %v4560_v61, %v1200_v62  ;;  %v6814_v62 = vld [vmem:[#allocation17_spill] sm:$0xff]  ;;  %v6815_v58 = vld [vmem:[#allocation18_spill] sm:$0xff] }
 0x439   : > { %v1182_v43 = vadd.f32 %v1178_v35, %v1150_v14  ;;  %v1209_v20 = vmul.f32 %v4556_v2, %v1197_v29  ;;  %v1215_v63 = vadd.f32 %v1211_v38, %v1183_v52  ;;  %v1210_v36 = vmul.f32 %v4556_v2, %v1198_v57  ;;  %v6817_v52 = vld [vmem:[#allocation7_spill] sm:$0xff] }
 0x43a   : > { %v1261_v40 = vmul.f32 %v1257_v28, %v6810_v9  ;;  %v1262_v60 = vmul.f32 %v1259_v21, %v6811_v54  ;;  %v1243_v13 = vmul.f32 %v6812_v3, %v1231_v55  ;;  %v1244_v25 = vmul.f32 %v6812_v3, %v1232_v30 }
 0x43b   : > { %v1263_v31 = vmul.f32 %v1258_v51, %v6810_v9  ;;  %v1264_v8 = vmul.f32 %v1260_v47, %v6811_v54  ;;  %v1241_v44 = vmul.f32 %v6813_v32, %v1229_v26  ;;  %v1242_v4 = vmul.f32 %v6813_v32, %v1230_v45 }
 0x43c   : > { %v1216_v37 = vadd.f32 %v1212_v22, %v1184_v15  ;;  %v1213_v35 = vadd.f32 %v1209_v20, %v1181_v7  ;;  %v1214_v17 = vadd.f32 %v1210_v36, %v1182_v43  ;;  %v1273_v48 = vmul.f32 %v6816_v56, %v1261_v40 }
 0x43d   : > { %v1274_v29 = vmul.f32 %v6816_v56, %v1262_v60  ;;  %v1247_v16 = vadd.f32 %v1243_v13, %v1215_v63  ;;  %v1275_v38 = vmul.f32 %v6817_v52, %v1263_v31  ;;  %v1276_v57 = vmul.f32 %v6817_v52, %v1264_v8  ;;  %v1688_v52 = vld [vmem:[%s6596_s9 + $0x30] sm:$0xff] }
 0x43e   : > { %v1248_v49 = vadd.f32 %v1244_v25, %v1216_v37  ;;  %v1246_v30 = vadd.f32 %v1242_v4, %v1214_v17  ;;  %v6818_v31 = vmov 0.0   ;;  %v1685_v37 = vld [vmem:[%s6596_s9 + $0x18] sm:$0xff]  ;;  %v6821_v17 = vld [vmem:[#allocation20_spill] sm:$0xff]  ;;  %v6822_v56 = vmov 1  }
 0x43f   : > { %v1279_v15 = vadd.f32 %v1275_v38, %v1247_v16  ;;  %v1686_v16 = vld [vmem:[%s6596_s9 + $0x20] sm:$0xff]  ;;  %v4855_v38 = vld [vmem:[%s6597_s10 + $0x30] sm:$0xff] }
 0x440   : > { %v1278_v47 = vadd.f32 %v1274_v29, %v1246_v30  ;;  %v1280_v20 = vadd.f32 %v1276_v57, %v1248_v49  ;;  %v6824_v29 = vmov 3   ;;  %v4846_v49 = vld [vmem:[%s6597_s10 + $0x20] sm:$0xff]  ;;  %v1689_v57 = vld [vmem:[%s6596_s9 + $0x38] sm:$0xff]  ;;  %v6825_v30 = vmov 5  }
 0x49a   : > { %v1442_v34 = vpop.xlane.xlu0 %1441 }
 0x49b   : > { %3629 = vrcp.f32 %v1442_v34 }
 0x49e   : > { %v1288_v23 = vpop.permute.xlu0 %1287  ;;  %v1445_v61 = vpop.xlane.xlu1 %1444 }
 0x49f   : > { %v1290_v2 = vsel %vm917_vm8, %v1284_v27, %v1288_v23  ;;  %v1292_v39 = vsel %vm917_vm8, %v1288_v23, %v1284_v27  ;;  %v1245_v27 = vadd.f32 %v1241_v44, %v1213_v35  ;;  %3631 = vrcp.f32 %v1445_v61 }
 0x4a0   : > { %v1295_v33 = vmul.f32 %v6814_v62, %v1290_v2  ;;  %v1296_v14 = vmul.f32 %v6815_v58, %v1292_v39  ;;  %v1534_v2 = vld [vmem:[%s6594_s7 + $0x8] sm:$0xff]  ;;  %v1684_v39 = vld [vmem:[%s6596_s9 + $0x10] sm:$0xff]  ;;  %v6819_v35 = vmov 4  }
 0x4a1   : > { %v1277_v51 = vadd.f32 %v1273_v48, %v1245_v27  ;;  %v6823_v48 = vmov 2   ;;  %v1687_v27 = vld [vmem:[%s6596_s9 + $0x28] sm:$0xff] }
 0x4a2   : > { %v1286_v55 = vpop.permute.xlu1 %1285  ;;  %v1307_v21 = vmul.f32 %v4623_v59, %v1295_v33  ;;  %v1308_v26 = vmul.f32 %v4623_v59, %v1296_v14  ;;  %v4816_v33 = vld [vmem:[%s6597_s10 + $0x10] sm:$0xff]  ;;  %v4823_v14 = vld [vmem:[%s6597_s10] sm:$0xff] }
 0x4a3   : > { %v1289_v7 = vsel %vm917_vm8, %v1282_v24, %v1286_v55  ;;  %v1291_v28 = vsel %vm917_vm8, %v1286_v55, %v1282_v24  ;;  %1821 = vperm.xlu0 %3590, %v4823_v14   ;;  %v1683_v55 = vld [vmem:[%s6596_s9 + $0x8] sm:$0xff] }
 0x4a4   : > { %v1293_v34 = vmul.f32 %v6814_v62, %v1289_v7  ;;  %v1294_v45 = vmul.f32 %v6815_v58, %v1291_v28  ;;  %v1311_v63 = vadd.f32 %v1307_v21, %v1279_v15  ;;  %v1312_v40 = vadd.f32 %v1308_v26, %v1280_v20  ;;  %v4810_v62 = vld [vmem:[%s6597_s10 + $0x8] sm:$0xff]  ;;  %v4884_v21 = vld [vmem:[%s6597_s10 + $0x38] sm:$0xff] }
 0x4a5   : > { %v3630_v59 = vpop.eup %3629  ;;  %v6820_v58 = vmov 0   ;;  %v4876_v7 = vld [vmem:[%s6597_s10 + $0x28] sm:$0xff]  ;;  %v6826_v28 = vmov 6   ;;  %v6827_v26 = vmov 7  }
 0x4a6   : > { %v1305_v22 = vmul.f32 %v4605_v18, %v1293_v34  ;;  %v1306_v43 = vmul.f32 %v4605_v18, %v1294_v45  ;;  %v1448_v13 = vmul.f32 %v3630_v59, %v4576_v5  ;;  %v1682_v18 = vld [vmem:[%s6596_s9] sm:$0xff]  ;;  %v6828_v34 = vmov 8  }
 0x4a7   : > { %1700 = vperm.xlu1 %3574, %v1682_v18   ;;  %1836 = vperm.xlu0 %3590, %v6821_v17  }
 0x4a8   : > { %v1309_v36 = vadd.f32 %v1305_v22, %v1277_v51  ;;  %v1310_v24 = vadd.f32 %v1306_v43, %v1278_v47  ;;  %v3669_v47 = vld [vmem:[%s3909_s17] sm:$0xff]  ;;  %v3670_v22 = vld [vmem:[%s3909_s17 + $0x8] sm:$0xff] }
 0x4a9   : > { %v3632_v25 = vpop.eup %3631 }
 0x4aa   : > { %v3460_v60 = vpack.c.bf16 %v1312_v40, %v1310_v24  ;;  %v3462_v3 = vpack.c.bf16 %v1311_v63, %v1309_v36  ;;  %v1449_v8 = vmul.f32 %v3632_v25, %v4580_v41  ;;  %v1533_v41 = vld [vmem:[%s6594_s7] sm:$0xff]  ;;  %v3671_v63 = vld [vmem:[%s3909_s17 + $0x10] sm:$0xff]  ;;  %v3672_v40 = vld [vmem:[%s3909_s17 + $0x18] sm:$0xff]  ;;  %s431_s17 = sand.u32 1, %s3734_s26  }
 0x4ab   : > { %1710 = vperm.xlu1 %3574, %v1684_v39   ;;  %2698 = vperm.xlu0 %3590, %v4846_v49   ;;  %s3418_s2 = sshll.u32 %s431_s17, 5  ;;  %s6545_s29 = scalar_lea.sflag [#allocation3], %s431_s17 }
 0x4ac   : > { %3461 = vmatprep.subr.bf16.mxu1 %v3460_v60  ;;  %s433_s3 = scalar_lea.vmem [#allocation2], %s3418_s2 }
 0x4ad   : > { %3463 = vmatpush1.bf16.msra.mxu1 %v3462_v3  ;;  %s3352_s4 = sshll.u32 %s433_s3, 4  ;;  %s6536_s4 = int_to_ptr.vmem [resolvable:$true] %s3352_s4 }
 0x4af   : > { %1715 = vperm.xlu1 %3574, %v1685_v37   ;;  %2708 = vperm.xlu0 %3590, %v4855_v38  }
 0x4b0   : > { %3427 = vmatmul.mubr.msk.f32.vlgmr.msra.gmra.mrb[4].mxu1 %vm522_vm0, %v1448_v13 }
 0x4b1   : > { %1526 = vmatprep.mubr.f32.mxu1 %v6818_v31 }
 0x4b3   : > { %3575 = vset.pattern.permute.xlu1 %v6819_v35  ;;  %3594 = vset.pattern.permute.xlu0 %v6820_v58 }
 0x4b4   : > { %3428 = vmatmul.mubr.msk.f32.gmra.mrb[6].mxu1 %vm522_vm0, %v1449_v8  ;;  %1826 = vperm.xlu1 %3575, %v4810_v62  }
 0x4b5   : > { %1794 = vmatprep.mubr.f32.mxu1 %v6818_v31  ;;  %1705 = vperm.xlu0 %3594, %v1683_v55  }
 0x4b8   : > { %1831 = vperm.xlu1 %3575, %v4816_v33  }
 0x4b9   : > { %1884 = vperm.xlu0 %3594, %v4810_v62  }
 0x4bc   : > { %3576 = vset.pattern.permute.xlu1 %v6820_v58 }
 0x4bd   : > { %1880 = vperm.xlu1 %3576, %v4823_v14   ;;  %2582 = vperm.xlu0 %3594, %v1687_v27  }
 0x4c1   : > { %1888 = vperm.xlu1 %3576, %v4816_v33   ;;  %2761 = vperm.xlu0 %3594, %v4876_v7  }
 0x4c5   : > { %1892 = vperm.xlu1 %3576, %v6821_v17   ;;  %2769 = vperm.xlu0 %3594, %v4884_v21  }
 0x4c9   : > { %3577 = vset.pattern.permute.xlu1 %v6822_v56  ;;  %3597 = vset.pattern.permute.xlu0 %v6822_v56 }
 0x4ca   : > { %1948 = vperm.xlu1 %3577, %v4810_v62   ;;  %1944 = vperm.xlu0 %3597, %v4823_v14  }
 0x4ce   : > { %1952 = vperm.xlu1 %3577, %v4816_v33   ;;  %1956 = vperm.xlu0 %3597, %v6821_v17  }
 0x4d2   : > { %3578 = vset.pattern.permute.xlu1 %v6823_v48  ;;  %2829 = vperm.xlu0 %3597, %v4855_v38  }
 0x4d3   : > { %2008 = vperm.xlu1 %3578, %v4823_v14  }
 0x4d6   : > { %3599 = vset.pattern.permute.xlu0 %v6823_v48 }
 0x4d7   : > { %2016 = vperm.xlu1 %3578, %v4816_v33   ;;  %2012 = vperm.xlu0 %3599, %v4810_v62  }
 0x4db   : > { %2020 = vperm.xlu1 %3578, %v6821_v17   ;;  %2893 = vperm.xlu0 %3599, %v4855_v38  }
 0x4df   : > { %3579 = vset.pattern.permute.xlu1 %v6824_v29  ;;  %3602 = vset.pattern.permute.xlu0 %v6824_v29 }
 0x4e0   : > { %2076 = vperm.xlu1 %3579, %v4810_v62   ;;  %2072 = vperm.xlu0 %3602, %v4823_v14  }
 0x4e4   : > { %3580 = vset.pattern.permute.xlu1 %v6820_v58  ;;  %2080 = vperm.xlu0 %3602, %v4816_v33  }
 0x4e5   : > { %2577 = vperm.xlu1 %3580, %v1686_v16  }
 0x4e8   : > { %2953 = vperm.xlu0 %3602, %v4876_v7  }
 0x4e9   : > { %2587 = vperm.xlu1 %3580, %v1688_v52  }
 0x4ec   : > { %2957 = vperm.xlu0 %3602, %v4855_v38  }
 0x4ed   : > { %2592 = vperm.xlu1 %3580, %v1689_v57  }
 0x4f0   : > { %3605 = vset.pattern.permute.xlu0 %v6825_v30 }
 0x4f1   : > { %3581 = vset.pattern.permute.xlu1 %v6824_v29  ;;  %2140 = vperm.xlu0 %3605, %v4810_v62  }
 0x4f2   : > { %2084 = vperm.xlu1 %3581, %v6821_v17  }
 0x4f5   : > { %2144 = vperm.xlu0 %3605, %v4816_v33  }
 0x4f6   : > { %3582 = vset.pattern.permute.xlu1 %v6825_v30 }
 0x4f7   : > { %2136 = vperm.xlu1 %3582, %v4823_v14  }
 0x4f9   : > { %3017 = vperm.xlu0 %3605, %v4876_v7  }
 0x4fb   : > { %3583 = vset.pattern.permute.xlu1 %v6826_v28 }
 0x4fc   : > { %2200 = vperm.xlu1 %3583, %v4823_v14  }
 0x4fd   : > { %3021 = vperm.xlu0 %3605, %v4855_v38  }
 0x500   : > { %2204 = vperm.xlu1 %3583, %v4810_v62  }
 0x501   : > { %3608 = vset.pattern.permute.xlu0 %v6826_v28 }
 0x502   : > { %2212 = vperm.xlu0 %3608, %v6821_v17  }
 0x504   : > { %3584 = vset.pattern.permute.xlu1 %v6825_v30 }
 0x505   : > { %2148 = vperm.xlu1 %3584, %v6821_v17  }
 0x506   : > { %3081 = vperm.xlu0 %3608, %v4876_v7  }
 0x509   : > { %3585 = vset.pattern.permute.xlu1 %v6827_v26 }
 0x50a   : > { %2268 = vperm.xlu1 %3585, %v4810_v62   ;;  %3085 = vperm.xlu0 %3608, %v4855_v38  }
 0x50e   : > { %3586 = vset.pattern.permute.xlu1 %v6826_v28  ;;  %3611 = vset.pattern.permute.xlu0 %v6827_v26 }
 0x50f   : > { %2208 = vperm.xlu1 %3586, %v4816_v33   ;;  %2264 = vperm.xlu0 %3611, %v4823_v14  }
 0x513   : > { %3587 = vset.pattern.permute.xlu1 %v6828_v34  ;;  %2272 = vperm.xlu0 %3611, %v4816_v33  }
 0x514   : > { %2328 = vperm.xlu1 %3587, %v4823_v14  }
 0x517   : > { %3145 = vperm.xlu0 %3611, %v4876_v7  }
 0x518   : > { %2332 = vperm.xlu1 %3587, %v4810_v62  }
 0x51c   : > { %3588 = vset.pattern.permute.xlu1 %v6827_v26 }
 0x51d   : > { %2276 = vperm.xlu1 %3588, %v6821_v17  }
 0x521   : > { %3589 = vset.pattern.permute.xlu1 %v6828_v34 }
 0x522   : > { %2336 = vperm.xlu1 %3589, %v4816_v33   ;;  %v1674_v33 = vld [vmem:[%s6595_s8] sm:$0xff] }
 0x526   : > { %3591 = vset.pattern.permute.xlu1 %v6819_v35 }
 0x527   : > { %2703 = vperm.xlu1 %3591, %v4876_v7  }
 0x52b   : > { %3592 = vset.pattern.permute.xlu1 %v6820_v58 }
 0x52c   : > { %2757 = vperm.xlu1 %3592, %v4846_v49  }
 0x530   : > { %3593 = vset.pattern.permute.xlu1 %v6822_v56 }
 0x531   : > { %2821 = vperm.xlu1 %3593, %v4846_v49  }
 0x535   : > { %2825 = vperm.xlu1 %3593, %v4876_v7  }
 0x539   : > { %3595 = vset.pattern.permute.xlu1 %v6819_v35 }
 0x53a   : > { %2713 = vperm.xlu1 %3595, %v4884_v21  }
 0x53e   : > { %3596 = vset.pattern.permute.xlu1 %v6820_v58 }
 0x53f   : > { %2765 = vperm.xlu1 %3596, %v4855_v38  }
 0x543   : > { %3598 = vset.pattern.permute.xlu1 %v6823_v48 }
 0x544   : > { %2885 = vperm.xlu1 %3598, %v4846_v49  }
 0x548   : > { %2889 = vperm.xlu1 %3598, %v4876_v7   ;;  %v1675_v7 = vld [vmem:[%s6595_s8 + $0x8] sm:$0xff] }
 0x54c   : > { %3600 = vset.pattern.permute.xlu1 %v6822_v56 }
 0x54d   : > { %2833 = vperm.xlu1 %3600, %v4884_v21  }
 0x551   : > { %3601 = vset.pattern.permute.xlu1 %v6824_v29 }
 0x552   : > { %2949 = vperm.xlu1 %3601, %v4846_v49  }
 0x556   : > { %3603 = vset.pattern.permute.xlu1 %v6823_v48  ;;  %v1676_v48 = vld [vmem:[%s6595_s8 + $0x10] sm:$0xff] }
 0x557   : > { %2897 = vperm.xlu1 %3603, %v4884_v21  }
 0x55b   : > { %3604 = vset.pattern.permute.xlu1 %v6825_v30 }
 0x55c   : > { %3013 = vperm.xlu1 %3604, %v4846_v49  }
 0x560   : > { %3606 = vset.pattern.permute.xlu1 %v6824_v29  ;;  %v5028_v29 = vpop.permute.xlu1 %1700 }
 0x561   : > { %2961 = vperm.xlu1 %3606, %v4884_v21  }
 0x565   : > { %3607 = vset.pattern.permute.xlu1 %v6826_v28 }
 0x566   : > { %3077 = vperm.xlu1 %3607, %v4846_v49  }
 0x56a   : > { %3609 = vset.pattern.permute.xlu1 %v6825_v30 }
 0x56b   : > { %3025 = vperm.xlu1 %3609, %v4884_v21  }
 0x56f   : > { %3610 = vset.pattern.permute.xlu1 %v6827_v26 }
 0x570   : > { %3141 = vperm.xlu1 %3610, %v4846_v49  }
 0x574   : > { %3612 = vset.pattern.permute.xlu1 %v6826_v28 }
 0x575   : > { %3089 = vperm.xlu1 %3612, %v4884_v21  }
 0x579   : > { %3613 = vset.pattern.permute.xlu1 %v6828_v34 }
 0x57a   : > { %3205 = vperm.xlu1 %3613, %v4846_v49  }
 0x57e   : > { %3615 = vset.pattern.permute.xlu1 %v6827_v26 }
 0x583   : > { %v1522_v23 = vpop.f32.mrb[4].mxu1 }
 0x584   : > { %v1524_v61 = vpop.f32.mrb[5].mxu1 }
 0x587   : > { %v1528_v32 = vpop.f32.mrb[6].mxu1 }
 0x588   : > { %v3466_v5 = vpack.c.bf16 %v1528_v32, %v1522_v23  ;;  %v1530_v44 = vpop.f32.mrb[7].mxu1 }
 0x589   : > { %v3464_v4 = vpack.c.bf16 %v1530_v44, %v1524_v61 }
 0x58b   : > { %3465 = vmatprep.subr.bf16.mxu0 %v3464_v4 }
 0x58c   : > { %3467 = vmatpush1.bf16.msra.mxu0 %v3466_v5 }
 0x58f   : > { %3429 = vmatmul.mubr.msk.f32.vlgmr.msra.gmra.mrb[8].mxu0 %vm522_vm0, %v1533_v41 }
 0x590   : > { %1611 = vmatprep.mubr.f32.mxu0 %v6818_v31 }
 0x593   : > { %3430 = vmatmul.mubr.msk.f32.gmra.mrb[10].mxu0 %vm522_vm0, %v1534_v2 }
 0x594   : > { %2671 = vmatprep.mubr.f32.mxu0 %v6818_v31 }
 0x662   : > { %v1607_v45 = vpop.f32.mrb[8].mxu0 }
 0x663   : > { %v1609_v51 = vpop.f32.mrb[9].mxu0  ;;  %v4916_v15 = vadd.f32 %v3669_v47, %v1607_v45 }
 0x664   : > { %v4920_v43 = vadd.f32 %v3670_v22, %v1609_v51 }
 0x665   : > { %6829 = vst [vmem:[#allocation15_spill] sm:$0xff] %v4916_v15  ;;  %v1638_v3 = vmul.f32 %v4916_v15, %v4916_v15 }
 0x666   : > { %6830 = vst [vmem:[#allocation16_spill] sm:$0xff] %v4920_v43  ;;  %v1613_v20 = vpop.f32.mrb[10].mxu0  ;;  %v1639_v25 = vmul.f32 %v4920_v43, %v4920_v43 }
 0x667   : > { %v4924_v36 = vadd.f32 %v3671_v63, %v1613_v20  ;;  %v1615_v24 = vpop.f32.mrb[11].mxu0 }
 0x668   : > { %v4928_v60 = vadd.f32 %v3672_v40, %v1615_v24 }
 0x669   : > { %6831 = vst [vmem:[#allocation8_spill] sm:$0xff] %v4924_v36  ;;  %v1622_v59 = vadd.f32 %v4924_v36, %v4916_v15  ;;  %v1640_v13 = vmul.f32 %v4924_v36, %v4924_v36 }
 0x66a   : > { %6832 = vst [vmem:[#allocation9_spill] sm:$0xff] %v4928_v60  ;;  %v1629_v8 = vadd.f32 %v4928_v60, %v4920_v43  ;;  %v1641_v18 = vmul.f32 %v4928_v60, %v4928_v60 }
 0x66b   : > { %v1623_v23 = vrot.slane %v1622_v59, 4  ;;  %v1642_v61 = vadd.f32 %v1640_v13, %v1638_v3 }
 0x66c   : > { %v1630_v32 = vrot.slane %v1629_v8, 4  ;;  %v1649_v5 = vadd.f32 %v1641_v18, %v1639_v25 }
 0x66d   : > { %v1624_v44 = vadd.f32 %v1623_v23, %v1622_v59  ;;  %v1643_v4 = vrot.slane %v1642_v61, 4 }
 0x66e   : > { %v1631_v41 = vadd.f32 %v1630_v32, %v1629_v8  ;;  %v1650_v2 = vrot.slane %v1649_v5, 4 }
 0x66f   : > { %v1625_v39 = vrot.slane %v1624_v44, 2  ;;  %v1644_v37 = vadd.f32 %v1643_v4, %v1642_v61 }
 0x670   : > { %v1632_v62 = vrot.slane %v1631_v41, 2  ;;  %v1651_v16 = vadd.f32 %v1650_v2, %v1649_v5 }
 0x671   : > { %v1626_v52 = vadd.f32 %v1625_v39, %v1624_v44  ;;  %v1645_v57 = vrot.slane %v1644_v37, 2 }
 0x672   : > { %v1633_v55 = vadd.f32 %v1632_v62, %v1631_v41  ;;  %v1652_v27 = vrot.slane %v1651_v16, 2 }
 0x673   : > { %v1627_v45 = vrot.slane %v1626_v52, 1  ;;  %v1646_v51 = vadd.f32 %v1645_v57, %v1644_v37  ;;  %v1679_v57 = vld [vmem:[%s6595_s8 + $0x28] sm:$0xff] }
 0x674   : > { %v1634_v47 = vrot.slane %v1633_v55, 1  ;;  %v1653_v22 = vadd.f32 %v1652_v27, %v1651_v16  ;;  %v1677_v27 = vld [vmem:[%s6595_s8 + $0x18] sm:$0xff] }
 0x675   : > { %v1628_v20 = vadd.f32 %v1627_v45, %v1626_v52  ;;  %v1647_v63 = vrot.slane %v1646_v51, 1  ;;  %v1678_v52 = vld [vmem:[%s6595_s8 + $0x20] sm:$0xff]  ;;  %v1681_v45 = vld [vmem:[%s6595_s8 + $0x38] sm:$0xff] }
 0x676   : > { %v1654_v24 = vrot.slane %v1653_v22, 1  ;;  %v1635_v40 = vadd.f32 %v1634_v47, %v1633_v55  ;;  %v1680_v55 = vld [vmem:[%s6595_s8 + $0x30] sm:$0xff] }
 0x677   : > { %v1636_v3 = vmul.f32 0.0625, %v1628_v20  ;;  %v1648_v59 = vadd.f32 %v1647_v63, %v1646_v51  ;;  %v5030_v51 = vpop.permute.xlu1 %1710 }
 0x678   : > { %v1655_v13 = vadd.f32 %v1654_v24, %v1653_v22  ;;  %v1637_v25 = vmul.f32 0.0625, %v1635_v40 }
 0x679   : > { %v1656_v8 = vmul.f32 0.0625, %v1648_v59  ;;  %v1658_v18 = vmul.f32 %v1636_v3, %v1636_v3  ;;  %v1664_v58 = vsub.f32 %v4924_v36, %v1636_v3  ;;  %v1662_v17 = vsub.f32 %v4916_v15, %v1636_v3 }
 0x67a   : > { %v1657_v23 = vmul.f32 0.0625, %v1655_v13  ;;  %v1659_v61 = vmul.f32 %v1637_v25, %v1637_v25  ;;  %v1663_v38 = vsub.f32 %v4920_v43, %v1637_v25  ;;  %v1665_v41 = vsub.f32 %v4928_v60, %v1637_v25 }
 0x67b   : > { %v1660_v32 = vsub.f32 %v1656_v8, %v1658_v18  ;;  %v5032_v30 = vpop.permute.xlu1 %1715  ;;  %v5062_v8 = vpop.permute.xlu0 %2340 }
 0x67c   : > { %v1661_v35 = vsub.f32 %v1657_v23, %v1659_v61  ;;  %6842 = vst [vmem:[#allocation25_spill] sm:$0xff] %v5062_v8 }
 0x67d   : > { %v1666_v5 = vadd.f32 1e-05, %v1660_v32 }
 0x67e   : > { %v1667_v44 = vadd.f32 1e-05, %v1661_v35 }
 0x67f   : > { %3633 = vrsqrt.f32 %v1666_v5  ;;  %v5034_v47 = vpop.permute.xlu1 %1826  ;;  %v5066_v23 = vpop.permute.xlu0 %1821 }
 0x680   : > { %3635 = vrsqrt.f32 %v1667_v44  ;;  %6833 = vst [vmem:[#allocation17_spill] sm:$0xff] %v5034_v47 }
 0x683   : > { %v5036_v22 = vpop.permute.xlu1 %1831  ;;  %v5070_v32 = vpop.permute.xlu0 %1836 }
 0x684   : > { %6834 = vst [vmem:[#allocation18_spill] sm:$0xff] %v5036_v22  ;;  %6844 = vst [vmem:[#allocation27_spill] sm:$0xff] %v5070_v32 }
 0x687   : > { %v5038_v20 = vpop.permute.xlu1 %1880  ;;  %v5074_v5 = vpop.permute.xlu0 %2698 }
 0x689   : > { %v3634_v4 = vpop.eup %3633 }
 0x68a   : > { %v3636_v2 = vpop.eup %3635  ;;  %v1670_v39 = vmul.f32 %v3634_v4, %v1662_v17  ;;  %v1672_v37 = vmul.f32 %v3634_v4, %v1664_v58 }
 0x68b   : > { %v1671_v62 = vmul.f32 %v3636_v2, %v1663_v38  ;;  %v1673_v14 = vmul.f32 %v3636_v2, %v1665_v41  ;;  %v5040_v28 = vpop.permute.xlu1 %1888  ;;  %v5078_v58 = vpop.permute.xlu0 %2708 }
 0x68c   : > { %v3470_v56 = vpack.c.bf16 %v1672_v37, %v1670_v39  ;;  %6835 = vst [vmem:[#allocation19_spill] sm:$0xff] %v5040_v28  ;;  %6846 = vst [vmem:[#allocation29_spill] sm:$0xff] %v5078_v58 }
 0x68d   : > { %v3468_v16 = vpack.c.bf16 %v1673_v14, %v1671_v62 }
 0x68f   : > { %3469 = vmatprep.subr.bf16.mxu1 %v3468_v16  ;;  %3473 = vmatprep.subr.bf16.mxu0 %v3468_v16  ;;  %v5042_v21 = vpop.permute.xlu1 %1892  ;;  %v5082_v4 = vpop.permute.xlu0 %1705 }
 0x690   : > { %3471 = vmatpush1.bf16.msra.mxu1 %v3470_v56  ;;  %3475 = vmatpush1.bf16.msra.mxu0 %v3470_v56  ;;  %6836 = vst [vmem:[#allocation7_spill] sm:$0xff] %v5042_v21 }
 0x693   : > { %3431 = vmatmul.mubr.msk.f32.vlgmr.msra.gmra.mrb[8].mxu1 %vm522_vm0, %v1674_v33  ;;  %3435 = vmatmul.mubr.msk.f32.vlgmr.msra.gmra.mrb[12].mxu0 %vm522_vm0, %v1678_v52  ;;  %v5044_v63 = vpop.permute.xlu1 %1948  ;;  %v5086_v41 = vpop.permute.xlu0 %1884 }
 0x694   : > { %1800 = vmatprep.mubr.f32.mxu1 %v6818_v31  ;;  %2677 = vmatprep.mubr.f32.mxu0 %v6818_v31  ;;  %6837 = vst [vmem:[#allocation20_spill] sm:$0xff] %v5044_v63  ;;  %6849 = vst [vmem:[#allocation32_spill] sm:$0xff] %v5086_v41 }
 0x697   : > { %3432 = vmatmul.mubr.msk.f32.gmra.mrb[10].mxu1 %vm522_vm0, %v1675_v7  ;;  %3436 = vmatmul.mubr.msk.f32.gmra.mrb[14].mxu0 %vm522_vm0, %v1679_v57  ;;  %v5046_v49 = vpop.permute.xlu1 %1952  ;;  %v5090_v39 = vpop.permute.xlu0 %2582 }
 0x698   : > { %1806 = vmatprep.mubr.f32.mxu1 %v6818_v31  ;;  %2683 = vmatprep.mubr.f32.mxu0 %v6818_v31  ;;  %6838 = vst [vmem:[#allocation21_spill] sm:$0xff] %v5046_v49 }
 0x69b   : > { %3433 = vmatmul.mubr.msk.f32.gmra.mrb[12].mxu1 %vm522_vm0, %v1676_v48  ;;  %3437 = vmatmul.mubr.msk.f32.gmra.mrb[16].mxu0 %vm522_vm0, %v1680_v55  ;;  %v5048_v26 = vpop.permute.xlu1 %2008  ;;  %v5094_v62 = vpop.permute.xlu0 %2761 }
 0x69c   : > { %1812 = vmatprep.mubr.f32.mxu1 %v6818_v31  ;;  %2689 = vmatprep.mubr.f32.mxu0 %v6818_v31  ;;  %6852 = vst [vmem:[#allocation35_spill] sm:$0xff] %v5094_v62 }
 0x69f   : > { %3434 = vmatmul.mubr.msk.f32.gmra.mrb[14].mxu1 %vm522_vm0, %v1677_v27  ;;  %3438 = vmatmul.mubr.msk.f32.gmra.mrb[18].mxu0 %vm522_vm0, %v1681_v45  ;;  %v5050_v24 = vpop.permute.xlu1 %2016  ;;  %v5098_v16 = vpop.permute.xlu0 %2769 }
 0x6a0   : > { %3317 = vmatprep.mubr.f32.mxu1 %v6818_v31  ;;  %6839 = vst [vmem:[#allocation22_spill] sm:$0xff] %v5050_v24  ;;  %6854 = vst [vmem:[#allocation37_spill] sm:$0xff] %v5098_v16 }
 0x6a3   : > { %v5052_v40 = vpop.permute.xlu1 %2020  ;;  %v5102_v33 = vpop.permute.xlu0 %1944 }
 0x6a4   : > { %6840 = vst [vmem:[#allocation23_spill] sm:$0xff] %v5052_v40 }
 0x6a7   : > { %v5054_v3 = vpop.permute.xlu1 %2076 }
 0x6a8   : > { %6841 = vst [vmem:[#allocation24_spill] sm:$0xff] %v5054_v3 }
 0x6ab   : > { %v5056_v59 = vpop.permute.xlu1 %2577 }
 0x6af   : > { %v5058_v13 = vpop.permute.xlu1 %2587 }
 0x6b3   : > { %v5060_v25 = vpop.permute.xlu1 %2592 }
 0x6b7   : > { %v5064_v18 = vpop.permute.xlu1 %2084 }
 0x6b8   : > { %6843 = vst [vmem:[#allocation26_spill] sm:$0xff] %v5064_v18 }
 0x6bb   : > { %v5068_v61 = vpop.permute.xlu1 %2136 }
 0x6bf   : > { %v5072_v35 = vpop.permute.xlu1 %2200 }
 0x6c3   : > { %v5076_v44 = vpop.permute.xlu1 %2204 }
 0x6c4   : > { %6845 = vst [vmem:[#allocation28_spill] sm:$0xff] %v5076_v44 }
 0x6c7   : > { %v5080_v17 = vpop.permute.xlu1 %2148 }
 0x6c8   : > { %6847 = vst [vmem:[#allocation30_spill] sm:$0xff] %v5080_v17 }
 0x6cb   : > { %v5084_v38 = vpop.permute.xlu1 %2268 }
 0x6cc   : > { %6848 = vst [vmem:[#allocation31_spill] sm:$0xff] %v5084_v38 }
 0x6cf   : > { %v5088_v2 = vpop.permute.xlu1 %2208 }
 0x6d0   : > { %6850 = vst [vmem:[#allocation33_spill] sm:$0xff] %v5088_v2 }
 0x6d3   : > { %v5092_v37 = vpop.permute.xlu1 %2328 }
 0x6d4   : > { %6851 = vst [vmem:[#allocation34_spill] sm:$0xff] %v5092_v37 }
 0x6d7   : > { %v5096_v14 = vpop.permute.xlu1 %2332 }
 0x6d8   : > { %6853 = vst [vmem:[#allocation36_spill] sm:$0xff] %v5096_v14 }
 0x6db   : > { %v5100_v56 = vpop.permute.xlu1 %2276 }
 0x6dc   : > { %6855 = vst [vmem:[#allocation38_spill] sm:$0xff] %v5100_v56 }
 0x6df   : > { %v5107_v27 = vpop.permute.xlu1 %2336 }
 0x6e0   : > { %6856 = vst [vmem:[#allocation39_spill] sm:$0xff] %v5107_v27 }
 0x6e3   : > { %v5131_v56 = vpop.permute.xlu1 %2703 }
 0x6e4   : > { %6858 = vst [vmem:[#allocation41_spill] sm:$0xff] %v5131_v56 }
 0x6e7   : > { %v5154_v27 = vpop.permute.xlu1 %2757 }
 0x6eb   : > { %v5165_v28 = vpop.permute.xlu1 %2821 }
 0x766   : > { %v1796_v52 = vpop.f32.mrb[8].mxu1  ;;  %v2673_v7 = vpop.f32.mrb[12].mxu0 }
 0x767   : > { %v5105_v57 = vadd.f32 %v1796_v52, %v5028_v29  ;;  %v1798_v48 = vpop.f32.mrb[9].mxu1  ;;  %v2675_v55 = vpop.f32.mrb[13].mxu0  ;;  %v5152_v32 = vadd.f32 %v2673_v7, %v5056_v59 }
 0x768   : > { %v5121_v52 = vpop.permute.xlu0 %1956  ;;  %v5161_v2 = vadd.f32 %v1798_v48, %v5028_v29  ;;  %v5177_v29 = vpop.permute.xlu1 %2825 }
 0x769   : > { %1911 = vrot.lane.b32.xlu0 %v5105_v57, %s6769_s16  ;;  %1847 = vrot.lane.b32.xlu1 %v5105_v57, %s6792_s30  ;;  %6857 = vst [vmem:[#allocation40_spill] sm:$0xff] %v5121_v52  ;;  %6863 = vst [vmem:[#allocation46_spill] sm:$0xff] %v5177_v29 }
 0x76a   : > { %v1802_v45 = vpop.f32.mrb[10].mxu1  ;;  %v2679_v60 = vpop.f32.mrb[14].mxu0 }
 0x76b   : > { %v5113_v36 = vpop.f32.mrb[11].mxu1  ;;  %v5115_v43 = vpop.f32.mrb[15].mxu0 }
 0x76c   : > { %v5149_v21 = vpop.permute.xlu0 %2829 }
 0x76d   : > { %2039 = vrot.lane.b32.xlu0 %v5105_v57, %s6794_s15  ;;  %1975 = vrot.lane.b32.xlu1 %v5105_v57, %s6793_s24  ;;  %6860 = vst [vmem:[#allocation43_spill] sm:$0xff] %v5149_v21  ;;  %v5185_v21 = vpop.permute.xlu1 %2713 }
 0x76e   : > { %v5123_v15 = vpop.f32.mrb[12].mxu1  ;;  %v5125_v31 = vpop.f32.mrb[16].mxu0  ;;  %6864 = vst [vmem:[#allocation47_spill] sm:$0xff] %v5185_v21  ;;  %v5203_v21 = vadd.f32 %v1802_v45, %v5082_v4 }
 0x76f   : > { %v5127_v16 = vpop.f32.mrb[13].mxu1  ;;  %v5129_v8 = vpop.f32.mrb[17].mxu0  ;;  %v5362_v62 = vadd.f32 %v5125_v31, %v5058_v13 }
 0x770   : > { %v5163_v24 = vpop.permute.xlu0 %2012  ;;  %6867 = vst [vmem:[#allocation50_spill] sm:$0xff] %v5203_v21  ;;  %v5366_v14 = vadd.f32 %v5127_v16, %v5030_v51  ;;  %v5409_v47 = vadd.f32 %v5129_v8, %v5058_v13 }
 0x771   : > { %2103 = vrot.lane.b32.xlu0 %v5105_v57, %s6797_s1  ;;  %2167 = vrot.lane.b32.xlu1 %v5105_v57, %s6799_s23  ;;  %6861 = vst [vmem:[#allocation44_spill] sm:$0xff] %v5163_v24  ;;  %v5198_v49 = vpop.permute.xlu1 %2765  ;;  %6892 = vst [vmem:[#allocation75_spill] sm:$0xff] %v5362_v62 }
 0x772   : > { %v5137_v17 = vpop.f32.mrb[14].mxu1  ;;  %v5139_v18 = vpop.f32.mrb[18].mxu0  ;;  %6865 = vst [vmem:[#allocation48_spill] sm:$0xff] %v5198_v49 }
 0x773   : > { %v5141_v40 = vpop.f32.mrb[15].mxu1  ;;  %v5143_v52 = vpop.f32.mrb[19].mxu0 }
 0x774   : > { %6859 = vst [vmem:[#allocation42_spill] sm:$0xff] %v5143_v52  ;;  %v5175_v7 = vpop.permute.xlu0 %2893 }
 0x775   : > { %2231 = vrot.lane.b32.xlu0 %v5105_v57, %s6803_s21  ;;  %2295 = vrot.lane.b32.xlu1 %v5105_v57, %s6804_s22  ;;  %6862 = vst [vmem:[#allocation45_spill] sm:$0xff] %v5175_v7  ;;  %v5192_v7 = vadd.f32 %v2675_v55, %v5056_v59  ;;  %v5209_v59 = vpop.permute.xlu1 %2885 }
 0x778   : > { %v5183_v48 = vpop.permute.xlu0 %2072 }
 0x779   : > { %2788 = vrot.lane.b32.xlu0 %v5152_v32, %s6769_s16  ;;  %2724 = vrot.lane.b32.xlu1 %v5152_v32, %s6792_s30  ;;  %v5221_v45 = vpop.permute.xlu1 %2889 }
 0x77a   : > { %6869 = vst [vmem:[#allocation52_spill] sm:$0xff] %v5221_v45 }
 0x77c   : > { %v5200_v22 = vpop.permute.xlu0 %2080 }
 0x77d   : > { %2852 = vrot.lane.b32.xlu0 %v5152_v32, %s6793_s24  ;;  %1855 = vrot.lane.b32.xlu1 %v5161_v2, %s6792_s30  ;;  %6866 = vst [vmem:[#allocation49_spill] sm:$0xff] %v5200_v22  ;;  %v5230_v22 = vadd.f32 %v2679_v60, %v5090_v39  ;;  %v5234_v37 = vpop.permute.xlu1 %2833 }
 0x77e   : > { %6873 = vst [vmem:[#allocation56_spill] sm:$0xff] %v5234_v37 }
 0x77f   : > { %6871 = vst [vmem:[#allocation54_spill] sm:$0xff] %v5230_v22 }
 0x780   : > { %v5211_v55 = vpop.permute.xlu0 %2953 }
 0x781   : > { %2916 = vrot.lane.b32.xlu0 %v5152_v32, %s6794_s15  ;;  %1983 = vrot.lane.b32.xlu1 %v5161_v2, %s6793_s24  ;;  %6868 = vst [vmem:[#allocation51_spill] sm:$0xff] %v5211_v55  ;;  %v5246_v60 = vpop.permute.xlu1 %2949 }
 0x784   : > { %v5223_v49 = vpop.permute.xlu0 %2957 }
 0x785   : > { %2980 = vrot.lane.b32.xlu0 %v5152_v32, %s6797_s1  ;;  %2175 = vrot.lane.b32.xlu1 %v5161_v2, %s6799_s23  ;;  %6870 = vst [vmem:[#allocation53_spill] sm:$0xff] %v5223_v49  ;;  %v5254_v55 = vpop.permute.xlu1 %2897 }
 0x786   : > { %6876 = vst [vmem:[#allocation59_spill] sm:$0xff] %v5254_v55 }
 0x788   : > { %v5232_v58 = vpop.permute.xlu0 %2140 }
 0x789   : > { %3044 = vrot.lane.b32.xlu0 %v5152_v32, %s6799_s23  ;;  %2303 = vrot.lane.b32.xlu1 %v5161_v2, %s6804_s22  ;;  %6872 = vst [vmem:[#allocation55_spill] sm:$0xff] %v5232_v58  ;;  %v5266_v52 = vpop.permute.xlu1 %3013 }
 0x78c   : > { %v5244_v49 = vpop.permute.xlu0 %2144 }
 0x78d   : > { %1919 = vrot.lane.b32.xlu0 %v5161_v2, %s6769_s16  ;;  %2732 = vrot.lane.b32.xlu1 %v5192_v7, %s6792_s30  ;;  %6874 = vst [vmem:[#allocation57_spill] sm:$0xff] %v5244_v49  ;;  %v5278_v45 = vpop.permute.xlu1 %2961 }
 0x78e   : > { %6880 = vst [vmem:[#allocation63_spill] sm:$0xff] %v5278_v45  ;;  %v5298_v45 = vadd.f32 %v5115_v43, %v5090_v39 }
 0x790   : > { %v5252_v37 = vpop.permute.xlu0 %3017  ;;  %6883 = vst [vmem:[#allocation66_spill] sm:$0xff] %v5298_v45 }
 0x791   : > { %2047 = vrot.lane.b32.xlu0 %v5161_v2, %s6794_s15  ;;  %1913 = vrot.lane.b32.xlu1 %v5203_v21, %s6769_s16  ;;  %6875 = vst [vmem:[#allocation58_spill] sm:$0xff] %v5252_v37  ;;  %v5270_v37 = vadd.f32 %v5113_v36, %v5082_v4  ;;  %v5290_v4 = vpop.permute.xlu1 %3077 }
 0x792   : > { %6882 = vst [vmem:[#allocation65_spill] sm:$0xff] %v5290_v4 }
 0x793   : > { %6878 = vst [vmem:[#allocation61_spill] sm:$0xff] %v5270_v37 }
 0x794   : > { %v5264_v49 = vpop.permute.xlu0 %3021 }
 0x795   : > { %2111 = vrot.lane.b32.xlu0 %v5161_v2, %s6797_s1  ;;  %2041 = vrot.lane.b32.xlu1 %v5203_v21, %s6794_s15  ;;  %6877 = vst [vmem:[#allocation60_spill] sm:$0xff] %v5264_v49  ;;  %v5302_v49 = vpop.permute.xlu1 %3025 }
 0x796   : > { %6885 = vst [vmem:[#allocation68_spill] sm:$0xff] %v5302_v49 }
 0x798   : > { %v5276_v55 = vpop.permute.xlu0 %2212 }
 0x799   : > { %2239 = vrot.lane.b32.xlu0 %v5161_v2, %s6803_s21  ;;  %2105 = vrot.lane.b32.xlu1 %v5203_v21, %s6797_s1  ;;  %6879 = vst [vmem:[#allocation62_spill] sm:$0xff] %v5276_v55  ;;  %v5314_v43 = vpop.permute.xlu1 %3141 }
 0x79a   : > { %6886 = vst [vmem:[#allocation69_spill] sm:$0xff] %v5314_v43 }
 0x79c   : > { %v5288_v36 = vpop.permute.xlu0 %3081 }
 0x79d   : > { %2796 = vrot.lane.b32.xlu0 %v5192_v7, %s6769_s16  ;;  %2233 = vrot.lane.b32.xlu1 %v5203_v21, %s6803_s21  ;;  %6881 = vst [vmem:[#allocation64_spill] sm:$0xff] %v5288_v36  ;;  %v5322_v49 = vpop.permute.xlu1 %3089 }
 0x79e   : > { %6888 = vst [vmem:[#allocation71_spill] sm:$0xff] %v5322_v49 }
 0x7a0   : > { %v5300_v55 = vpop.permute.xlu0 %3085 }
 0x7a1   : > { %2860 = vrot.lane.b32.xlu0 %v5192_v7, %s6793_s24  ;;  %2790 = vrot.lane.b32.xlu1 %v5230_v22, %s6769_s16  ;;  %6884 = vst [vmem:[#allocation67_spill] sm:$0xff] %v5300_v55  ;;  %v5334_v43 = vpop.permute.xlu1 %3205 }
 0x7a2   : > { %6890 = vst [vmem:[#allocation73_spill] sm:$0xff] %v5334_v43 }
 0x7a4   : > { %v5312_v36 = vpop.permute.xlu0 %2264 }
 0x7a5   : > { %2924 = vrot.lane.b32.xlu0 %v5192_v7, %s6794_s15  ;;  %2854 = vrot.lane.b32.xlu1 %v5230_v22, %s6793_s24 }
 0x7a8   : > { %v5320_v39 = vpop.permute.xlu0 %2272 }
 0x7a9   : > { %2988 = vrot.lane.b32.xlu0 %v5192_v7, %s6797_s1  ;;  %2918 = vrot.lane.b32.xlu1 %v5230_v22, %s6794_s15  ;;  %6887 = vst [vmem:[#allocation70_spill] sm:$0xff] %v5320_v39  ;;  %v5338_v39 = vadd.f32 %v5123_v15, %v5030_v51 }
 0x7ab   : > { %6891 = vst [vmem:[#allocation74_spill] sm:$0xff] %v5338_v39 }
 0x7ac   : > { %v5332_v55 = vpop.permute.xlu0 %3145 }
 0x7ad   : > { %3052 = vrot.lane.b32.xlu0 %v5192_v7, %s6799_s23  ;;  %2982 = vrot.lane.b32.xlu1 %v5230_v22, %s6797_s1  ;;  %6889 = vst [vmem:[#allocation72_spill] sm:$0xff] %v5332_v55 }
 0x7b1   : > { %1849 = vrot.lane.b32.xlu0 %v5203_v21, %s6792_s30  ;;  %3046 = vrot.lane.b32.xlu1 %v5230_v22, %s6799_s23 }
 0x7b5   : > { %1977 = vrot.lane.b32.xlu0 %v5203_v21, %s6793_s24  ;;  %1921 = vrot.lane.b32.xlu1 %v5270_v37, %s6769_s16 }
 0x7b9   : > { %2169 = vrot.lane.b32.xlu0 %v5203_v21, %s6799_s23  ;;  %2049 = vrot.lane.b32.xlu1 %v5270_v37, %s6794_s15 }
 0x7bd   : > { %2297 = vrot.lane.b32.xlu0 %v5203_v21, %s6804_s22  ;;  %2113 = vrot.lane.b32.xlu1 %v5270_v37, %s6797_s1  ;;  %v6895_v21 = vld [vmem:[#allocation11_spill] sm:$0xff] }
 0x7c1   : > { %2726 = vrot.lane.b32.xlu0 %v5230_v22, %s6792_s30  ;;  %2241 = vrot.lane.b32.xlu1 %v5270_v37, %s6803_s21 }
 0x7c5   : > { %1857 = vrot.lane.b32.xlu0 %v5270_v37, %s6792_s30  ;;  %2798 = vrot.lane.b32.xlu1 %v5298_v45, %s6769_s16 }
 0x7c9   : > { %1985 = vrot.lane.b32.xlu0 %v5270_v37, %s6793_s24  ;;  %2862 = vrot.lane.b32.xlu1 %v5298_v45, %s6793_s24 }
 0x7cd   : > { %2177 = vrot.lane.b32.xlu0 %v5270_v37, %s6799_s23  ;;  %2926 = vrot.lane.b32.xlu1 %v5298_v45, %s6794_s15 }
 0x7d1   : > { %2305 = vrot.lane.b32.xlu0 %v5270_v37, %s6804_s22  ;;  %2990 = vrot.lane.b32.xlu1 %v5298_v45, %s6797_s1  ;;  %v6894_v37 = vld [vmem:[#allocation10_spill] sm:$0xff] }
 0x7d5   : > { %2734 = vrot.lane.b32.xlu0 %v5298_v45, %s6792_s30  ;;  %3054 = vrot.lane.b32.xlu1 %v5298_v45, %s6799_s23 }
 0x7d9   : > { %1915 = vrot.lane.b32.xlu0 %v5338_v39, %s6769_s16  ;;  %1851 = vrot.lane.b32.xlu1 %v5338_v39, %s6792_s30 }
 0x7db   : > { %v1912_v49 = vpop.permute.xlu0 %1911  ;;  %v1848_v29 = vpop.permute.xlu1 %1847 }
 0x7dd   : > { %2043 = vrot.lane.b32.xlu0 %v5338_v39, %s6794_s15  ;;  %1979 = vrot.lane.b32.xlu1 %v5338_v39, %s6793_s24 }
 0x7df   : > { %v5348_v55 = vpop.permute.xlu0 %2039  ;;  %v1976_v43 = vpop.permute.xlu1 %1975 }
 0x7e1   : > { %2107 = vrot.lane.b32.xlu0 %v5338_v39, %s6797_s1  ;;  %2171 = vrot.lane.b32.xlu1 %v5338_v39, %s6799_s23 }
 0x7e3   : > { %v5354_v15 = vpop.permute.xlu0 %2103  ;;  %v2168_v56 = vpop.permute.xlu1 %2167 }
 0x7e5   : > { %2299 = vrot.lane.b32.xlu0 %v5338_v39, %s6804_s22  ;;  %2235 = vrot.lane.b32.xlu1 %v5338_v39, %s6803_s21 }
 0x7e7   : > { %v5368_v38 = vpop.permute.xlu0 %2231  ;;  %v5370_v44 = vpop.permute.xlu1 %2295 }
 0x7e8   : > { %6893 = vst [vmem:[#allocation76_spill] sm:$0xff] %v5370_v44 }
 0x7e9   : > { %1923 = vrot.lane.b32.xlu0 %v5366_v14, %s6769_s16  ;;  %2728 = vrot.lane.b32.xlu1 %v5362_v62, %s6792_s30 }
 0x7eb   : > { %v5376_v45 = vpop.permute.xlu0 %2788  ;;  %v5378_v39 = vpop.permute.xlu1 %2724 }
 0x7ed   : > { %2051 = vrot.lane.b32.xlu0 %v5366_v14, %s6794_s15  ;;  %2792 = vrot.lane.b32.xlu1 %v5362_v62, %s6769_s16 }
 0x7ef   : > { %v5384_v31 = vpop.permute.xlu0 %2852  ;;  %v1856_v51 = vpop.permute.xlu1 %1855 }
 0x7f0   : > { %v1867_v58 = vsel %vm630_vm1, %v1856_v51, %v1848_v29  ;;  %v1863_v41 = vsel %vm630_vm1, %v1848_v29, %v1856_v51 }
 0x7f1   : > { %2115 = vrot.lane.b32.xlu0 %v5366_v14, %s6797_s1  ;;  %2856 = vrot.lane.b32.xlu1 %v5362_v62, %s6793_s24  ;;  %v1871_v63 = vmul.f32 %v1867_v58, %v6894_v37  ;;  %v1872_v22 = vmul.f32 %v1863_v41, %v6895_v21 }
 0x7f3   : > { %v5390_v16 = vpop.permute.xlu0 %2916  ;;  %v1984_v44 = vpop.permute.xlu1 %1983  ;;  %v1895_v29 = vmul.f32 %v5038_v20, %v1871_v63  ;;  %v1896_v13 = vmul.f32 %v5038_v20, %v1872_v22 }
 0x7f4   : > { %v1991_v58 = vsel %vm712_vm3, %v1976_v43, %v1984_v44  ;;  %v1995_v51 = vsel %vm712_vm3, %v1984_v44, %v1976_v43 }
 0x7f5   : > { %2243 = vrot.lane.b32.xlu0 %v5366_v14, %s6803_s21  ;;  %2920 = vrot.lane.b32.xlu1 %v5362_v62, %s6794_s15  ;;  %v1999_v44 = vmul.f32 %v1995_v51, %v4168_v0  ;;  %v2000_v43 = vmul.f32 %v1991_v58, %v4171_v19 }
 0x7f7   : > { %v5398_v24 = vpop.permute.xlu0 %2980  ;;  %v2176_v3 = vpop.permute.xlu1 %2175 }
 0x7f9   : > { %2307 = vrot.lane.b32.xlu0 %v5366_v14, %s6804_s22  ;;  %2984 = vrot.lane.b32.xlu1 %v5362_v62, %s6797_s1  ;;  %v1840_v62 = vmul.f32 %v5066_v23, %v5161_v2  ;;  %v2183_v2 = vsel %vm835_vm6, %v2168_v56, %v2176_v3 }
 0x7fb   : > { %v5412_v34 = vpop.permute.xlu0 %3044  ;;  %v5414_v4 = vpop.permute.xlu1 %2303 }
 0x7fc   : > { %6896 = vst [vmem:[#allocation10_spill] sm:$0xff] %v5412_v34  ;;  %6897 = vst [vmem:[#allocation77_spill] sm:$0xff] %v5414_v4  ;;  %v1839_v4 = vmul.f32 %v5066_v23, %v5105_v57  ;;  %v1904_v23 = vadd.f32 %v1896_v13, %v1840_v62  ;;  %v2024_v13 = vmul.f32 %v5048_v26, %v2000_v43 }
 0x7fd   : > { %2736 = vrot.lane.b32.xlu0 %v5409_v47, %s6792_s30  ;;  %1859 = vrot.lane.b32.xlu1 %v5366_v14, %s6792_s30 }
 0x7fe   : > { %v1903_v57 = vadd.f32 %v1895_v29, %v1839_v4  ;;  %v2023_v29 = vmul.f32 %v5048_v26, %v1999_v44 }
 0x7ff   : > { %v1920_v8 = vpop.permute.xlu0 %1919  ;;  %v2733_v41 = vpop.permute.xlu1 %2732 }
 0x800   : > { %v1927_v63 = vsel %vm671_vm2, %v1912_v49, %v1920_v8  ;;  %v1931_v34 = vsel %vm671_vm2, %v1920_v8, %v1912_v49 }
 0x801   : > { %v1935_v22 = vmul.f32 %v1931_v34, %v4154_v53  ;;  %v1936_v20 = vmul.f32 %v1927_v63, %v4157_v11  ;;  %2800 = vrot.lane.b32.xlu0 %v5409_v47, %s6769_s16  ;;  %1987 = vrot.lane.b32.xlu1 %v5366_v14, %s6793_s24  ;;  %v2187_v34 = vsel %vm835_vm6, %v2176_v3, %v2168_v56 }
 0x802   : > { %v2192_v26 = vmul.f32 %v2187_v34, %v4200_v46 }
 0x803   : > { %v1959_v49 = vmul.f32 %v5102_v33, %v1935_v22  ;;  %v1960_v51 = vmul.f32 %v5102_v33, %v1936_v20  ;;  %v2048_v58 = vpop.permute.xlu0 %2047  ;;  %v5446_v8 = vpop.permute.xlu1 %1913  ;;  %v2191_v22 = vmul.f32 %v2183_v2, %v4195_v6 }
 0x804   : > { %v2055_v4 = vsel %vm753_vm4, %v5348_v55, %v2048_v58  ;;  %v2059_v62 = vsel %vm753_vm4, %v2048_v58, %v5348_v55  ;;  %v5467_v55 = vadd.f32 %v5137_v17, %v5032_v30 }
 0x805   : > { %v1967_v63 = vadd.f32 %v1959_v49, %v1903_v57  ;;  %v1968_v33 = vadd.f32 %v1960_v51, %v1904_v23  ;;  %2864 = vrot.lane.b32.xlu0 %v5409_v47, %s6793_s24  ;;  %v2063_v3 = vmul.f32 %v2059_v62, %v4189_v1  ;;  %v2064_v56 = vmul.f32 %v2055_v4, %v4192_v50 }
 0x806   : > { %2179 = vrot.lane.b32.xlu1 %v5366_v14, %s6799_s23  ;;  %v2744_v51 = vsel %vm630_vm1, %v2733_v41, %v5378_v39  ;;  %v2740_v4 = vsel %vm630_vm1, %v5378_v39, %v2733_v41 }
 0x807   : > { %v2031_v44 = vadd.f32 %v2023_v29, %v1967_v63  ;;  %v2032_v43 = vadd.f32 %v2024_v13, %v1968_v33  ;;  %v2112_v20 = vpop.permute.xlu0 %2111  ;;  %v5470_v57 = vpop.permute.xlu1 %2041  ;;  %v2087_v23 = vmul.f32 %v5183_v48, %v2063_v3  ;;  %v2088_v2 = vmul.f32 %v5183_v48, %v2064_v56 }
 0x808   : > { %v2119_v49 = vsel %vm794_vm5, %v5354_v15, %v2112_v20  ;;  %v2123_v17 = vsel %vm794_vm5, %v2112_v20, %v5354_v15  ;;  %v2215_v48 = vmul.f32 %v5072_v35, %v2191_v22  ;;  %v2216_v3 = vmul.f32 %v5072_v35, %v2192_v26 }
 0x809   : > { %v2127_v58 = vmul.f32 %v2119_v49, %v4203_v12  ;;  %v2128_v34 = vmul.f32 %v2123_v17, %v4206_v42  ;;  %2928 = vrot.lane.b32.xlu0 %v5409_v47, %s6794_s15  ;;  %v2095_v15 = vadd.f32 %v2087_v23, %v2031_v44  ;;  %v2096_v62 = vadd.f32 %v2088_v2, %v2032_v43 }
 0x80a   : > { %1917 = vrot.lane.b32.xlu1 %v5467_v55, %s6769_s16  ;;  %v2748_v22 = vmul.f32 %v2744_v51, %v6894_v37  ;;  %v2749_v35 = vmul.f32 %v2740_v4, %v6895_v21 }
 0x80b   : > { %v2151_v29 = vmul.f32 %v5068_v61, %v2127_v58  ;;  %v2152_v13 = vmul.f32 %v5068_v61, %v2128_v34  ;;  %v2240_v63 = vpop.permute.xlu0 %2239  ;;  %v5495_v33 = vpop.permute.xlu1 %2105 }
 0x80c   : > { %v2247_v39 = vsel %vm876_vm7, %v5368_v38, %v2240_v63  ;;  %v2251_v41 = vsel %vm876_vm7, %v2240_v63, %v5368_v38  ;;  %v2772_v17 = vmul.f32 %v5154_v27, %v2748_v22  ;;  %v2717_v63 = vmul.f32 %v5074_v5, %v5192_v7 }
 0x80d   : > { %v2159_v56 = vadd.f32 %v2151_v29, %v2095_v15  ;;  %v2160_v44 = vadd.f32 %v2152_v13, %v2096_v62  ;;  %v2255_v43 = vmul.f32 %v2247_v39, %v6810_v9  ;;  %v2256_v61 = vmul.f32 %v2251_v41, %v6811_v54  ;;  %2992 = vrot.lane.b32.xlu0 %v5409_v47, %s6797_s1 }
 0x80e   : > { %2045 = vrot.lane.b32.xlu1 %v5467_v55, %s6794_s15  ;;  %v2773_v15 = vmul.f32 %v5154_v27, %v2749_v35  ;;  %v2716_v62 = vmul.f32 %v5074_v5, %v5152_v32 }
 0x80f   : > { %v2223_v26 = vadd.f32 %v2215_v48, %v2159_v56  ;;  %v2224_v20 = vadd.f32 %v2216_v3, %v2160_v44  ;;  %v2279_v23 = vmul.f32 %v5312_v36, %v2255_v43  ;;  %v2280_v38 = vmul.f32 %v5312_v36, %v2256_v61  ;;  %v2797_v2 = vpop.permute.xlu0 %2796  ;;  %v5514_v49 = vpop.permute.xlu1 %2233 }
 0x810   : > { %v2804_v51 = vsel %vm671_vm2, %v5376_v45, %v2797_v2  ;;  %v2808_v58 = vsel %vm671_vm2, %v2797_v2, %v5376_v45  ;;  %v2780_v39 = vadd.f32 %v2772_v17, %v2716_v62  ;;  %v2781_v41 = vadd.f32 %v2773_v15, %v2717_v63 }
 0x811   : > { %v5523_v34 = vadd.f32 %v2279_v23, %v2223_v26  ;;  %v5525_v48 = vadd.f32 %v2280_v38, %v2224_v20  ;;  %v2812_v4 = vmul.f32 %v2808_v58, %v4154_v53  ;;  %v2813_v36 = vmul.f32 %v2804_v51, %v4157_v11  ;;  %1853 = vrot.lane.b32.xlu0 %v5467_v55, %s6792_s30 }
 0x812   : > { %2109 = vrot.lane.b32.xlu1 %v5467_v55, %s6797_s1  ;;  %v5575_v17 = vadd.f32 %v5141_v40, %v5032_v30 }
 0x813   : > { %v2836_v45 = vmul.f32 %v5165_v28, %v2812_v4  ;;  %v2861_v29 = vpop.permute.xlu0 %2860  ;;  %v5537_v13 = vpop.permute.xlu1 %2790  ;;  %v2837_v3 = vmul.f32 %v5165_v28, %v2813_v36 }
 0x814   : > { %v2868_v27 = vsel %vm712_vm3, %v5384_v31, %v2861_v29  ;;  %v2872_v22 = vsel %vm712_vm3, %v2861_v29, %v5384_v31 }
 0x815   : > { %1981 = vrot.lane.b32.xlu0 %v5467_v55, %s6793_s24  ;;  %v2876_v56 = vmul.f32 %v2872_v22, %v4168_v0  ;;  %v2877_v44 = vmul.f32 %v2868_v27, %v4171_v19  ;;  %v2844_v28 = vadd.f32 %v2836_v45, %v2780_v39  ;;  %v2845_v61 = vadd.f32 %v2837_v3, %v2781_v41  ;;  %v6899_v27 = vld [vmem:[#allocation10_spill] sm:$0xff] }
 0x816   : > { %2237 = vrot.lane.b32.xlu1 %v5467_v55, %s6803_s21 }
 0x817   : > { %v2925_v5 = vpop.permute.xlu0 %2924  ;;  %v5554_v43 = vpop.permute.xlu1 %2854  ;;  %v2900_v35 = vmul.f32 %v5209_v59, %v2876_v56  ;;  %v2901_v31 = vmul.f32 %v5209_v59, %v2877_v44  ;;  %v5571_v59 = vadd.f32 %v5139_v18, %v5060_v25 }
 0x818   : > { %v2932_v26 = vsel %vm753_vm4, %v5390_v16, %v2925_v5  ;;  %v2936_v38 = vsel %vm753_vm4, %v2925_v5, %v5390_v16 }
 0x819   : > { %2173 = vrot.lane.b32.xlu0 %v5467_v55, %s6799_s23  ;;  %v2908_v20 = vadd.f32 %v2900_v35, %v2844_v28  ;;  %v2909_v23 = vadd.f32 %v2901_v31, %v2845_v61  ;;  %v2941_v2 = vmul.f32 %v2932_v26, %v4192_v50  ;;  %6898 = vst [vmem:[#allocation78_spill] sm:$0xff] %v5571_v59 }
 0x81a   : > { %2301 = vrot.lane.b32.xlu1 %v5467_v55, %s6804_s22  ;;  %v2940_v4 = vmul.f32 %v2936_v38, %v4189_v1 }
 0x81b   : > { %v2989_v51 = vpop.permute.xlu0 %2988  ;;  %v5577_v58 = vpop.permute.xlu1 %2918  ;;  %v2965_v16 = vmul.f32 %v5246_v60, %v2941_v2 }
 0x81c   : > { %v2996_v36 = vsel %vm794_vm5, %v5398_v24, %v2989_v51  ;;  %v3000_v18 = vsel %vm794_vm5, %v2989_v51, %v5398_v24  ;;  %v2964_v30 = vmul.f32 %v5246_v60, %v2940_v4 }
 0x81d   : > { %v3004_v15 = vmul.f32 %v2996_v36, %v4203_v12  ;;  %1861 = vrot.lane.b32.xlu0 %v5575_v17, %s6792_s30  ;;  %v2973_v40 = vadd.f32 %v2965_v16, %v2909_v23  ;;  %v3005_v62 = vmul.f32 %v3000_v18, %v4206_v42  ;;  %v5637_v16 = vld [vmem:[%s6597_s10 + $0x30] sm:$0xff] }
 0x81e   : > { %2730 = vrot.lane.b32.xlu1 %v5571_v59, %s6792_s30  ;;  %v2972_v3 = vadd.f32 %v2964_v30, %v2908_v20 }
 0x81f   : > { %v3028_v45 = vmul.f32 %v5266_v52, %v3004_v15  ;;  %v3053_v29 = vpop.permute.xlu0 %3052  ;;  %v5595_v63 = vpop.permute.xlu1 %2982  ;;  %v3029_v24 = vmul.f32 %v5266_v52, %v3005_v62  ;;  %v6900_v52 = vld [vmem:[#allocation65_spill] sm:$0xff]  ;;  %v6903_v62 = vmov 8  }
 0x820   : > { %v3060_v22 = vsel %vm835_vm6, %v6899_v27, %v3053_v29  ;;  %v3064_v60 = vsel %vm835_vm6, %v3053_v29, %v6899_v27 }
 0x821   : > { %v3068_v39 = vmul.f32 %v3060_v22, %v4195_v6  ;;  %1989 = vrot.lane.b32.xlu0 %v5575_v17, %s6793_s24  ;;  %v3036_v41 = vadd.f32 %v3028_v45, %v2972_v3  ;;  %v3037_v56 = vadd.f32 %v3029_v24, %v2973_v40  ;;  %v3069_v44 = vmul.f32 %v3064_v60, %v4200_v46  ;;  %v6904_v3 = vld [vmem:[#allocation54_spill] sm:$0xff] }
 0x822   : > { %2794 = vrot.lane.b32.xlu1 %v5571_v59, %s6769_s16 }
 0x823   : > { %v3092_v28 = vmul.f32 %v6900_v52, %v3068_v39  ;;  %v1850_v5 = vpop.permute.xlu0 %1849  ;;  %v5611_v61 = vpop.permute.xlu1 %3046  ;;  %v3093_v35 = vmul.f32 %v6900_v52, %v3069_v44  ;;  %v6905_v44 = vld [vmem:[#allocation50_spill] sm:$0xff]  ;;  %v6906_v52 = vld [vmem:[#allocation17_spill] sm:$0xff] }
 0x825   : > { %v5614_v31 = vadd.f32 %v3092_v28, %v3036_v41  ;;  %3108 = vrot.lane.b32.xlu0 %v5152_v32, %s6803_s21  ;;  %v5618_v26 = vadd.f32 %v3093_v35, %v3037_v56  ;;  %v1841_v28 = vmul.f32 %v6906_v52, %v6905_v44  ;;  %v6910_v44 = vld [vmem:[#allocation24_spill] sm:$0xff] }
 0x826   : > { %2858 = vrot.lane.b32.xlu1 %v5571_v59, %s6793_s24 }
 0x827   : > { %6901 = vst [vmem:[#allocation10_spill] sm:$0xff] %v5614_v31  ;;  %6902 = vst [vmem:[#allocation65_spill] sm:$0xff] %v5618_v26  ;;  %v1978_v20 = vpop.permute.xlu0 %1977  ;;  %v1922_v23 = vpop.permute.xlu1 %1921 }
 0x828   : > { %v1928_v36 = vsel %vm671_vm2, %v5446_v8, %v1922_v23  ;;  %v1932_v18 = vsel %vm671_vm2, %v1922_v23, %v5446_v8  ;;  %v3674_v8 = vld [vmem:[%s6597_s10 + $0x28] sm:$0xff] }
 0x829   : > { %2181 = vrot.lane.b32.xlu0 %v5575_v17, %s6799_s23  ;;  %v1937_v45 = vmul.f32 %v1932_v18, %v4154_v53  ;;  %v1938_v29 = vmul.f32 %v1928_v36, %v4157_v11  ;;  %v6908_v18 = vld [vmem:[#allocation61_spill] sm:$0xff] }
 0x82a   : > { %2922 = vrot.lane.b32.xlu1 %v5571_v59, %s6794_s15 }
 0x82b   : > { %v5626_v38 = vpop.permute.xlu0 %2169  ;;  %v2050_v2 = vpop.permute.xlu1 %2049 }
 0x82c   : > { %v2060_v40 = vsel %vm753_vm4, %v2050_v2, %v5470_v57  ;;  %v2056_v22 = vsel %vm753_vm4, %v5470_v57, %v2050_v2  ;;  %v6907_v57 = vld [vmem:[#allocation20_spill] sm:$0xff] }
 0x82d   : > { %3116 = vrot.lane.b32.xlu0 %v5192_v7, %s6803_s21  ;;  %v2065_v60 = vmul.f32 %v2060_v40, %v4189_v1  ;;  %v1961_v2 = vmul.f32 %v6907_v57, %v1937_v45  ;;  %v1962_v36 = vmul.f32 %v6907_v57, %v1938_v29  ;;  %v1842_v40 = vmul.f32 %v6906_v52, %v6908_v18 }
 0x82e   : > { %2986 = vrot.lane.b32.xlu1 %v5571_v59, %s6797_s1 }
 0x82f   : > { %v5632_v51 = vpop.permute.xlu0 %2297  ;;  %v2114_v4 = vpop.permute.xlu1 %2113  ;;  %v2089_v52 = vmul.f32 %v6910_v44, %v2065_v60 }
 0x830   : > { %v2120_v56 = vsel %vm794_vm5, %v5495_v33, %v2114_v4 }
 0x831   : > { %3149 = vperm.xlu0 %3611, %v5637_v16   ;;  %v2129_v57 = vmul.f32 %v2120_v56, %v4203_v12 }
 0x832   : > { %1925 = vrot.lane.b32.xlu1 %v5575_v17, %s6769_s16 }
 0x833   : > { %v5648_v15 = vpop.permute.xlu0 %2726  ;;  %v2242_v30 = vpop.permute.xlu1 %2241 }
 0x834   : > { %v2248_v60 = vsel %vm876_vm7, %v5514_v49, %v2242_v30  ;;  %v2252_v56 = vsel %vm876_vm7, %v2242_v30, %v5514_v49 }
 0x835   : > { %3614 = vset.pattern.permute.xlu0 %v6903_v62 }
 0x836   : > { %3110 = vrot.lane.b32.xlu1 %v6904_v3, %s6803_s21  ;;  %3209 = vperm.xlu0 %3614, %v3674_v8   ;;  %v2124_v8 = vsel %vm794_vm5, %v2114_v4, %v5495_v33 }
 0x837   : > { %v1858_v24 = vpop.permute.xlu0 %1857  ;;  %v2799_v27 = vpop.permute.xlu1 %2798 }
 0x838   : > { %v1864_v39 = vsel %vm630_vm1, %v1850_v5, %v1858_v24  ;;  %v1868_v41 = vsel %vm630_vm1, %v1858_v24, %v1850_v5  ;;  %v2066_v5 = vmul.f32 %v2056_v22, %v4192_v50  ;;  %v6909_v24 = vld [vmem:[#allocation32_spill] sm:$0xff] }
 0x839   : > { %v1873_v35 = vmul.f32 %v1868_v41, %v6894_v37  ;;  %v1874_v23 = vmul.f32 %v1864_v39, %v6895_v21 }
 0x83a   : > { %2053 = vrot.lane.b32.xlu1 %v5575_v17, %s6794_s15  ;;  %3050 = vrot.lane.b32.xlu0 %v5571_v59, %s6799_s23 }
 0x83b   : > { %v1897_v39 = vmul.f32 %v6909_v24, %v1873_v35  ;;  %v1898_v45 = vmul.f32 %v6909_v24, %v1874_v23  ;;  %v1986_v29 = vpop.permute.xlu0 %1985  ;;  %v2863_v41 = vpop.permute.xlu1 %2862  ;;  %v2130_v35 = vmul.f32 %v2124_v8, %v4206_v42  ;;  %v6911_v23 = vld [vmem:[#allocation44_spill] sm:$0xff] }
 0x83c   : > { %v1992_v18 = vsel %vm712_vm3, %v1978_v20, %v1986_v29  ;;  %v1996_v22 = vsel %vm712_vm3, %v1986_v29, %v1978_v20  ;;  %v6912_v29 = vld [vmem:[#allocation55_spill] sm:$0xff] }
 0x83d   : > { %v1905_v26 = vadd.f32 %v1897_v39, %v1841_v28  ;;  %v1906_v31 = vadd.f32 %v1898_v45, %v1842_v40  ;;  %v2001_v33 = vmul.f32 %v1996_v22, %v4168_v0  ;;  %v2002_v4 = vmul.f32 %v1992_v18, %v4171_v19 }
 0x83e   : > { %2117 = vrot.lane.b32.xlu1 %v5575_v17, %s6797_s1  ;;  %3174 = vrot.lane.b32.xlu0 %v6904_v3, %s6804_s22  ;;  %v2090_v45 = vmul.f32 %v6910_v44, %v2066_v5  ;;  %v2153_v18 = vmul.f32 %v6912_v29, %v2129_v57  ;;  %v2154_v22 = vmul.f32 %v6912_v29, %v2130_v35  ;;  %v6913_v57 = vld [vmem:[#allocation66_spill] sm:$0xff] }
 0x83f   : > { %v1969_v20 = vadd.f32 %v1961_v2, %v1905_v26  ;;  %v1970_v28 = vadd.f32 %v1962_v36, %v1906_v31  ;;  %v2025_v40 = vmul.f32 %v6911_v23, %v2001_v33  ;;  %v2026_v8 = vmul.f32 %v6911_v23, %v2002_v4  ;;  %v2178_v24 = vpop.permute.xlu0 %2177  ;;  %v2927_v39 = vpop.permute.xlu1 %2926 }
 0x840   : > { %v2184_v49 = vsel %vm835_vm6, %v5626_v38, %v2178_v24  ;;  %v2188_v30 = vsel %vm835_vm6, %v2178_v24, %v5626_v38  ;;  %v2257_v5 = vmul.f32 %v2248_v60, %v6810_v9  ;;  %v2258_v44 = vmul.f32 %v2252_v56, %v6811_v54 }
 0x841   : > { %v2033_v26 = vadd.f32 %v2025_v40, %v1969_v20  ;;  %v2034_v31 = vadd.f32 %v2026_v8, %v1970_v28  ;;  %v2193_v2 = vmul.f32 %v2184_v49, %v4195_v6  ;;  %v2194_v36 = vmul.f32 %v2188_v30, %v4200_v46  ;;  %v6914_v28 = vld [vmem:[#allocation28_spill] sm:$0xff]  ;;  %v6915_v49 = vld [vmem:[#allocation31_spill] sm:$0xff] }
 0x842   : > { %3118 = vrot.lane.b32.xlu1 %v6913_v57, %s6803_s21  ;;  %3182 = vrot.lane.b32.xlu0 %v6913_v57, %s6804_s22  ;;  %v2805_v38 = vsel %vm671_vm2, %v5537_v13, %v2799_v27  ;;  %v2809_v33 = vsel %vm671_vm2, %v2799_v27, %v5537_v13  ;;  %v5745_v13 = vld [vmem:[%s6599_s12 + $0x10] ss:$0 sm:$0xff]  ;;  %v2281_v30 = vmul.f32 %v6915_v49, %v2257_v5 }
 0x843   : > { %v2097_v4 = vadd.f32 %v2089_v52, %v2033_v26  ;;  %v2098_v35 = vadd.f32 %v2090_v45, %v2034_v31  ;;  %v2306_v20 = vpop.permute.xlu0 %2305  ;;  %v2991_v60 = vpop.permute.xlu1 %2990  ;;  %v2217_v56 = vmul.f32 %v6914_v28, %v2193_v2  ;;  %v2218_v23 = vmul.f32 %v6914_v28, %v2194_v36  ;;  %v5751_v52 = vld [vmem:[%s6599_s12 + $0x18] ss:$0 sm:$0xff] }
 0x844   : > { %v2312_v40 = vsel %vm917_vm8, %v5632_v51, %v2306_v20  ;;  %v2316_v8 = vsel %vm917_vm8, %v2306_v20, %v5632_v51  ;;  %v2282_v51 = vmul.f32 %v6915_v49, %v2258_v44  ;;  %v2815_v26 = vmul.f32 %v2805_v38, %v4157_v11  ;;  %v3677_v31 = vld [vmem:[%s6597_s10 + $0x38] sm:$0xff]  ;;  %v6920_v49 = vld [vmem:[#allocation35_spill] sm:$0xff] }
 0x845   : > { %v2161_v24 = vadd.f32 %v2153_v18, %v2097_v4  ;;  %v2162_v29 = vadd.f32 %v2154_v22, %v2098_v35  ;;  %v2321_v27 = vmul.f32 %v5745_v13, %v2312_v40  ;;  %v2322_v45 = vmul.f32 %v5751_v52, %v2316_v8  ;;  %v6916_v4 = vld [vmem:[#allocation36_spill] sm:$0xff] }
 0x846   : > { %v2814_v18 = vmul.f32 %v2809_v33, %v4154_v53  ;;  %3153 = vperm.xlu1 %3615, %v3677_v31   ;;  %v2869_v2 = vsel %vm712_vm3, %v5554_v43, %v2863_v41  ;;  %v2873_v36 = vsel %vm712_vm3, %v2863_v41, %v5554_v43  ;;  %3217 = vperm.xlu0 %3614, %v3677_v31  }
 0x847   : > { %v2225_v22 = vadd.f32 %v2217_v56, %v2161_v24  ;;  %v2226_v5 = vadd.f32 %v2218_v23, %v2162_v29  ;;  %v2735_v44 = vpop.permute.xlu0 %2734  ;;  %v3055_v33 = vpop.permute.xlu1 %3054  ;;  %v2345_v38 = vmul.f32 %v6916_v4, %v2321_v27  ;;  %v2346_v35 = vmul.f32 %v6916_v4, %v2322_v45 }
 0x848   : > { %v2741_v20 = vsel %vm630_vm1, %v5648_v15, %v2735_v44  ;;  %v2745_v28 = vsel %vm630_vm1, %v2735_v44, %v5648_v15  ;;  %v2878_v56 = vmul.f32 %v2873_v36, %v4168_v0  ;;  %v2879_v23 = vmul.f32 %v2869_v2, %v4171_v19  ;;  %v6917_v15 = vld [vmem:[#allocation75_spill] sm:$0xff]  ;;  %v6921_v36 = vld [vmem:[#allocation41_spill] sm:$0xff] }
 0x849   : > { %v2289_v40 = vadd.f32 %v2281_v30, %v2225_v22  ;;  %v2290_v8 = vadd.f32 %v2282_v51, %v2226_v5  ;;  %v2750_v43 = vmul.f32 %v2745_v28, %v6894_v37  ;;  %v2751_v41 = vmul.f32 %v2741_v20, %v6895_v21 }
 0x84a   : > { %v2933_v24 = vsel %vm753_vm4, %v5577_v58, %v2927_v39  ;;  %v2937_v29 = vsel %vm753_vm4, %v2927_v39, %v5577_v58  ;;  %3048 = vrot.lane.b32.xlu1 %v6917_v15, %s6799_s23  ;;  %3120 = vrot.lane.b32.xlu0 %v5409_v47, %s6803_s21  ;;  %v2718_v58 = vmul.f32 %v6921_v36, %v6904_v3 }
 0x84b   : > { %v5787_v27 = vadd.f32 %v2345_v38, %v2289_v40  ;;  %v5789_v45 = vadd.f32 %v2346_v35, %v2290_v8  ;;  %v2774_v30 = vmul.f32 %v6920_v49, %v2750_v43  ;;  %v2775_v51 = vmul.f32 %v6920_v49, %v2751_v41  ;;  %v1916_v31 = vpop.permute.xlu0 %1915  ;;  %v5795_v2 = vpop.permute.xlu1 %1851  ;;  %3616 = vset.pattern.permute.xlu1 %v6903_v62  ;;  %v6922_v38 = vld [vmem:[#allocation46_spill] sm:$0xff]  ;;  %v6923_v62 = vld [vmem:[#allocation52_spill] sm:$0xff] }
 0x84c   : > { %v2719_v39 = vmul.f32 %v6921_v36, %v6913_v57  ;;  %v2942_v22 = vmul.f32 %v2937_v29, %v4189_v1  ;;  %v2943_v5 = vmul.f32 %v2933_v24, %v4192_v50  ;;  %v2997_v44 = vsel %vm794_vm5, %v5595_v63, %v2991_v60  ;;  %v6926_v29 = vld [vmem:[#allocation51_spill] sm:$0xff] }
 0x84d   : > { %6918 = vst [vmem:[#allocation54_spill] sm:$0xff] %v5787_v27  ;;  %6919 = vst [vmem:[#allocation50_spill] sm:$0xff] %v5789_v45  ;;  %v3001_v4 = vsel %vm794_vm5, %v2991_v60, %v5595_v63  ;;  %v2838_v35 = vmul.f32 %v6922_v38, %v2814_v18  ;;  %v2839_v3 = vmul.f32 %v6922_v38, %v2815_v26 }
 0x84e   : > { %v2782_v20 = vadd.f32 %v2774_v30, %v2718_v58  ;;  %v2783_v57 = vadd.f32 %v2775_v51, %v2719_v39  ;;  %3056 = vrot.lane.b32.xlu1 %v5409_v47, %s6799_s23  ;;  %v2902_v28 = vmul.f32 %v6923_v62, %v2878_v56  ;;  %v2903_v40 = vmul.f32 %v6923_v62, %v2879_v23  ;;  %v6924_v23 = vld [vmem:[#allocation42_spill] sm:$0xff] }
 0x84f   : > { %v3061_v8 = vsel %vm835_vm6, %v5611_v61, %v3055_v33  ;;  %v3065_v63 = vsel %vm835_vm6, %v3055_v33, %v5611_v61  ;;  %3176 = vrot.lane.b32.xlu0 %v6917_v15, %s6804_s22  ;;  %v2044_v60 = vpop.permute.xlu0 %2043  ;;  %v5824_v18 = vpop.permute.xlu1 %1979  ;;  %v3006_v26 = vmul.f32 %v2997_v44, %v4203_v12  ;;  %v3007_v43 = vmul.f32 %v3001_v4, %v4206_v42 }
 0x850   : > { %v2846_v41 = vadd.f32 %v2838_v35, %v2782_v20  ;;  %v2847_v56 = vadd.f32 %v2839_v3, %v2783_v57  ;;  %v5830_v24 = vadd.f32 %v6924_v23, %v5060_v25  ;;  %v2966_v49 = vmul.f32 %v6926_v29, %v2942_v22  ;;  %v6927_v25 = vld [vmem:[#allocation58_spill] sm:$0xff]  ;;  %v6928_v3 = vld [vmem:[#allocation64_spill] sm:$0xff] }
 0x851   : > { %v2967_v61 = vmul.f32 %v6926_v29, %v2943_v5  ;;  %v3070_v51 = vmul.f32 %v3061_v8, %v4195_v6  ;;  %v3071_v36 = vmul.f32 %v3065_v63, %v4200_v46  ;;  %v3030_v44 = vmul.f32 %v6927_v25, %v3006_v26 }
 0x852   : > { %6925 = vst [vmem:[#allocation17_spill] sm:$0xff] %v5830_v24  ;;  %v2910_v33 = vadd.f32 %v2902_v28, %v2846_v41  ;;  %v2911_v30 = vadd.f32 %v2903_v40, %v2847_v56  ;;  %3172 = vrot.lane.b32.xlu1 %v5152_v32, %s6804_s22  ;;  %v3031_v22 = vmul.f32 %v6927_v25, %v3007_v43 }
 0x853   : > { %3058 = vrot.lane.b32.xlu0 %v5830_v24, %s6799_s23  ;;  %v2108_v58 = vpop.permute.xlu0 %2107  ;;  %v5840_v39 = vpop.permute.xlu1 %2171  ;;  %v3094_v20 = vmul.f32 %v6928_v3, %v3070_v51  ;;  %v3095_v57 = vmul.f32 %v6928_v3, %v3071_v36 }
 0x854   : > { %v2974_v5 = vadd.f32 %v2966_v49, %v2910_v33  ;;  %v2975_v4 = vadd.f32 %v2967_v61, %v2911_v30  ;;  %v6931_v49 = vld [vmem:[#allocation77_spill] sm:$0xff]  ;;  %v6932_v61 = vld [vmem:[#allocation76_spill] sm:$0xff] }
 0x855   : > { %v2311_v33 = vsel %vm917_vm8, %v6932_v61, %v6931_v49 }
 0x856   : > { %v3038_v38 = vadd.f32 %v3030_v44, %v2974_v5  ;;  %v3039_v35 = vadd.f32 %v3031_v22, %v2975_v4  ;;  %2245 = vrot.lane.b32.xlu1 %v5575_v17, %s6803_s21  ;;  %v2319_v36 = vmul.f32 %v5745_v13, %v2311_v33 }
 0x857   : > { %3184 = vrot.lane.b32.xlu0 %v5409_v47, %s6804_s22  ;;  %v2300_v32 = vpop.permute.xlu0 %2299  ;;  %v2236_v62 = vpop.permute.xlu1 %2235 }
 0x858   : > { %v5850_v28 = vadd.f32 %v3094_v20, %v3038_v38  ;;  %v5852_v40 = vadd.f32 %v3095_v57, %v3039_v35  ;;  %v6935_v38 = vld [vmem:[#allocation34_spill] sm:$0xff] }
 0x859   : > { %v2343_v35 = vmul.f32 %v6935_v38, %v2319_v36  ;;  %v6937_v36 = vld [vmem:[#allocation29_spill] sm:$0xff] }
 0x85a   : > { %6929 = vst [vmem:[#allocation20_spill] sm:$0xff] %v5850_v28  ;;  %6930 = vst [vmem:[#allocation61_spill] sm:$0xff] %v5852_v40  ;;  %2309 = vrot.lane.b32.xlu1 %v5575_v17, %s6804_s22 }
 0x85b   : > { %v1924_v8 = vpop.permute.xlu0 %1923  ;;  %v2729_v63 = vpop.permute.xlu1 %2728  ;;  %v5907_v57 = vadd.f32 %v2343_v35, %v5523_v34  ;;  %v6938_v35 = vld [vmem:[#allocation74_spill] sm:$0xff] }
 0x85c   : > { %v1929_v26 = vsel %vm671_vm2, %v1916_v31, %v1924_v8  ;;  %v1933_v43 = vsel %vm671_vm2, %v1924_v8, %v1916_v31  ;;  %v5874_v31 = vmul.f32 0.70710677, %v5787_v27  ;;  %v6943_v27 = vld [vmem:[#allocation48_spill] sm:$0xff] }
 0x85d   : > { %6936 = vst [vmem:[#allocation44_spill] sm:$0xff] %v5907_v57  ;;  %v1939_v33 = vmul.f32 %v1933_v43, %v4154_v53 }
 0x85e   : > { %3180 = vrot.lane.b32.xlu1 %v5192_v7, %s6804_s22  ;;  %6933 = vst [vmem:[#allocation32_spill] sm:$0xff] %v5874_v31  ;;  %v5877_v7 = vmul.f32 0.70710677, %v5789_v45  ;;  %v5893_v44 = vand.u32 2147483647, %v5874_v31 }
 0x85f   : > { %v2052_v41 = vpop.permute.xlu0 %2051  ;;  %v5862_v56 = vpop.permute.xlu1 %2792 }
 0x860   : > { %v2057_v23 = vsel %vm753_vm4, %v2044_v60, %v2052_v41  ;;  %v2061_v29 = vsel %vm753_vm4, %v2052_v41, %v2044_v60  ;;  %6934 = vst [vmem:[#allocation24_spill] sm:$0xff] %v5877_v7  ;;  %v5896_v22 = vand.u32 2147483647, %v5877_v7  ;;  %v2401_v8 = vmul.f32 0.3275911, %v5893_v44 }
 0x861   : > { %v2067_v28 = vmul.f32 %v2061_v29, %v4189_v1 }
 0x862   : > { %3213 = vperm.xlu1 %3616, %v5637_v16   ;;  %v2315_v16 = vsel %vm917_vm8, %v6931_v49, %v6932_v61  ;;  %v2402_v41 = vmul.f32 0.3275911, %v5896_v22 }
 0x863   : > { %v2116_v30 = vpop.permute.xlu0 %2115  ;;  %v5879_v51 = vpop.permute.xlu1 %2856  ;;  %v2320_v4 = vmul.f32 %v5751_v52, %v2315_v16  ;;  %v2720_v16 = vmul.f32 %v6937_v36, %v6917_v15 }
 0x864   : > { %v2121_v60 = vsel %vm794_vm5, %v2108_v58, %v2116_v30  ;;  %v2125_v25 = vsel %vm794_vm5, %v2116_v30, %v2108_v58 }
 0x865   : > { %v2344_v61 = vmul.f32 %v6935_v38, %v2320_v4  ;;  %v6939_v4 = vld [vmem:[#allocation18_spill] sm:$0xff] }
 0x866   : > { %3112 = vrot.lane.b32.xlu1 %v6917_v15, %s6803_s21  ;;  %v1843_v38 = vmul.f32 %v6939_v4, %v6938_v35  ;;  %v1844_v43 = vmul.f32 %v6939_v4, %v5366_v14  ;;  %v5945_v15 = vadd.f32 1.0, %v2402_v41  ;;  %v2131_v14 = vmul.f32 %v2121_v60, %v4203_v12 }
 0x867   : > { %v2244_v5 = vpop.permute.xlu0 %2243  ;;  %v5904_v20 = vpop.permute.xlu1 %2920  ;;  %v5934_v40 = vadd.f32 %v2344_v61, %v5525_v48  ;;  %v6940_v61 = vld [vmem:[#allocation21_spill] sm:$0xff]  ;;  %v2132_v4 = vmul.f32 %v2125_v25, %v4206_v42 }
 0x868   : > { %v2249_v58 = vsel %vm876_vm7, %v2236_v62, %v2244_v5  ;;  %v2253_v3 = vsel %vm876_vm7, %v2244_v5, %v2236_v62  ;;  %v2721_v5 = vmul.f32 %v6937_v36, %v5409_v47  ;;  %v5943_v47 = vadd.f32 1.0, %v2401_v8 }
 0x869   : > { %v2068_v36 = vmul.f32 %v2057_v23, %v4192_v50  ;;  %v1963_v35 = vmul.f32 %v6940_v61, %v1939_v33  ;;  %v6941_v33 = vld [vmem:[#allocation49_spill] sm:$0xff] }
 0x86a   : > { %3114 = vrot.lane.b32.xlu1 %v5571_v59, %s6803_s21  ;;  %3637 = vrcp.f32 %v5943_v47  ;;  %v6071_v47 = vmul.f32 0.70710677, %v5934_v40 }
 0x86b   : > { %v2308_v49 = vpop.permute.xlu0 %2307  ;;  %v5923_v30 = vpop.permute.xlu1 %2984  ;;  %3639 = vrcp.f32 %v5945_v15 }
 0x86c   : > { %v5917_v62 = vsel %vm917_vm8, %v2300_v32, %v2308_v49  ;;  %v5921_v34 = vsel %vm917_vm8, %v2308_v49, %v2300_v32  ;;  %v5937_v32 = vmul.f32 0.70710677, %v5907_v57  ;;  %v1940_v49 = vmul.f32 %v1929_v26, %v4157_v11 }
 0x86d   : > { %v2091_v57 = vmul.f32 %v6941_v33, %v2067_v28  ;;  %v6085_v15 = vand.u32 2147483647, %v6071_v47  ;;  %vm2376_vm12 = vcmp.ge.f32.partialorder %v6071_v47, 0.0 }
 0x86e   : > { %3178 = vrot.lane.b32.xlu1 %v5571_v59, %s6804_s22  ;;  %v1964_v25 = vmul.f32 %v6940_v61, %v1940_v49  ;;  %v6944_v49 = vld [vmem:[#allocation19_spill] sm:$0xff]  ;;  %vm2375_vm11 = vcmp.ge.f32.partialorder %v5937_v32, 0.0 }
 0x86f   : > { %v2737_v48 = vpop.permute.xlu0 %2736  ;;  %v1860_v59 = vpop.permute.xlu1 %1859 }
 0x870   : > { %v2742_v26 = vsel %vm630_vm1, %v2729_v63, %v2737_v48  ;;  %v2746_v29 = vsel %vm630_vm1, %v2737_v48, %v2729_v63  ;;  %v1865_v23 = vsel %vm630_vm1, %v5795_v2, %v1860_v59  ;;  %v1869_v60 = vsel %vm630_vm1, %v1860_v59, %v5795_v2 }
 0x871   : > { %v2752_v8 = vmul.f32 %v2746_v29, %v6894_v37  ;;  %v2753_v41 = vmul.f32 %v2742_v26, %v6895_v21  ;;  %v1875_v45 = vmul.f32 %v1869_v60, %v6894_v37  ;;  %v1876_v63 = vmul.f32 %v1865_v23, %v6895_v21  ;;  %v6942_v26 = vld [vmem:[#allocation57_spill] sm:$0xff] }
 0x872   : > { %2738 = vrot.lane.b32.xlu1 %v5830_v24, %s6792_s30  ;;  %v2092_v48 = vmul.f32 %v6941_v33, %v2068_v36  ;;  %v2155_v29 = vmul.f32 %v6942_v26, %v2131_v14  ;;  %v2156_v2 = vmul.f32 %v6942_v26, %v2132_v4  ;;  %v2259_v36 = vmul.f32 %v2249_v58, %v6810_v9  ;;  %v6945_v26 = vld [vmem:[#allocation43_spill] sm:$0xff]  ;;  %s3680_s30 = scalar_lea.vmem %s6536_s4, 512 }
 0x873   : > { %v2776_v7 = vmul.f32 %v6943_v27, %v2752_v8  ;;  %v2777_v31 = vmul.f32 %v6943_v27, %v2753_v41  ;;  %v2801_v59 = vpop.permute.xlu0 %2800  ;;  %v1899_v28 = vmul.f32 %v6944_v49, %v1875_v45  ;;  %v1900_v61 = vmul.f32 %v6944_v49, %v1876_v63  ;;  %v1988_v60 = vpop.permute.xlu1 %1987  ;;  %p3681_p11 = scmp.ne.s32.totalorder %s6536_s4, %s3680_s30 }
 0x874   : > { %v2806_v23 = vsel %vm671_vm2, %v5862_v56, %v2801_v59  ;;  %v2260_v14 = vmul.f32 %v2253_v3, %v6811_v54  ;;  %v2810_v27 = vsel %vm671_vm2, %v2801_v59, %v5862_v56  ;;  %v1993_v58 = vsel %vm712_vm3, %v5824_v18, %v1988_v60 }
 0x875   : > { %v2817_v8 = vmul.f32 %v2806_v23, %v4157_v11  ;;  %v2784_v4 = vadd.f32 %v2776_v7, %v2720_v16  ;;  %v1907_v41 = vadd.f32 %v1899_v28, %v1843_v38  ;;  %v1908_v45 = vadd.f32 %v1900_v61, %v1844_v43  ;;  %v6946_v23 = vld [vmem:[#allocation22_spill] sm:$0xff]  ;;  %p3682_p12 = pnand %p3681_p11, %p3873_p5 }
 0x876   : > { %v2816_v33 = vmul.f32 %v2810_v27, %v4154_v53  ;;  %2802 = vrot.lane.b32.xlu1 %v5830_v24, %s6769_s16  ;;  %v2785_v63 = vadd.f32 %v2777_v31, %v2721_v5  ;;  %v1997_v56 = vsel %vm712_vm3, %v1988_v60, %v5824_v18  ;;  %v2004_v31 = vmul.f32 %v1993_v58, %v4171_v19 }
 0x877   : > { %v2841_v49 = vmul.f32 %v6945_v26, %v2817_v8  ;;  %v2865_v3 = vpop.permute.xlu0 %2864  ;;  %v1971_v16 = vadd.f32 %v1963_v35, %v1907_v41  ;;  %v1972_v38 = vadd.f32 %v1964_v25, %v1908_v45  ;;  %v2003_v43 = vmul.f32 %v1997_v56, %v4168_v0  ;;  %p3683_p13 = pneg %p3682_p12 }
 0x878   : > { %v2840_v7 = vmul.f32 %v6945_v26, %v2816_v33  ;;  %v2180_v59 = vpop.permute.xlu1 %2179  ;;  %v2870_v5 = vsel %vm712_vm3, %v5879_v51, %v2865_v3  ;;  %v2874_v61 = vsel %vm712_vm3, %v2865_v3, %v5879_v51  ;;  %v2323_v27 = vmul.f32 %v5745_v13, %v5917_v62  ;;  %v6947_v33 = vld [vmem:[#allocation45_spill] sm:$0xff] }
 0x879   : > { %v2849_v28 = vadd.f32 %v2841_v49, %v2785_v63  ;;  %v2027_v60 = vmul.f32 %v6946_v23, %v2003_v43  ;;  %v2880_v35 = vmul.f32 %v2874_v61, %v4168_v0  ;;  %v2881_v25 = vmul.f32 %v2870_v5, %v4171_v19 }
 0x87a   : > { %v2848_v18 = vadd.f32 %v2840_v7, %v2784_v4  ;;  %2866 = vrot.lane.b32.xlu1 %v5830_v24, %s6793_s24  ;;  %v2028_v8 = vmul.f32 %v6946_v23, %v2004_v31  ;;  %v2185_v41 = vsel %vm835_vm6, %v5840_v39, %v2180_v59  ;;  %v2189_v51 = vsel %vm835_vm6, %v2180_v59, %v5840_v39  ;;  %v6948_v31 = vld [vmem:[#allocation33_spill] sm:$0xff]  ;;  %s3763_s24 = smov [#allocation2]  }
 0x87b   : > { %v2929_v4 = vpop.permute.xlu0 %2928  ;;  %v2035_v45 = vadd.f32 %v2027_v60, %v1971_v16  ;;  %v2904_v63 = vmul.f32 %v6947_v33, %v2880_v35  ;;  %v2905_v26 = vmul.f32 %v6947_v33, %v2881_v25  ;;  %v2195_v49 = vmul.f32 %v2185_v41, %v4195_v6 }
 0x87c   : > { %v6021_v58 = vpop.permute.xlu1 %1917  ;;  %v2036_v62 = vadd.f32 %v2028_v8, %v1972_v38  ;;  %v2196_v56 = vmul.f32 %v2189_v51, %v4200_v46  ;;  %v2934_v3 = vsel %vm753_vm4, %v5904_v20, %v2929_v4  ;;  %v2938_v39 = vsel %vm753_vm4, %v2929_v4, %v5904_v20 }
 0x87d   : > { %v2324_v7 = vmul.f32 %v5751_v52, %v5921_v34  ;;  %v2099_v16 = vadd.f32 %v2091_v57, %v2035_v45  ;;  %v2912_v43 = vadd.f32 %v2904_v63, %v2848_v18  ;;  %v2913_v59 = vadd.f32 %v2905_v26, %v2849_v28  ;;  %v6949_v18 = vld [vmem:[#allocation53_spill] sm:$0xff] }
 0x87e   : > { %2930 = vrot.lane.b32.xlu1 %v5830_v24, %s6794_s15  ;;  %v2100_v38 = vadd.f32 %v2092_v48, %v2036_v62  ;;  %v2219_v5 = vmul.f32 %v6948_v31, %v2195_v49  ;;  %v2944_v61 = vmul.f32 %v2938_v39, %v4189_v1  ;;  %v2945_v23 = vmul.f32 %v2934_v3, %v4192_v50  ;;  %s3684_s15 = sshll.u32 %s3763_s24, 4  ;;  %s3685_s15 = int_to_ptr.vmem [resolvable:$false] %s3684_s15 }
 0x87f   : > { %v2993_v60 = vpop.permute.xlu0 %2992  ;;  %v2163_v35 = vadd.f32 %v2155_v29, %v2099_v16  ;;  %v2220_v20 = vmul.f32 %v6948_v31, %v2196_v56  ;;  %v6950_v29 = vld [vmem:[#allocation70_spill] sm:$0xff]  ;;  %v6952_v56 = vld [vmem:[#allocation39_spill] sm:$0xff]  ;;  %p3687_p0 = scmp.lt.s32.totalorder %s6536_s4, %s3685_s15 }
 0x880   : > { %v2998_v57 = vsel %vm794_vm5, %v5923_v30, %v2993_v60  ;;  %v3002_v34 = vsel %vm794_vm5, %v2993_v60, %v5923_v30  ;;  %v6044_v28 = vpop.permute.xlu1 %2045  ;;  %v2164_v48 = vadd.f32 %v2156_v2, %v2100_v38  ;;  %v2968_v25 = vmul.f32 %v6949_v18, %v2944_v61  ;;  %v6951_v2 = vld [vmem:[#allocation60_spill] sm:$0xff] }
 0x881   : > { %v2969_v8 = vmul.f32 %v6949_v18, %v2945_v23  ;;  %v3008_v41 = vmul.f32 %v2998_v57, %v4203_v12  ;;  %v2283_v51 = vmul.f32 %v6950_v29, %v2259_v36  ;;  %v2284_v4 = vmul.f32 %v6950_v29, %v2260_v14 }
 0x882   : > { %v2227_v45 = vadd.f32 %v2219_v5, %v2163_v35  ;;  %v3009_v33 = vmul.f32 %v3002_v34, %v4206_v42  ;;  %2994 = vrot.lane.b32.xlu1 %v5830_v24, %s6797_s1  ;;  %v2228_v30 = vadd.f32 %v2220_v20, %v2164_v48  ;;  %v2976_v63 = vadd.f32 %v2968_v25, %v2912_v43  ;;  %v6090_v35 = vpop.eup %3637  ;;  %s3686_s1 = scalar_lea.vmem %s3685_s15, 1024 }
 0x883   : > { %v2977_v26 = vadd.f32 %v2969_v8, %v2913_v59  ;;  %v3032_v49 = vmul.f32 %v6951_v2, %v3008_v41  ;;  %v1854_v62 = vpop.permute.xlu0 %1853  ;;  %v2347_v3 = vmul.f32 %v6952_v56, %v2323_v27  ;;  %v2348_v16 = vmul.f32 %v6952_v56, %v2324_v7  ;;  %v6095_v48 = vpop.eup %3639  ;;  %p3688_p1 = scmp.lt.s32.totalorder %s3686_s1, %s3680_s30 }
 0x884   : > { %v2291_v39 = vadd.f32 %v2283_v51, %v2227_v45  ;;  %v3033_v36 = vmul.f32 %v6951_v2, %v3009_v33  ;;  %v6058_v14 = vpop.permute.xlu1 %2109  ;;  %v2292_v38 = vadd.f32 %v2284_v4, %v2228_v30  ;;  %v6074_v27 = vand.u32 2147483647, %v5937_v32 }
 0x885   : > { %v6061_v31 = vadd.f32 %v3032_v49, %v2976_v63  ;;  %v2400_v57 = vmul.f32 0.3275911, %v6085_v15  ;;  %v2433_v25 = vmul.f32 1.0614054, %v6090_v35  ;;  %v2434_v41 = vmul.f32 1.0614054, %v6095_v48  ;;  %p3689_p2 = por %p3688_p1, %p3687_p0 }
 0x886   : > { %v6064_v43 = vadd.f32 %v2347_v3, %v2291_v39  ;;  %v6066_v59 = vadd.f32 %v3033_v36, %v2977_v26  ;;  %3122 = vrot.lane.b32.xlu1 %v5830_v24, %s6803_s21  ;;  %v6076_v5 = vadd.f32 %v2348_v16, %v2292_v38  ;;  %v2399_v23 = vmul.f32 0.3275911, %v6074_v27 }
 0x887   : > { %6953 = vst [vmem:[#allocation55_spill] sm:$0xff] %v6061_v31  ;;  %v6078_v7 = vpop.permute.xlu0 %1981  ;;  %v2408_v8 = vadd.f32 1.0, %v2400_v57  ;;  %v2441_v4 = vadd.f32 -1.4531521, %v2433_v25  ;;  %v2442_v33 = vadd.f32 -1.4531521, %v2434_v41  ;;  %p3690_p3 = pnand %p3689_p2, %p3683_p13 }
 0x888   : > { %6954 = vst [vmem:[#allocation66_spill] sm:$0xff] %v6064_v43  ;;  %6955 = vst [vmem:[#allocation28_spill] sm:$0xff] %v6066_v59  ;;  %v6080_v61 = vpop.permute.xlu1 %2237  ;;  %v2407_v34 = vadd.f32 1.0, %v2399_v23  ;;  %v6104_v45 = vmul.f32 0.70710677, %v6076_v5  ;;  %v2505_v3 = vsub.f32 0.0, %v5893_v44 }
 0x889   : > { %6956 = vst [vmem:[#allocation31_spill] sm:$0xff] %v6076_v5  ;;  %v2449_v63 = vmul.f32 %v6090_v35, %v2441_v4  ;;  %v6110_v26 = vmul.f32 0.70710677, %v6064_v43  ;;  %v2450_v56 = vmul.f32 %v6095_v48, %v2442_v33 }
 0x88a   : > { %3186 = vrot.lane.b32.xlu1 %v5830_v24, %s6804_s22  ;;  %3641 = vrcp.f32 %v2407_v34  ;;  %v6113_v49 = vand.u32 2147483647, %v6104_v45  ;;  %v2513_v41 = vmul.f32 %v2505_v3, %v5893_v44  ;;  %vm2380_vm13 = vcmp.ge.f32.partialorder %v6104_v45, 0.0 }
 0x88b   : > { %v6092_v20 = vpop.permute.xlu0 %2173  ;;  %3643 = vrcp.f32 %v2408_v8  ;;  %v2457_v16 = vadd.f32 1.4214138, %v2449_v63  ;;  %v6122_v38 = vand.u32 2147483647, %v6110_v26  ;;  %v2458_v25 = vadd.f32 1.4214138, %v2450_v56 }
 0x88c   : > { %v6088_v60 = vpop.permute.xlu1 %2301  ;;  %v2404_v23 = vmul.f32 0.3275911, %v6113_v49  ;;  %v2506_v8 = vsub.f32 0.0, %v5896_v22  ;;  %v6962_v56 = vld [vmem:[#allocation27_spill] sm:$0xff]  ;;  %vm2379_vm14 = vcmp.ge.f32.partialorder %v6110_v26, 0.0 }
 0x88d   : > { %v2403_v24 = vmul.f32 0.3275911, %v6122_v38  ;;  %v1845_v44 = vmul.f32 %v6962_v56, %v5467_v55  ;;  %v2466_v3 = vmul.f32 %v6095_v48, %v2458_v25  ;;  %v6963_v55 = vld [vmem:[#allocation7_spill] sm:$0xff] }
 0x88f   : > { %v1862_v29 = vpop.permute.xlu0 %1861  ;;  %v2411_v31 = vadd.f32 1.0, %v2403_v24 }
 0x890   : > { %v6097_v18 = vpop.permute.xlu1 %2730  ;;  %v1866_v57 = vsel %vm630_vm1, %v1854_v62, %v1862_v29  ;;  %v1870_v34 = vsel %vm630_vm1, %v1862_v29, %v1854_v62  ;;  %v2412_v29 = vadd.f32 1.0, %v2404_v23 }
 0x891   : > { %6957 = vst [vmem:[#allocation36_spill] sm:$0xff] %v6097_v18  ;;  %v1878_v62 = vmul.f32 %v1866_v57, %v6895_v21  ;;  %v2523_v18 = vmul.f32 1.442695, %v2513_v41 }
 0x892   : > { %3645 = vrcp.f32 %v2412_v29 }
 0x893   : > { %v1990_v2 = vpop.permute.xlu0 %1989  ;;  %v1902_v25 = vmul.f32 %v6963_v55, %v1878_v62  ;;  %3647 = vrcp.f32 %v2411_v31 }
 0x894   : > { %v6101_v51 = vpop.permute.xlu1 %2794  ;;  %v6119_v36 = vpop.eup %3641  ;;  %v1994_v24 = vsel %vm712_vm3, %v6078_v7, %v1990_v2  ;;  %3649 = vpow2.f32 %v2523_v18 }
 0x895   : > { %6958 = vst [vmem:[#allocation75_spill] sm:$0xff] %v6101_v51  ;;  %v2431_v63 = vmul.f32 1.0614054, %v6119_v36  ;;  %v1877_v51 = vmul.f32 %v1870_v34, %v6894_v37 }
 0x897   : > { %v6131_v4 = vpop.permute.xlu0 %3108  ;;  %v2439_v43 = vadd.f32 -1.4531521, %v2431_v63  ;;  %v1901_v57 = vmul.f32 %v6963_v55, %v1877_v51  ;;  %v1846_v51 = vmul.f32 %v6962_v56, %v5575_v17  ;;  %v6964_v63 = vld [vmem:[#allocation40_spill] sm:$0xff] }
 0x898   : > { %v6106_v30 = vpop.permute.xlu1 %2858 }
 0x899   : > { %6959 = vst [vmem:[#allocation35_spill] sm:$0xff] %v6106_v30  ;;  %v2465_v30 = vmul.f32 %v6090_v35, %v2457_v16 }
 0x89b   : > { %v2473_v16 = vadd.f32 -0.28449672, %v2465_v30  ;;  %v1998_v30 = vsel %vm712_vm3, %v1990_v2, %v6078_v7  ;;  %v2006_v7 = vmul.f32 %v1994_v24, %v4171_v19  ;;  %v2447_v2 = vmul.f32 %v6119_v36, %v2439_v43  ;;  %v6965_v43 = vld [vmem:[#allocation23_spill] sm:$0xff] }
 0x89c   : > { %v6117_v39 = vpop.permute.xlu1 %2922  ;;  %v2005_v21 = vmul.f32 %v1998_v30, %v4168_v0 }
 0x89d   : > { %6960 = vst [vmem:[#allocation41_spill] sm:$0xff] %v6117_v39  ;;  %v6136_v39 = vpop.eup %3643  ;;  %v2481_v29 = vmul.f32 %v6090_v35, %v2473_v16 }
 0x89e   : > { %v2432_v59 = vmul.f32 1.0614054, %v6136_v39 }
 0x89f   : > { %v2489_v16 = vadd.f32 0.2548296, %v2481_v29 }
 0x8a0   : > { %v6133_v33 = vpop.permute.xlu1 %2986 }
 0x8a1   : > { %6961 = vst [vmem:[#allocation46_spill] sm:$0xff] %v6133_v33  ;;  %v2514_v33 = vmul.f32 %v2506_v8, %v5896_v22  ;;  %v6155_v22 = vpop.permute.xlu0 %2181 }
 0x8a2   : > { %v2186_v32 = vsel %vm835_vm6, %v6092_v20, %v6155_v22  ;;  %v2190_v47 = vsel %vm835_vm6, %v6155_v22, %v6092_v20 }
 0x8a4   : > { %v1926_v5 = vpop.permute.xlu1 %1925 }
 0x8a5   : > { %v1930_v34 = vsel %vm671_vm2, %v6021_v58, %v1926_v5  ;;  %v1934_v23 = vsel %vm671_vm2, %v1926_v5, %v6021_v58  ;;  %v2474_v58 = vadd.f32 -0.28449672, %v2466_v3  ;;  %v2525_v5 = vmul.f32 1.442695, %v2514_v33  ;;  %v6176_v33 = vpop.permute.xlu0 %3116 }
 0x8a6   : > { %v1941_v8 = vmul.f32 %v1934_v23, %v4154_v53  ;;  %v1942_v41 = vmul.f32 %v1930_v34, %v4157_v11  ;;  %v2440_v34 = vadd.f32 -1.4531521, %v2432_v59  ;;  %v1909_v11 = vadd.f32 %v1901_v57, %v1845_v44 }
 0x8a7   : > { %v1910_v53 = vadd.f32 %v1902_v25, %v1846_v51  ;;  %v2482_v17 = vmul.f32 %v6095_v48, %v2474_v58  ;;  %3651 = vpow2.f32 %v2525_v5  ;;  %v2029_v44 = vmul.f32 %v6965_v43, %v2005_v21  ;;  %v6966_v58 = vld [vmem:[#allocation26_spill] sm:$0xff] }
 0x8a8   : > { %v1965_v62 = vmul.f32 %v6964_v63, %v1941_v8  ;;  %v1966_v23 = vmul.f32 %v6964_v63, %v1942_v41  ;;  %v6169_v55 = vpop.permute.xlu1 %3110  ;;  %v2448_v18 = vmul.f32 %v6136_v39, %v2440_v34  ;;  %v2030_v57 = vmul.f32 %v6965_v43, %v2006_v7 }
 0x8a9   : > { %v2490_v41 = vadd.f32 0.2548296, %v2482_v17  ;;  %v2497_v21 = vmul.f32 %v6090_v35, %v2489_v16  ;;  %v2504_v35 = vsub.f32 0.0, %v6085_v15  ;;  %v3128_v20 = vsel %vm876_vm7, %v6176_v33, %v6131_v4 }
 0x8aa   : > { %v1973_v56 = vadd.f32 %v1965_v62, %v1909_v11  ;;  %v1974_v3 = vadd.f32 %v1966_v23, %v1910_v53  ;;  %v2455_v11 = vadd.f32 1.4214138, %v2447_v2  ;;  %v6193_v62 = vpop.eup %3645  ;;  %v2456_v34 = vadd.f32 1.4214138, %v2448_v18 }
 0x8ab   : > { %v2498_v16 = vmul.f32 %v6095_v48, %v2490_v41  ;;  %v2436_v18 = vmul.f32 1.0614054, %v6193_v62 }
 0x8ac   : > { %v2054_v8 = vpop.permute.xlu1 %2053  ;;  %v2037_v24 = vadd.f32 %v2029_v44, %v1973_v56  ;;  %v2038_v30 = vadd.f32 %v2030_v57, %v1974_v3  ;;  %v6204_v3 = vpop.eup %3647 }
 0x8ad   : > { %v2058_v31 = vsel %vm753_vm4, %v6044_v28, %v2054_v8  ;;  %v2062_v59 = vsel %vm753_vm4, %v2054_v8, %v6044_v28  ;;  %v2503_v8 = vsub.f32 0.0, %v6074_v27  ;;  %v3650_v44 = vpop.eup %3649  ;;  %v2435_v48 = vmul.f32 1.0614054, %v6204_v3 }
 0x8ae   : > { %v2069_v25 = vmul.f32 %v2062_v59, %v4189_v1  ;;  %v2070_v53 = vmul.f32 %v2058_v31, %v4192_v50  ;;  %v6967_v31 = vld [vmem:[#allocation30_spill] sm:$0xff] }
 0x8af   : > { %v2511_v41 = vmul.f32 %v2503_v8, %v6074_v27  ;;  %v6969_v8 = vld [vmem:[#allocation24_spill] sm:$0xff] }
 0x8b0   : > { %v2093_v5 = vmul.f32 %v6966_v58, %v2069_v25  ;;  %v2094_v51 = vmul.f32 %v6966_v58, %v2070_v53  ;;  %v2118_v63 = vpop.permute.xlu1 %2117  ;;  %v6191_v28 = vpop.permute.xlu0 %3149  ;;  %v2464_v25 = vmul.f32 %v6136_v39, %v2456_v34  ;;  %vm2378_vm10 = vcmp.ge.f32.partialorder %v6969_v8, 0.0 }
 0x8b1   : > { %v2122_v23 = vsel %vm794_vm5, %v6058_v14, %v2118_v63  ;;  %v2126_v29 = vsel %vm794_vm5, %v2118_v63, %v6058_v14  ;;  %v2463_v14 = vmul.f32 %v6119_v36, %v2455_v11  ;;  %v3652_v53 = vpop.eup %3651  ;;  %v2512_v11 = vmul.f32 %v2504_v35, %v6085_v15 }
 0x8b2   : > { %v2101_v7 = vadd.f32 %v2093_v5, %v2037_v24  ;;  %v2102_v2 = vadd.f32 %v2094_v51, %v2038_v30  ;;  %v2133_v17 = vmul.f32 %v2122_v23, %v4203_v12  ;;  %v2134_v56 = vmul.f32 %v2126_v29, %v4206_v42  ;;  %v6968_v29 = vld [vmem:[#allocation32_spill] sm:$0xff] }
 0x8b3   : > { %v2537_v24 = vmul.f32 %v3650_v44, %v2497_v21  ;;  %v2538_v51 = vmul.f32 %v3652_v53, %v2498_v16  ;;  %v2471_v63 = vadd.f32 -0.28449672, %v2463_v14  ;;  %v2444_v23 = vadd.f32 -1.4531521, %v2436_v18 }
 0x8b4   : > { %v2157_v59 = vmul.f32 %v6967_v31, %v2133_v17  ;;  %v2158_v43 = vmul.f32 %v6967_v31, %v2134_v56  ;;  %v3119_v5 = vpop.permute.xlu1 %3118  ;;  %vm2377_vm9 = vcmp.ge.f32.partialorder %v6968_v29, 0.0  ;;  %v2472_v34 = vadd.f32 -0.28449672, %v2464_v25 }
 0x8b5   : > { %v3210_v57 = vpop.permute.xlu0 %3209  ;;  %v2545_v21 = vsub.f32 1.0, %v2537_v24  ;;  %v3129_v27 = vsel %vm876_vm7, %v3119_v5, %v6169_v55  ;;  %v2519_v56 = vmul.f32 1.442695, %v2511_v41  ;;  %v2546_v15 = vsub.f32 1.0, %v2538_v51  ;;  %v6970_v51 = vld [vmem:[#allocation72_spill] sm:$0xff] }
 0x8b6   : > { %v6214_v30 = vadd.f32 %v2157_v59, %v2101_v7  ;;  %v6216_v58 = vadd.f32 %v2158_v43, %v2102_v2  ;;  %v3125_v7 = vsel %vm876_vm7, %v6169_v55, %v3119_v5  ;;  %v2443_v2 = vadd.f32 -1.4531521, %v2435_v48 }
 0x8b7   : > { %v2521_v35 = vmul.f32 1.442695, %v2512_v11  ;;  %v2479_v16 = vmul.f32 %v6119_v36, %v2471_v63  ;;  %v2452_v31 = vmul.f32 %v6193_v62, %v2444_v23  ;;  %v6751_v59 = vmov -1.0  }
 0x8b8   : > { %v2385_v43 = vsel %vm2377_vm9, 1.0, %v6751_v59  ;;  %v3134_v14 = vmul.f32 %v3125_v7, %v6810_v9  ;;  %v3135_v18 = vmul.f32 %v3129_v27, %v6811_v54  ;;  %v2480_v55 = vmul.f32 %v6136_v39, %v2472_v34 }
 0x8b9   : > { %v6222_v17 = vpop.permute.xlu0 %3050  ;;  %v2553_v25 = vmul.f32 %v2545_v21, %v2385_v43  ;;  %v2386_v53 = vsel %vm2378_vm10, 1.0, %v6751_v59  ;;  %v2451_v24 = vmul.f32 %v6204_v3, %v2443_v2  ;;  %3653 = vpow2.f32 %v2519_v56 }
 0x8ba   : > { %v2554_v48 = vmul.f32 %v2546_v15, %v2386_v53  ;;  %3655 = vpow2.f32 %v2521_v35  ;;  %v2508_v41 = vsub.f32 0.0, %v6113_v49  ;;  %v2460_v5 = vadd.f32 1.4214138, %v2452_v31  ;;  %v6971_v31 = vld [vmem:[#allocation54_spill] sm:$0xff] }
 0x8bb   : > { %v3158_v11 = vmul.f32 %v6970_v51, %v3134_v14  ;;  %v3159_v63 = vmul.f32 %v6970_v51, %v3135_v18  ;;  %v2487_v29 = vadd.f32 0.2548296, %v2479_v16  ;;  %v2488_v7 = vadd.f32 0.2548296, %v2480_v55  ;;  %v6972_v14 = vld [vmem:[#allocation50_spill] sm:$0xff]  ;;  %v6974_v51 = vld [vmem:[#allocation61_spill] sm:$0xff] }
 0x8bc   : > { %v2561_v27 = vadd.f32 1.0, %v2553_v25  ;;  %v2459_v2 = vadd.f32 1.4214138, %v2451_v24  ;;  %v2507_v56 = vsub.f32 0.0, %v6122_v38  ;;  %v2562_v35 = vadd.f32 1.0, %v2554_v48  ;;  %v6973_v25 = vld [vmem:[#allocation20_spill] sm:$0xff] }
 0x8bd   : > { %v3175_v44 = vpop.permute.xlu0 %3174  ;;  %v2361_v43 = vmul.f32 0.5, %v6971_v31  ;;  %v2362_v16 = vmul.f32 0.5, %v6972_v14  ;;  %v2516_v18 = vmul.f32 %v2508_v41, %v6113_v49  ;;  %v2468_v55 = vmul.f32 %v6193_v62, %v2460_v5 }
 0x8be   : > { %v3166_v53 = vadd.f32 %v3158_v11, %v6973_v25  ;;  %v2496_v48 = vmul.f32 %v6136_v39, %v2488_v7  ;;  %v2467_v31 = vmul.f32 %v6204_v3, %v2459_v2  ;;  %v2515_v14 = vmul.f32 %v2507_v56, %v6122_v38 }
 0x8bf   : > { %v2570_v5 = vmul.f32 %v2562_v35, %v2362_v16  ;;  %v2476_v42 = vadd.f32 -0.28449672, %v2468_v55  ;;  %v2529_v25 = vmul.f32 1.442695, %v2516_v18  ;;  %v6975_v55 = vmov -1.0  }
 0x8c0   : > { %v2527_v7 = vmul.f32 1.442695, %v2515_v14  ;;  %v2198_v14 = vmul.f32 %v2190_v47, %v4200_v46 }
 0x8c1   : > { %v3183_v23 = vpop.permute.xlu0 %3182  ;;  %v2484_v38 = vmul.f32 %v6193_v62, %v2476_v42  ;;  %3657 = vpow2.f32 %v2529_v25  ;;  %v2384_v42 = vsel %vm2376_vm12, 1.0, %v6975_v55 }
 0x8c2   : > { %v3189_v34 = vsel %vm917_vm8, %v3175_v44, %v3183_v23  ;;  %v3193_v21 = vsel %vm917_vm8, %v3183_v23, %v3175_v44  ;;  %v3167_v44 = vadd.f32 %v3159_v63, %v6974_v51  ;;  %3659 = vpow2.f32 %v2527_v7 }
 0x8c3   : > { %v3198_v8 = vmul.f32 %v5745_v13, %v3189_v34  ;;  %v3199_v15 = vmul.f32 %v5751_v52, %v3193_v21  ;;  %v2569_v34 = vmul.f32 %v2561_v27, %v2361_v43  ;;  %v2495_v21 = vmul.f32 %v6119_v36, %v2487_v29  ;;  %v3654_v11 = vpop.eup %3653 }
 0x8c4   : > { %v3656_v27 = vpop.eup %3655  ;;  %v2475_v29 = vadd.f32 -0.28449672, %v2467_v31  ;;  %v2492_v18 = vadd.f32 0.2548296, %v2484_v38  ;;  %v2197_v31 = vmul.f32 %v2186_v32, %v4195_v6  ;;  %v3133_v7 = vmul.f32 %v3128_v20, %v6811_v54 }
 0x8c5   : > { %v3222_v24 = vmul.f32 %v3210_v57, %v3198_v8  ;;  %v3223_v23 = vmul.f32 %v3210_v57, %v3199_v15  ;;  %v6255_v59 = vpop.permute.xlu1 %3153  ;;  %v6267_v36 = vpop.permute.xlu0 %3217  ;;  %v2535_v39 = vmul.f32 %v3654_v11, %v2495_v21  ;;  %v2536_v2 = vmul.f32 %v3656_v27, %v2496_v48 }
 0x8c6   : > { %v2483_v35 = vmul.f32 %v6204_v3, %v2475_v29  ;;  %v2500_v48 = vmul.f32 %v6193_v62, %v2492_v18  ;;  %v2388_v32 = vsel %vm2380_vm13, 1.0, %v6975_v55 }
 0x8c7   : > { %v3230_v49 = vadd.f32 %v3222_v24, %v3166_v53  ;;  %v3231_v41 = vadd.f32 %v3223_v23, %v3167_v44  ;;  %v2543_v15 = vsub.f32 1.0, %v2535_v39  ;;  %v2544_v43 = vsub.f32 1.0, %v2536_v2 }
 0x8c8   : > { %v2383_v53 = vsel %vm2375_vm11, 1.0, %v6975_v55  ;;  %v2491_v24 = vadd.f32 0.2548296, %v2483_v35  ;;  %v6978_v35 = vld [vmem:[#allocation38_spill] sm:$0xff] }
 0x8c9   : > { %v6261_v63 = vmul.f32 %v3230_v49, %v2569_v34  ;;  %v6263_v57 = vpop.permute.xlu1 %3048  ;;  %v6265_v8 = vmul.f32 %v3231_v41, %v2570_v5  ;;  %v6275_v16 = vpop.permute.xlu0 %3120  ;;  %v2551_v44 = vmul.f32 %v2543_v15, %v2383_v53  ;;  %v2552_v23 = vmul.f32 %v2544_v43, %v2384_v42  ;;  %v6976_v34 = vld [vmem:[#allocation44_spill] sm:$0xff] }
 0x8ca   : > { %v2359_v21 = vmul.f32 0.5, %v6976_v34  ;;  %v3124_v49 = vsel %vm876_vm7, %v6131_v4, %v6176_v33  ;;  %v2499_v25 = vmul.f32 %v6204_v3, %v2491_v24 }
 0x8cb   : > { %v2559_v11 = vadd.f32 1.0, %v2551_v44  ;;  %v3658_v27 = vpop.eup %3657  ;;  %v2560_v4 = vadd.f32 1.0, %v2552_v23  ;;  %v3132_v33 = vmul.f32 %v3124_v49, %v6810_v9 }
 0x8cc   : > { %v2540_v2 = vmul.f32 %v3658_v27, %v2500_v48  ;;  %v3660_v38 = vpop.eup %3659  ;;  %v6979_v48 = vld [vmem:[#allocation69_spill] sm:$0xff] }
 0x8cd   : > { %v6270_v56 = vpop.permute.xlu1 %3056  ;;  %v6299_v41 = vpop.permute.xlu0 %3176  ;;  %v2539_v47 = vmul.f32 %v3660_v38, %v2499_v25  ;;  %v2567_v38 = vmul.f32 %v2559_v11, %v2359_v21 }
 0x8ce   : > { %v2548_v20 = vsub.f32 1.0, %v2540_v2 }
 0x8d1   : > { %v3173_v51 = vpop.permute.xlu1 %3172  ;;  %v6335_v49 = vpop.permute.xlu0 %3058 }
 0x8d5   : > { %v2246_v22 = vpop.permute.xlu1 %2245  ;;  %v3185_v11 = vpop.permute.xlu0 %3184 }
 0x8d6   : > { %v2250_v62 = vsel %vm876_vm7, %v6080_v61, %v2246_v22  ;;  %v2254_v5 = vsel %vm876_vm7, %v2246_v22, %v6080_v61  ;;  %v6977_v61 = vld [vmem:[#allocation62_spill] sm:$0xff] }
 0x8d7   : > { %v2261_v39 = vmul.f32 %v2250_v62, %v6810_v9  ;;  %v2262_v29 = vmul.f32 %v2254_v5, %v6811_v54  ;;  %v2221_v15 = vmul.f32 %v6977_v61, %v2197_v31  ;;  %v2222_v3 = vmul.f32 %v6977_v61, %v2198_v14  ;;  %v6980_v62 = vld [vmem:[#allocation25_spill] sm:$0xff] }
 0x8d8   : > { %v3156_v31 = vmul.f32 %v6979_v48, %v3132_v33  ;;  %v3157_v14 = vmul.f32 %v6979_v48, %v3133_v7  ;;  %v6354_v7 = vld [vmem:[%s6599_s12 + $0x10] ss:$0 sm:$0xff]  ;;  %v2360_v61 = vmul.f32 0.5, %v5934_v40 }
 0x8d9   : > { %v2285_v43 = vmul.f32 %v6978_v35, %v2261_v39  ;;  %v2286_v18 = vmul.f32 %v6978_v35, %v2262_v29  ;;  %v2310_v53 = vpop.permute.xlu1 %2309  ;;  %v2229_v44 = vadd.f32 %v2221_v15, %v6214_v30  ;;  %v2230_v24 = vadd.f32 %v2222_v3, %v6216_v58  ;;  %v6983_v40 = vld [vmem:[#allocation73_spill] sm:$0xff] }
 0x8da   : > { %v2314_v45 = vsel %vm917_vm8, %v6088_v60, %v2310_v53  ;;  %v2318_v42 = vsel %vm917_vm8, %v2310_v53, %v6088_v60  ;;  %v3062_v60 = vsel %vm835_vm6, %v6263_v57, %v6270_v56  ;;  %v2547_v39 = vsub.f32 1.0, %v2539_v47  ;;  %v6982_v47 = vld [vmem:[#allocation65_spill] sm:$0xff] }
 0x8db   : > { %v2325_v23 = vmul.f32 %v5745_v13, %v2314_v45  ;;  %v2326_v34 = vmul.f32 %v5751_v52, %v2318_v42  ;;  %v2293_v22 = vadd.f32 %v2285_v43, %v2229_v44  ;;  %v2294_v30 = vadd.f32 %v2286_v18, %v2230_v24  ;;  %v6981_v45 = vld [vmem:[#allocation10_spill] sm:$0xff] }
 0x8dc   : > { %v3066_v52 = vsel %vm835_vm6, %v6270_v56, %v6263_v57  ;;  %v6360_v57 = vld [vmem:[%s6599_s12 + $0x18] ss:$0 sm:$0xff]  ;;  %v2556_v15 = vmul.f32 %v2548_v20, %v2388_v32  ;;  %v2387_v53 = vsel %vm2379_vm14, 1.0, %v6975_v55  ;;  %v3164_v42 = vadd.f32 %v3156_v31, %v6981_v45  ;;  %v6986_v45 = vld [vmem:[#allocation28_spill] sm:$0xff] }
 0x8dd   : > { %v2349_v58 = vmul.f32 %v6980_v62, %v2325_v23  ;;  %v2350_v13 = vmul.f32 %v6980_v62, %v2326_v34  ;;  %v3181_v5 = vpop.permute.xlu1 %3180  ;;  %v3073_v3 = vmul.f32 %v3066_v52, %v4200_v46  ;;  %v3165_v21 = vadd.f32 %v3157_v14, %v6982_v47 }
 0x8de   : > { %v3188_v25 = vsel %vm917_vm8, %v3173_v51, %v3181_v5  ;;  %v3192_v27 = vsel %vm917_vm8, %v3181_v5, %v3173_v51  ;;  %v3072_v51 = vmul.f32 %v3062_v60, %v4195_v6  ;;  %v2568_v34 = vmul.f32 %v2560_v4, %v2360_v61  ;;  %v6984_v60 = vld [vmem:[#allocation67_spill] sm:$0xff] }
 0x8df   : > { %v6347_v29 = vadd.f32 %v2349_v58, %v2293_v22  ;;  %v6349_v33 = vadd.f32 %v2350_v13, %v2294_v30  ;;  %v3196_v2 = vmul.f32 %v6354_v7, %v3188_v25  ;;  %v3197_v56 = vmul.f32 %v6360_v57, %v3192_v27 }
 0x8e0   : > { %v2555_v48 = vmul.f32 %v2547_v39, %v2387_v53  ;;  %v3096_v20 = vmul.f32 %v6984_v60, %v3072_v51  ;;  %v2564_v30 = vadd.f32 1.0, %v2556_v15  ;;  %v3097_v31 = vmul.f32 %v6984_v60, %v3073_v3  ;;  %v6985_v3 = vld [vmem:[#allocation55_spill] sm:$0xff] }
 0x8e1   : > { %v6367_v35 = vmul.f32 0.70710677, %v6347_v29  ;;  %v6370_v43 = vmul.f32 0.70710677, %v6349_v33  ;;  %v3214_v18 = vpop.permute.xlu1 %3213  ;;  %v3220_v32 = vmul.f32 %v6983_v40, %v3196_v2  ;;  %v3221_v44 = vmul.f32 %v6983_v40, %v3197_v56 }
 0x8e2   : > { %v3190_v14 = vsel %vm917_vm8, %v6299_v41, %v3185_v11  ;;  %v3194_v27 = vsel %vm917_vm8, %v3185_v11, %v6299_v41  ;;  %v2563_v56 = vadd.f32 1.0, %v2555_v48  ;;  %v3104_v53 = vadd.f32 %v3096_v20, %v6985_v3 }
 0x8e3   : > { %v2397_v24 = vand.u32 2147483647, %v6367_v35  ;;  %v2398_v23 = vand.u32 2147483647, %v6370_v43  ;;  %v3228_v22 = vadd.f32 %v3220_v32, %v3164_v42  ;;  %v3229_v26 = vadd.f32 %v3221_v44, %v3165_v21 }
 0x8e4   : > { %v3200_v42 = vmul.f32 %v6354_v7, %v3190_v14  ;;  %v3201_v41 = vmul.f32 %v6360_v57, %v3194_v27  ;;  %vm2381_vm15 = vcmp.ge.f32.partialorder %v6367_v35, 0.0  ;;  %vm2382_vm0 = vcmp.ge.f32.partialorder %v6370_v43, 0.0 }
 0x8e5   : > { %v2405_v62 = vmul.f32 0.3275911, %v2397_v24  ;;  %v2406_v58 = vmul.f32 0.3275911, %v2398_v23  ;;  %v3113_v13 = vpop.permute.xlu1 %3112  ;;  %v3238_v5 = vmul.f32 %v3228_v22, %v2567_v38  ;;  %v3239_v25 = vmul.f32 %v3229_v26, %v2568_v34 }
 0x8e6   : > { %v3126_v4 = vsel %vm876_vm7, %v3113_v13, %v6275_v16  ;;  %v3130_v52 = vsel %vm876_vm7, %v6275_v16, %v3113_v13  ;;  %v3105_v16 = vadd.f32 %v3097_v31, %v6986_v45  ;;  %v3224_v44 = vmul.f32 %v3214_v18, %v3200_v42  ;;  %v6993_v42 = vld [vmem:[#allocation47_spill] sm:$0xff] }
 0x8e7   : > { %v2413_v39 = vadd.f32 1.0, %v2405_v62  ;;  %v2414_v2 = vadd.f32 1.0, %v2406_v58  ;;  %v3136_v51 = vmul.f32 %v3126_v4, %v6810_v9  ;;  %v3137_v38 = vmul.f32 %v3130_v52, %v6811_v54  ;;  %v6989_v4 = vld [vmem:[#allocation36_spill] sm:$0xff] }
 0x8e8   : > { %v3476_v61 = vpack.c.bf16 %v6265_v8, %v3239_v25  ;;  %v3478_v15 = vpack.c.bf16 %v6261_v63, %v3238_v5  ;;  %v6987_v8 = vld [vmem:[#allocation66_spill] sm:$0xff]  ;;  %v6988_v63 = vld [vmem:[#allocation31_spill] sm:$0xff]  ;;  %v3225_v34 = vmul.f32 %v3214_v18, %v3201_v41  ;;  %v2509_v62 = vsub.f32 0.0, %v2397_v24 }
 0x8e9   : > { %3661 = vrcp.f32 %v2413_v39  ;;  %v6402_v47 = vpop.permute.xlu1 %3114  ;;  %v3160_v21 = vmul.f32 %v6191_v28, %v3136_v51  ;;  %v3161_v11 = vmul.f32 %v6191_v28, %v3137_v38  ;;  %v2363_v40 = vmul.f32 0.5, %v6987_v8  ;;  %v6990_v51 = vld [vmem:[#allocation11_spill] sm:$0xff] }
 0x8ea   : > { %3663 = vrcp.f32 %v2414_v2  ;;  %3477 = vmatprep.subr.bf16.mxu1 %v3476_v61  ;;  %v2364_v32 = vmul.f32 0.5, %v6988_v63  ;;  %v2510_v58 = vsub.f32 0.0, %v2398_v23  ;;  %v2366_v10 = vmul.f32 0.5, %v6349_v33 }
 0x8eb   : > { %3479 = vmatpush1.bf16.msra.mxu1 %v3478_v15  ;;  %v3168_v48 = vadd.f32 %v3160_v21, %v3104_v53  ;;  %v3169_v60 = vadd.f32 %v3161_v11, %v3105_v16  ;;  %v2571_v14 = vmul.f32 %v2563_v56, %v2363_v40  ;;  %v6991_v53 = vld [vmem:[#allocation75_spill] sm:$0xff]  ;;  %v6992_v16 = vld [vmem:[#allocation78_spill] sm:$0xff]  ;;  %v3063_v11 = vsel %vm835_vm6, %v6222_v17, %v6335_v49 }
 0x8ec   : > { %v2572_v26 = vmul.f32 %v2564_v30, %v2364_v32  ;;  %v2517_v30 = vmul.f32 %v2509_v62, %v2397_v24  ;;  %v2518_v2 = vmul.f32 %v2510_v58, %v2398_v23  ;;  %v2722_v41 = vmul.f32 %v6993_v42, %v6992_v16  ;;  %v6994_v23 = vld [vmem:[#allocation17_spill] sm:$0xff]  ;;  %v6998_v62 = vld [vmem:[#allocation35_spill] sm:$0xff] }
 0x8ed   : > { %v6409_v20 = vpop.permute.xlu1 %3178  ;;  %v3232_v22 = vadd.f32 %v3224_v44, %v3168_v48  ;;  %v3233_v31 = vadd.f32 %v3225_v34, %v3169_v60  ;;  %v6995_v32 = vld [vmem:[#allocation37_spill] sm:$0xff]  ;;  %v6996_v48 = vld [vmem:[#allocation12_spill] sm:$0xff]  ;;  %v7007_v33 = vmov 0.0  }
 0x8ee   : > { %v2531_v21 = vmul.f32 1.442695, %v2517_v30  ;;  %v2533_v40 = vmul.f32 1.442695, %v2518_v2 }
 0x8ef   : > { %v6411_v13 = vmul.f32 %v3233_v31, %v2572_v26  ;;  %v6413_v28 = vmul.f32 %v3232_v22, %v2571_v14  ;;  %v6997_v22 = vld [vmem:[#allocation13_spill] sm:$0xff] }
 0x8f0   : > { %3665 = vpow2.f32 %v2531_v21 }
 0x8f1   : > { %v2739_v5 = vpop.permute.xlu1 %2738  ;;  %3667 = vpow2.f32 %v2533_v40 }
 0x8f2   : > { %v2743_v52 = vsel %vm630_vm1, %v6989_v4, %v2739_v5  ;;  %v2747_v18 = vsel %vm630_vm1, %v2739_v5, %v6989_v4  ;;  %vm3246_vm1 = vcmask 261120  }
 0x8f3   : > { %v6421_v25 = vpop.eup %3661  ;;  %v2754_v56 = vmul.f32 %v2747_v18, %v6894_v37  ;;  %v2755_v38 = vmul.f32 %v2743_v52, %v6990_v51  ;;  %v2723_v37 = vmul.f32 %v6993_v42, %v6994_v23  ;;  %v3067_v52 = vsel %vm835_vm6, %v6335_v49, %v6222_v17  ;;  %v7000_v17 = vld [vmem:[#allocation41_spill] sm:$0xff]  ;;  %v7001_v49 = vld [vmem:[#allocation59_spill] sm:$0xff] }
 0x8f4   : > { %v6423_v27 = vpop.eup %3663  ;;  %v2437_v39 = vmul.f32 1.0614054, %v6421_v25  ;;  %v3075_v23 = vmul.f32 %v3067_v52, %v4200_v46 }
 0x8f5   : > { %v2803_v61 = vpop.permute.xlu1 %2802  ;;  %v2438_v15 = vmul.f32 1.0614054, %v6423_v27  ;;  %v2778_v44 = vmul.f32 %v6995_v32, %v2754_v56  ;;  %v2779_v34 = vmul.f32 %v6995_v32, %v2755_v38  ;;  %v7003_v32 = vld [vmem:[#allocation63_spill] sm:$0xff] }
 0x8f6   : > { %v2445_v3 = vadd.f32 -1.4531521, %v2437_v39  ;;  %v2807_v45 = vsel %vm671_vm2, %v6991_v53, %v2803_v61  ;;  %v2811_v24 = vsel %vm671_vm2, %v2803_v61, %v6991_v53  ;;  %v3074_v39 = vmul.f32 %v3063_v11, %v4195_v6  ;;  %v6999_v61 = vld [vmem:[#allocation56_spill] sm:$0xff] }
 0x8f7   : > { %v2446_v63 = vadd.f32 -1.4531521, %v2438_v15  ;;  %v2818_v60 = vmul.f32 %v2811_v24, %v6996_v48  ;;  %v2819_v26 = vmul.f32 %v2807_v45, %v6997_v22  ;;  %v2786_v51 = vadd.f32 %v2778_v44, %v2722_v41  ;;  %v7004_v22 = vld [vmem:[#allocation46_spill] sm:$0xff] }
 0x8f8   : > { %v2453_v8 = vmul.f32 %v6421_v25, %v2445_v3  ;;  %v2787_v38 = vadd.f32 %v2779_v34, %v2723_v37  ;;  %v7002_v37 = vld [vmem:[#allocation71_spill] sm:$0xff] }
 0x8f9   : > { %v2867_v31 = vpop.permute.xlu1 %2866  ;;  %v2454_v4 = vmul.f32 %v6423_v27, %v2446_v63  ;;  %v2842_v15 = vmul.f32 %v6999_v61, %v2818_v60  ;;  %v2843_v3 = vmul.f32 %v6999_v61, %v2819_v26  ;;  %v3098_v21 = vmul.f32 %v7002_v37, %v3074_v39 }
 0x8fa   : > { %v2461_v14 = vadd.f32 1.4214138, %v2453_v8  ;;  %v2871_v58 = vsel %vm712_vm3, %v6998_v62, %v2867_v31  ;;  %v2875_v5 = vsel %vm712_vm3, %v2867_v31, %v6998_v62  ;;  %v7005_v62 = vld [vmem:[#allocation14_spill] sm:$0xff] }
 0x8fb   : > { %v2882_v18 = vmul.f32 %v2875_v5, %v4168_v0  ;;  %v2883_v30 = vmul.f32 %v2871_v58, %v4171_v19  ;;  %v2462_v56 = vadd.f32 1.4214138, %v2454_v4  ;;  %v2850_v40 = vadd.f32 %v2842_v15, %v2786_v51 }
 0x8fc   : > { %v2469_v2 = vmul.f32 %v6421_v25, %v2461_v14  ;;  %v2851_v63 = vadd.f32 %v2843_v3, %v2787_v38  ;;  %v3099_v5 = vmul.f32 %v7002_v37, %v3075_v23  ;;  %v2390_v37 = vsel %vm2382_vm0, 1.0, %v6975_v55 }
 0x8fd   : > { %v2931_v53 = vpop.permute.xlu1 %2930  ;;  %v2470_v6 = vmul.f32 %v6423_v27, %v2462_v56  ;;  %v2906_v24 = vmul.f32 %v7001_v49, %v2882_v18  ;;  %v2907_v16 = vmul.f32 %v7001_v49, %v2883_v30  ;;  %v3666_v18 = vpop.eup %3665 }
 0x8fe   : > { %v2477_v45 = vadd.f32 -0.28449672, %v2469_v2  ;;  %v2935_v0 = vsel %vm753_vm4, %v7000_v17, %v2931_v53  ;;  %v2939_v19 = vsel %vm753_vm4, %v2931_v53, %v7000_v17  ;;  %v7006_v2 = vld [vmem:[#allocation68_spill] sm:$0xff]  ;;  %v3668_v61 = vpop.eup %3667 }
 0x8ff   : > { %v2946_v42 = vmul.f32 %v2939_v19, %v4189_v1  ;;  %v2947_v41 = vmul.f32 %v2935_v0, %v4192_v50  ;;  %v2478_v8 = vadd.f32 -0.28449672, %v2470_v6  ;;  %v2914_v26 = vadd.f32 %v2906_v24, %v2850_v40 }
 0x900   : > { %v2485_v11 = vmul.f32 %v6421_v25, %v2477_v45  ;;  %v2915_v31 = vadd.f32 %v2907_v16, %v2851_v63  ;;  %v2389_v19 = vsel %vm2381_vm15, 1.0, %v6975_v55 }
 0x901   : > { %v2970_v44 = vmul.f32 %v7003_v32, %v2946_v42  ;;  %v2971_v34 = vmul.f32 %v7003_v32, %v2947_v41  ;;  %v2995_v48 = vpop.permute.xlu1 %2994  ;;  %v2486_v46 = vmul.f32 %v6423_v27, %v2478_v8 }
 0x902   : > { %v2493_v60 = vadd.f32 0.2548296, %v2485_v11  ;;  %v2999_v1 = vsel %vm794_vm5, %v7004_v22, %v2995_v48  ;;  %v3003_v50 = vsel %vm794_vm5, %v2995_v48, %v7004_v22  ;;  %v3237_v22 = vld [vmem:[%s6598_s11 + $0x8] sm:$0xff] }
 0x903   : > { %v3010_v14 = vmul.f32 %v2999_v1, %v4203_v12  ;;  %v3011_v58 = vmul.f32 %v3003_v50, %v7005_v62  ;;  %v2494_v52 = vadd.f32 0.2548296, %v2486_v46  ;;  %v2978_v30 = vadd.f32 %v2970_v44, %v2914_v26  ;;  %v7009_v46 = vld [vmem:[#allocation16_spill] sm:$0xff] }
 0x904   : > { %v2501_v4 = vmul.f32 %v6421_v25, %v2493_v60  ;;  %v2979_v39 = vadd.f32 %v2971_v34, %v2915_v31 }
 0x905   : > { %v3034_v56 = vmul.f32 %v7006_v2, %v3010_v14  ;;  %v3035_v51 = vmul.f32 %v7006_v2, %v3011_v58  ;;  %v3123_v38 = vpop.permute.xlu1 %3122  ;;  %v2502_v25 = vmul.f32 %v6423_v27, %v2494_v52  ;;  %v7010_v14 = vld [vmem:[#allocation8_spill] sm:$0xff] }
 0x906   : > { %v2541_v15 = vmul.f32 %v3666_v18, %v2501_v4  ;;  %v3127_v12 = vsel %vm876_vm7, %v6402_v47, %v3123_v38  ;;  %v3131_v3 = vsel %vm876_vm7, %v3123_v38, %v6402_v47 }
 0x907   : > { %v3042_v53 = vadd.f32 %v3034_v56, %v2978_v30  ;;  %v3043_v45 = vadd.f32 %v3035_v51, %v2979_v39  ;;  %v3138_v17 = vmul.f32 %v3127_v12, %v6810_v9  ;;  %v3139_v0 = vmul.f32 %v3131_v3, %v6811_v54 }
 0x908   : > { %v2549_v6 = vsub.f32 1.0, %v2541_v15  ;;  %v2542_v49 = vmul.f32 %v3668_v61, %v2502_v25 }
 0x909   : > { %v3106_v24 = vadd.f32 %v3098_v21, %v3042_v53  ;;  %v3107_v16 = vadd.f32 %v3099_v5, %v3043_v45  ;;  %v3162_v47 = vmul.f32 %v6255_v59, %v3138_v17  ;;  %v3163_v27 = vmul.f32 %v6255_v59, %v3139_v0  ;;  %v3187_v42 = vpop.permute.xlu1 %3186  ;;  %v7011_v5 = vld [vmem:[#allocation9_spill] sm:$0xff] }
 0x90a   : > { %v2557_v41 = vmul.f32 %v2549_v6, %v2389_v19  ;;  %v3191_v9 = vsel %vm917_vm8, %v6409_v20, %v3187_v42  ;;  %v3195_v54 = vsel %vm917_vm8, %v3187_v42, %v6409_v20  ;;  %v2550_v35 = vsub.f32 1.0, %v2542_v49 }
 0x90b   : > { %v3202_v43 = vmul.f32 %v6354_v7, %v3191_v9  ;;  %v3203_v23 = vmul.f32 %v6360_v57, %v3195_v54  ;;  %v2365_v21 = vmul.f32 0.5, %v6347_v29  ;;  %v3170_v8 = vadd.f32 %v3162_v47, %v3106_v24 }
 0x90c   : > { %v2565_v59 = vadd.f32 1.0, %v2557_v41  ;;  %v2558_v11 = vmul.f32 %v2550_v35, %v2390_v37  ;;  %v3171_v40 = vadd.f32 %v3163_v27, %v3107_v16 }
 0x90d   : > { %v3226_v63 = vmul.f32 %v6267_v36, %v3202_v43  ;;  %v3227_v32 = vmul.f32 %v6267_v36, %v3203_v23  ;;  %v3236_v36 = vld [vmem:[%s6598_s11] sm:$0xff] }
 0x90e   : > { %v2573_v20 = vmul.f32 %v2565_v59, %v2365_v21  ;;  %v2566_v44 = vadd.f32 1.0, %v2558_v11 }
 0x90f   : > { %v3234_v7 = vadd.f32 %v3226_v63, %v3170_v8  ;;  %v3235_v34 = vadd.f32 %v3227_v32, %v3171_v40 }
 0x910   : > { %v2574_v57 = vmul.f32 %v2566_v44, %v2366_v10 }
 0x911   : > { %v3244_v48 = vmul.f32 %v3234_v7, %v2573_v20 }
 0x912   : > { %v3245_v55 = vmul.f32 %v3235_v34, %v2574_v57 }
 0x913   : > { %v3482_v29 = vpack.c.bf16 %v3244_v48, %v6413_v28 }
 0x914   : > { %v3480_v60 = vpack.c.bf16 %v3245_v55, %v6411_v13  ;;  %v7008_v13 = vld [vmem:[#allocation15_spill] sm:$0xff] }
 0x916   : > { %3481 = vmatprep.subr.bf16.mxu1 %v3480_v60 }
 0x917   : > { %3483 = vmatpush1.bf16.msra.mxu1 %v3482_v29 }
 0x91a   : > { %3439 = vmatmul.mubr.msk.f32.vlgmr.msra.gmra.mrb[16].mxu1 %vm3246_vm1, %v3236_v36 }
 0x91b   : > { %3323 = vmatprep.mubr.f32.mxu1 %v7007_v33 }
 0x91e   : > { %3440 = vmatmul.mubr.msk.f32.gmra.mrb[18].mxu1 %vm3246_vm1, %v3237_v22 }
 0x9ed   : > { %v3319_v28 = vpop.f32.mrb[16].mxu1 }
 0x9ee   : > { %v3330_v1 = vadd.f32 %v3319_v28, %v7008_v13  ;;  %v3321_v50 = vpop.f32.mrb[17].mxu1 }
 0x9ef   : > { %v3331_v26 = vadd.f32 %v3321_v50, %v7009_v46 }
 0x9f0   : > { %3334 = vst [vmem:[%s433_s3] sm:$0xff] %v3330_v1 }
 0x9f1   : > { %3335 = vst [vmem:[%s433_s3 + $0x8] sm:$0xff] %v3331_v26  ;;  %v3325_v31 = vpop.f32.mrb[18].mxu1 }
 0x9f2   : > { %v3332_v62 = vadd.f32 %v3325_v31, %v7010_v14  ;;  %v3327_v58 = vpop.f32.mrb[19].mxu1 }
 0x9f3   : > { %v3333_v4 = vadd.f32 %v3327_v58, %v7011_v5 }
 0x9f4   : > { %3336 = vst [vmem:[%s433_s3 + $0x10] sm:$0xff] %v3332_v62 }
 0x9f5   : > { %3337 = vst [vmem:[%s433_s3 + $0x18] sm:$0xff] %v3333_v4 }
 0x9f6   : > { %3693 = shalt.err (!%p3690_p3)
}
 0x9f7   : > { %s3694_s23 = scalar_lea.hbm %s6543_s27, 512  ;;  %s3698_s20 = scalar_lea.hbm %s6600_s13, 1024 }
 0x9f8   : > { %p3695_p4 = scmp.ne.s32.totalorder %s6543_s27, %s3694_s23  ;;  %p3699_p9 = scmp.lt.u32.totalorder %s6543_s27, %s6600_s13 }
 0x9f9   : > { %p3700_p10 = scmp.lt.u32.totalorder %s3698_s20, %s3694_s23  ;;  %p3702_p12 = scmp.lt.u32.totalorder %s3694_s23, %s6543_s27 }
 0x9fa   : > { %p3696_p7 = pnand %p3695_p4, %p3873_p5 }
 0x9fb   : > { %p3701_p11 = por %p3700_p10, %p3699_p9 }
 0x9fc   : > { %p3697_p8 = pneg %p3696_p7 }
 0x9fd   : > { %p3703_p13 = por %p3702_p12, %p3701_p11 }
 0x9ff   : > { %p3704_p0 = pnand %p3703_p13, %p3697_p8 }
 0xa01   : > { %3707 = shalt.err (!%p3704_p0)
}
 0xa02   : > { %s3764_s3 = smov 256  }
 0xa03   : > { %3484 = dma.vmem_to_hbm [thread:$0]  (%p3873_p5), %s6536_s4, 512, %s6543_s27, %s6545_s29, %s3764_s3, %s3764_s3, %s6769_s16  }
 0xa04 PF: > { %p3490_p1 = scmp.ge.s32.totalorder %s3742_s28, 2  ;;  %s3367_s0 = sand.u32 1, %s3730_s25  }
 0xa05   : > { %s3368_s5 = scalar_lea.sflag [#allocation3], %s3367_s0 }
 0xa06   : > { %p3487_p2 = pnand %p3490_p1, %p3877_p6 }
 0xa08   : > { %3725 = dma.done.wait (!%p3487_p2), %s3368_s5, 512  }
 0xa09   : > { %3727 = vsyncadd (!%p3487_p2), %s3368_s5, 4294966784  ;;  %s7012_s6 = sld [smem:[#allocation5_spill]]  ;;  %s7013_s27 = sld [smem:[#allocation6_spill]] }
 0xa0a   : > { %p23_p3 = scmp.ge.s32.totalorder %s3860_s14, 4   ;;  %s7014_s25 = smov %s3734_s26 }
 0xa0b   : > { %s7016_s28 = smov %s3860_s14 }
 0xa0c   :  { %25 = sbr.rel (!%p23_p3) target bundleno = 11 (0xb), region = 107 }
 0xa0f   : > { %s7015_s26 = smov %s7012_s6 }
 0xa13   :  { %3373 = vsyncpa [#allocation3], 1 }
 0xa14   :  { %3375 = vsyncpa [#allocation3 + $0x1], 1 }

</bundles_post_ra>
